<compile_context>
chip_gen: v5e
topology: v5e:2x2
jax: 0.10.0
libtpu: 0.0.40
codegen_flags: <defaults>
</compile_context>

<pallas_src>
import functools

import jax
import jax.numpy as jnp
import numpy as np
from jax.experimental import pallas as pl
from jax.experimental.pallas import tpu as pltpu

_LANE = 128
_MIB = 1024 * 1024


def _round_up(x, m):
    return (x + m - 1) // m * m


def _pick_tile(n, preferred):
    """Largest multiple of 128 that divides n and is <= preferred (n % 128 == 0)."""
    preferred = max(int(preferred), _LANE)
    if n <= preferred:
        return n
    t = (preferred // _LANE) * _LANE
    while t > _LANE and n % t:
        t -= _LANE
    return t


def _vmem_limit_bytes():
    """Per-generation VMEM limit: ~3/4 of physical (48 MiB v7x, 96 MiB v5e/v6e)."""
    cap = 64 * _MIB  # conservative default: v7x physical VMEM
    try:
        cap = int(getattr(pltpu.get_tpu_info(), "vmem_capacity_bytes", cap))
    except Exception:
        pass
    return max(32 * _MIB, min(3 * cap // 4, 96 * _MIB))


# --------------------------------------------------------------------------- #
# Kernels
# --------------------------------------------------------------------------- #
def _gc1_kernel(adj_ref, xa_ref, w1a_ref, w2_ref, b2_ref, p2_ref, acc_ref, *,
                feat_resident):
    """Layer-1 aggregation (A @ [x,1]) with fused layer-1 + layer-2 projections."""
    k = pl.program_id(1)

    @pl.when(k == 0)
    def _init():
        acc_ref[...] = jnp.zeros_like(acc_ref)

    if feat_resident:
        bk = adj_ref.shape[1]
        xa = xa_ref[pl.ds(pl.multiple_of(k * bk, bk), bk), :]
    else:
        xa = xa_ref[...]
    acc_ref[...] += jnp.dot(adj_ref[...], xa, preferred_element_type=jnp.float32)

    @pl.when(k == pl.num_programs(1) - 1)
    def _finalize():
        h1 = jnp.maximum(
            jnp.dot(acc_ref[...], w1a_ref[...],
                    preferred_element_type=jnp.float32), 0.0)
        p2 = jnp.dot(h1, w2_ref[...],
                     preferred_element_type=jnp.float32) + b2_ref[...]
        p2_ref[...] = p2.astype(p2_ref.dtype)


def _gc2_kernel(adj_ref, p2_ref, w3_ref, b3_ref, out_ref, acc_ref, *,
                feat_resident):
    """Layer-2 aggregation (A @ p2) with fused ReLU + output projection."""
    k = pl.program_id(1)

    @pl.when(k == 0)
    def _init():
        acc_ref[...] = jnp.zeros_like(acc_ref)

    if feat_resident:
        bk = adj_ref.shape[1]
        p2 = p2_ref[pl.ds(pl.multiple_of(k * bk, bk), bk), :]
    else:
        p2 = p2_ref[...]
    acc_ref[...] += jnp.dot(adj_ref[...], p2, preferred_element_type=jnp.float32)

    @pl.when(k == pl.num_programs(1) - 1)
    def _finalize():
        h2 = jnp.maximum(acc_ref[...], 0.0)
        out_ref[...] = (jnp.dot(h2, w3_ref[...],
                                preferred_element_type=jnp.float32)
                        + b3_ref[...]).astype(out_ref.dtype)


def _fused_kernel(adj_ref, xa_ref, w1a_ref, w2_ref, b2_ref, w3_ref, b3_ref,
                  out_ref, p2_ref, *, bm):
    """Small-graph path: adj fully VMEM-resident, both layers in one call.

    grid = (2, row_tiles): phase 0 writes p2 (row tile by row tile) into a
    persistent VMEM scratch; phase 1 aggregates against the complete p2 and
    projects the output.  adj is read from HBM once; p2 never leaves VMEM.
    The output block is resident (constant index map) so it is written back
    exactly once at the end of the grid.
    """
    phase = pl.program_id(0)
    j = pl.program_id(1)
    row0 = pl.multiple_of(j * bm, bm)
    a_rows = adj_ref[pl.ds(row0, bm), :]

    @pl.when(phase == 0)
    def _layer1():
        agg1 = jnp.dot(a_rows, xa_ref[...], preferred_element_type=jnp.float32)
        h1 = jnp.maximum(
            jnp.dot(agg1, w1a_ref[...], preferred_element_type=jnp.float32), 0.0)
        p2 = jnp.dot(h1, w2_ref[...],
                     preferred_element_type=jnp.float32) + b2_ref[...]
        p2_ref[pl.ds(row0, bm), :] = p2.astype(p2_ref.dtype)

    @pl.when(phase == 1)
    def _layer2():
        h2 = jnp.maximum(
            jnp.dot(a_rows, p2_ref[...], preferred_element_type=jnp.float32), 0.0)
        out_ref[pl.ds(row0, bm), :] = (
            jnp.dot(h2, w3_ref[...], preferred_element_type=jnp.float32)
            + b3_ref[...]).astype(out_ref.dtype)


# --------------------------------------------------------------------------- #
# Wrapper
# --------------------------------------------------------------------------- #
@functools.partial(jax.jit,
                   static_argnames=("block_m", "block_k", "allow_fused",
                                    "feature_resident"))
def gnn_forward(x, adj, w1, b1, w2, b2, w3, b3, *,
                block_m=512, block_k=2048, allow_fused=True,
                feature_resident=None):
    """x: (N, C_in) f32, adj: (N, N) f32 or bf16.  Weights stored (in, out),
    biases (out,) -- identical math to PyTorch's x @ W.T + b.
    Returns (1, N, C_out) float32."""
    n, c_in = x.shape
    h = w1.shape[1]
    c_out = w3.shape[1]
    c_aug = c_in + 1

    agg_dtype = adj.dtype            # pass bf16 adj to halve the dominant stream
    f32 = jnp.float32
    s_adj = jnp.dtype(agg_dtype).itemsize

    hp = _round_up(h, _LANE)         # lane-dense hidden width
    cp = _round_up(c_out, _LANE)     # lane-dense output width
    n_pad = _round_up(n, _LANE)

    # Layer-1 bias folded into an all-ones column:
    #   A @ (x W1 + b1) == (A @ [x, 1]) @ [[W1], [b1]]
    xa = jnp.concatenate([x.astype(f32), jnp.ones((n, 1), f32)], axis=1)
    w1a = jnp.concatenate([w1.astype(f32), b1.reshape(1, h).astype(f32)], axis=0)
    w1a = jnp.pad(w1a, ((0, 0), (0, hp - h)))
    w2p = jnp.pad(w2.astype(f32), ((0, hp - h), (0, hp - h)))
    b2p = jnp.pad(b2.reshape(1, h).astype(f32), ((0, 0), (0, hp - h)))
    w3p = jnp.pad(w3.astype(f32), ((0, hp - h), (0, cp - c_out)))
    b3p = jnp.pad(b3.reshape(1, c_out).astype(f32), ((0, 0), (0, cp - c_out)))

    if n_pad != n:
        # Padding MUST be zeros: padded rows emit p2 == b2 in layer 1, and only
        # all-zero padded adj columns guarantee they cancel in layer 2.
        # TODO(synk): callers with very large, oddly-sized graphs should
        #   pre-zero-pad adj to a multiple of 128 to avoid this one-time copy.
        adj = jnp.pad(adj, ((0, n_pad - n), (0, n_pad - n)))
        xa = jnp.pad(xa, ((0, n_pad - n), (0, 0)))
    xa = xa.astype(agg_dtype)        # bf16 x bf16 on the MXU when adj is bf16

    vmem_limit = _vmem_limit_bytes()
    budget = vmem_limit - 8 * _MIB

    flops1 = 2 * n_pad * n_pad * c_aug + 2 * n_pad * (c_aug * hp + hp * hp)
    flops2 = 2 * n_pad * n_pad * hp + 2 * n_pad * hp * cp

    # ---- small-graph fast path: adj resident, both layers fused --------------
    use_fused = False
    if allow_fused:
        bm_f = _pick_tile(n_pad, min(block_m, 256))
        fused_bytes = (2 * n_pad * n_pad * s_adj          # adj (worst-case 2 bufs)
                       + 2 * n_pad * _LANE * s_adj        # xa (lane-padded)
                       + n_pad * hp * s_adj               # p2 scratch
                       + 2 * n_pad * cp * 4               # resident output
                       + 4 * bm_f * (3 * hp + _LANE)      # in-kernel temporaries
                       + 2 * _MIB)                        # weights + slack
        use_fused = fused_bytes <= budget

    if use_fused:
        const = lambda p, j: (0, 0)
        out_padded = pl.pallas_call(
            functools.partial(_fused_kernel, bm=bm_f),
            out_shape=jax.ShapeDtypeStruct((n_pad, cp), f32),
            grid=(2, n_pad // bm_f),
            in_specs=[pl.BlockSpec((n_pad, n_pad), const),   # adj, DMA'd once
                      pl.BlockSpec((n_pad, c_aug), const),   # xa resident
                      pl.BlockSpec((c_aug, hp), const),
                      pl.BlockSpec((hp, hp), const),
                      pl.BlockSpec((1, hp), const),
                      pl.BlockSpec((hp, cp), const),
                      pl.BlockSpec((1, cp), const)],
            out_specs=pl.BlockSpec((n_pad, cp), const),      # resident output
            scratch_shapes=[pltpu.VMEM((n_pad, hp), agg_dtype)],
            compiler_params=pltpu.CompilerParams(
                dimension_semantics=("arbitrary", "arbitrary"),
                vmem_limit_bytes=vmem_limit),
            cost_estimate=pl.CostEstimate(
                flops=int(flops1 + flops2), transcendentals=0,
                bytes_accessed=int(n_pad * n_pad * s_adj
                                   + n_pad * (c_aug * s_adj + cp * 4))),
        )(adj, xa, w1a, w2p, b2p, w3p, b3p)
        return out_padded[None, :n, :c_out]

    # ---- general path: adj streamed in (bm, bk) tiles -------------------------
    # Keep >= 2 row tiles when possible so v7x's second TensorCore gets work.
    bm = _pick_tile(n_pad, min(block_m, max(n_pad // 2, _LANE)))
    bk = _pick_tile(n_pad, block_k)
    while bk > _LANE and 2 * bm * bk * s_adj > 2 * budget // 3:
        bk = _pick_tile(n_pad, bk // 2)
    grid = (n_pad // bm, n_pad // bk)

    # xa / p2 fully VMEM-resident (loaded once) when they fit; otherwise stream
    # (bk, C) feature blocks alongside adj.
    fixed_bytes = 2 * bm * bk * s_adj + 3 * bm * _LANE * 4 + 2 * _MIB
    resident_feat_bytes = 2 * n_pad * _LANE * s_adj
    if feature_resident is None:
        feat_resident = fixed_bytes + resident_feat_bytes <= budget
    else:
        feat_resident = bool(feature_resident)

    compiler_params = pltpu.CompilerParams(
        dimension_semantics=("parallel", "arbitrary"),
        vmem_limit_bytes=vmem_limit)
    adj_spec = pl.BlockSpec((bm, bk), lambda i, k: (i, k))
    if feat_resident:
        xa_spec = pl.BlockSpec((n_pad, c_aug), lambda i, k: (0, 0))
        p2_spec = pl.BlockSpec((n_pad, hp), lambda i, k: (0, 0))
    else:
        xa_spec = pl.BlockSpec((bk, c_aug), lambda i, k: (k, 0))
        p2_spec = pl.BlockSpec((bk, hp), lambda i, k: (k, 0))

    # ---- GraphConv layer 1 (+ fused layer-2 projection) ----------------------
    p2 = pl.pallas_call(
        functools.partial(_gc1_kernel, feat_resident=feat_resident),
        out_shape=jax.ShapeDtypeStruct((n_pad, hp), agg_dtype),
        grid=grid,
        in_specs=[adj_spec, xa_spec,
                  pl.BlockSpec((c_aug, hp), lambda i, k: (0, 0)),
                  pl.BlockSpec((hp, hp), lambda i, k: (0, 0)),
                  pl.BlockSpec((1, hp), lambda i, k: (0, 0))],
        out_specs=pl.BlockSpec((bm, hp), lambda i, k: (i, 0)),
        scratch_shapes=[pltpu.VMEM((bm, c_aug), jnp.float32)],
        compiler_params=compiler_params,
        cost_estimate=pl.CostEstimate(
            flops=int(flops1), transcendentals=0,
            bytes_accessed=int(n_pad * n_pad * s_adj
                               + n_pad * (c_aug + hp) * s_adj)),
    )(adj, xa, w1a, w2p, b2p)

    # ---- GraphConv layer 2 (+ fused output projection) -----------------------
    out_padded = pl.pallas_call(
        functools.partial(_gc2_kernel, feat_resident=feat_resident),
        out_shape=jax.ShapeDtypeStruct((n_pad, cp), jnp.float32),
        grid=grid,
        in_specs=[adj_spec, p2_spec,
                  pl.BlockSpec((hp, cp), lambda i, k: (0, 0)),
                  pl.BlockSpec((1, cp), lambda i, k: (0, 0))],
        out_specs=pl.BlockSpec((bm, cp), lambda i, k: (i, 0)),
        scratch_shapes=[pltpu.VMEM((bm, hp), jnp.float32)],
        compiler_params=compiler_params,
        cost_estimate=pl.CostEstimate(
            flops=int(flops2), transcendentals=0,
            bytes_accessed=int(n_pad * n_pad * s_adj
                               + n_pad * (hp * s_adj + cp * 4))),
    )(adj, p2, w3p, b3p)

    # Drop padding, restore the module's unsqueeze(0) batch dim.
    return out_padded[None, :n, :c_out]


def _init_linear(key, fan_in, fan_out):
    """Deterministic init mimicking nn.Linear's uniform(-1/sqrt(fan_in), ...)."""
    k_w, k_b = jax.random.split(key)
    bound = 1.0 / float(np.sqrt(fan_in))
    # Stored as (in, out) so the kernel does x @ W (== torch x @ W.T + b).
    w = jax.random.uniform(k_w, (fan_in, fan_out), jnp.float32, -bound, bound)
    b = jax.random.uniform(k_b, (fan_out,), jnp.float32, -bound, bound)
    return w, b


if __name__ == "__main__":
    # Small deterministic example: num_nodes=500 (exercises zero-padding to 512),
    # C_in=8, hidden=32, C_out=4.
    num_nodes = 500
    input_channels = 8
    hidden_channels = 32
    output_channels = 4

    key = jax.random.PRNGKey(0)
    k_x, k_adj, k_l1, k_l2, k_l3 = jax.random.split(key, 5)

    x = jax.random.normal(k_x, (num_nodes, input_channels), jnp.float32)
    u = jax.random.uniform(k_adj, (num_nodes, num_nodes), jnp.float32)
    adj = 0.5 * (u + u.T)            # symmetric dense "adjacency-like" matrix
    adj_bf16 = adj.astype(jnp.bfloat16)

    w1, b1 = _init_linear(k_l1, input_channels, hidden_channels)
    w2, b2 = _init_linear(k_l2, hidden_channels, hidden_channels)
    w3, b3 = _init_linear(k_l3, hidden_channels, output_channels)

    # Float64 reference of the module's math.
    xd = np.asarray(x, np.float64)
    ad = np.asarray(adj, np.float64)
    w1d, b1d = np.asarray(w1, np.float64), np.asarray(b1, np.float64)
    w2d, b2d = np.asarray(w2, np.float64), np.asarray(b2, np.float64)
    w3d, b3d = np.asarray(w3, np.float64), np.asarray(b3, np.float64)
    h1 = np.maximum(ad @ (xd @ w1d + b1d), 0.0)
    h2 = np.maximum(ad @ (h1 @ w2d + b2d), 0.0)
    ref = (h2 @ w3d + b3d)[None, :, :]
    scale = float(np.max(np.abs(ref)))

    tol_f32 = 5e-4 * scale + 1e-5
    tol_bf16 = 0.15 * scale          # loose sanity bound; bf16 error grows ~sqrt(N)

    def check(out, tol):
        out = jax.block_until_ready(out)
        assert out.shape == (1, num_nodes, output_channels), out.shape
        err = float(np.max(np.abs(np.asarray(out, np.float64) - ref)))
        assert err <= tol, (err, tol, scale)

    # 1) fused small-graph path, exact f32 adjacency (default configuration).
    check(gnn_forward(x, adj, w1, b1, w2, b2, w3, b3), tol_f32)
    # 2) streamed/tiled path with streamed feature blocks (forced, to exercise
    #    the large-graph fallback; small block_k so the k-accumulation runs).
    check(gnn_forward(x, adj, w1, b1, w2, b2, w3, b3,
                      block_m=256, block_k=256,
                      allow_fused=False, feature_resident=False), tol_f32)
    # 3) streamed/tiled path with resident features, bf16 adjacency (the
    #    recommended large-graph configuration, especially on v7x).
    check(gnn_forward(x, adj_bf16, w1, b1, w2, b2, w3, b3,
                      block_k=256, allow_fused=False), tol_bf16)
    # 4) fused small-graph path, bf16 adjacency.
    check(gnn_forward(x, adj_bf16, w1, b1, w2, b2, w3, b3), tol_bf16)

    print("KERNEL_OK")
</pallas_src>

<mosaic_0001>
module attributes {stable_mosaic.version = 11 : i64} {
  func.func @_fused_kernel(%arg0: i32, %arg1: i32, %arg2: memref<512x512xf32, #tpu.memory_space<vmem>>, %arg3: memref<512x9xf32, #tpu.memory_space<vmem>>, %arg4: memref<9x128xf32, #tpu.memory_space<vmem>>, %arg5: memref<128x128xf32, #tpu.memory_space<vmem>>, %arg6: memref<1x128xf32, #tpu.memory_space<vmem>>, %arg7: memref<128x128xf32, #tpu.memory_space<vmem>>, %arg8: memref<1x128xf32, #tpu.memory_space<vmem>>, %arg9: memref<512x128xf32, #tpu.memory_space<vmem>>, %arg10: memref<512x128xf32, #tpu.memory_space<vmem>>) attributes {dimension_semantics = [#tpu.dimension_semantics<arbitrary>, #tpu.dimension_semantics<arbitrary>], iteration_bounds = array<i64: 2, 2>, scalar_prefetch = 0 : i64, scratch_operands = 1 : i64, tpu.core_type = #tpu.core_type<tc>, window_params = [{pipeline_mode = #tpu.pipeline_mode<synchronous>, transform_indices = @transform_0, window_bounds = array<i64: 512, 512>}, {pipeline_mode = #tpu.pipeline_mode<synchronous>, transform_indices = @transform_1, window_bounds = array<i64: 512, 9>}, {pipeline_mode = #tpu.pipeline_mode<synchronous>, transform_indices = @transform_2, window_bounds = array<i64: 9, 128>}, {pipeline_mode = #tpu.pipeline_mode<synchronous>, transform_indices = @transform_3, window_bounds = array<i64: 128, 128>}, {pipeline_mode = #tpu.pipeline_mode<synchronous>, transform_indices = @transform_4, window_bounds = array<i64: 1, 128>}, {pipeline_mode = #tpu.pipeline_mode<synchronous>, transform_indices = @transform_5, window_bounds = array<i64: 128, 128>}, {pipeline_mode = #tpu.pipeline_mode<synchronous>, transform_indices = @transform_6, window_bounds = array<i64: 1, 128>}, {pipeline_mode = #tpu.pipeline_mode<synchronous>, transform_indices = @transform_7, window_bounds = array<i64: 512, 128>}]} {
    %c256_i32 = arith.constant 256 : i32
    %0 = arith.muli %arg1, %c256_i32 : i32
    %1 = tpu.assume_multiple %0, 256 : i32
    %2 = arith.index_cast %1 : i32 to index
    %c0 = arith.constant 0 : index
    %3 = vector.load %arg2[%2, %c0] : memref<512x512xf32, #tpu.memory_space<vmem>>, vector<256x512xf32>
    %c0_i32 = arith.constant 0 : i32
    %4 = arith.cmpi eq, %arg0, %c0_i32 : i32
    %5 = arith.extui %4 : i1 to i32
    %c0_i32_0 = arith.constant 0 : i32
    %6 = arith.cmpi ne, %5, %c0_i32_0 : i32
    scf.if %6 {
      %c0_2 = arith.constant 0 : index
      %c0_3 = arith.constant 0 : index
      %10 = vector.load %arg3[%c0_2, %c0_3] : memref<512x9xf32, #tpu.memory_space<vmem>>, vector<512x9xf32>
      %cst = arith.constant dense<0.000000e+00> : vector<256x9xf32>
      %11 = tpu.matmul %3, %10, %cst {dimension_numbers = #tpu.dot_dimension_numbers<[1], [0], [0], [1], [0, 0, 1, 1], [], []>} : vector<256x512xf32>, vector<512x9xf32>, vector<256x9xf32> -> vector<256x9xf32>
      %c0_4 = arith.constant 0 : index
      %c0_5 = arith.constant 0 : index
      %12 = vector.load %arg4[%c0_4, %c0_5] : memref<9x128xf32, #tpu.memory_space<vmem>>, vector<9x128xf32>
      %cst_6 = arith.constant dense<0.000000e+00> : vector<256x128xf32>
      %13 = tpu.matmul %11, %12, %cst_6 {dimension_numbers = #tpu.dot_dimension_numbers<[1], [0], [0], [1], [0, 0, 1, 1], [], []>} : vector<256x9xf32>, vector<9x128xf32>, vector<256x128xf32> -> vector<256x128xf32>
      %cst_7 = arith.constant 0.000000e+00 : f32
      %14 = vector.broadcast %cst_7 : f32 to vector<256x128xf32>
      %15 = arith.maximumf %13, %14 : vector<256x128xf32>
      %c0_8 = arith.constant 0 : index
      %c0_9 = arith.constant 0 : index
      %16 = vector.load %arg5[%c0_8, %c0_9] : memref<128x128xf32, #tpu.memory_space<vmem>>, vector<128x128xf32>
      %cst_10 = arith.constant dense<0.000000e+00> : vector<256x128xf32>
      %17 = tpu.matmul %15, %16, %cst_10 {dimension_numbers = #tpu.dot_dimension_numbers<[1], [0], [0], [1], [0, 0, 1, 1], [], []>} : vector<256x128xf32>, vector<128x128xf32>, vector<256x128xf32> -> vector<256x128xf32>
      %c0_11 = arith.constant 0 : index
      %c0_12 = arith.constant 0 : index
      %18 = vector.load %arg6[%c0_11, %c0_12] : memref<1x128xf32, #tpu.memory_space<vmem>>, vector<1x128xf32>
      %19 = vector.broadcast %18 : vector<1x128xf32> to vector<256x128xf32>
      %20 = arith.addf %17, %19 : vector<256x128xf32>
      %21 = arith.index_cast %1 : i32 to index
      %c0_13 = arith.constant 0 : index
      %22 = vector.load %arg10[%21, %c0_13] : memref<512x128xf32, #tpu.memory_space<vmem>>, vector<256x128xf32>
      tpu.vector_store %arg10[%21, %c0_13], %20 {strides = array<i32>} : memref<512x128xf32, #tpu.memory_space<vmem>>, vector<256x128xf32>,
    } else {
    }
    %c1_i32 = arith.constant 1 : i32
    %7 = arith.cmpi eq, %arg0, %c1_i32 : i32
    %8 = arith.extui %7 : i1 to i32
    %c0_i32_1 = arith.constant 0 : i32
    %9 = arith.cmpi ne, %8, %c0_i32_1 : i32
    scf.if %9 {
      %c0_2 = arith.constant 0 : index
      %c0_3 = arith.constant 0 : index
      %10 = vector.load %arg10[%c0_2, %c0_3] : memref<512x128xf32, #tpu.memory_space<vmem>>, vector<512x128xf32>
      %cst = arith.constant dense<0.000000e+00> : vector<256x128xf32>
      %11 = tpu.matmul %3, %10, %cst {dimension_numbers = #tpu.dot_dimension_numbers<[1], [0], [0], [1], [0, 0, 1, 1], [], []>} : vector<256x512xf32>, vector<512x128xf32>, vector<256x128xf32> -> vector<256x128xf32>
      %cst_4 = arith.constant 0.000000e+00 : f32
      %12 = vector.broadcast %cst_4 : f32 to vector<256x128xf32>
      %13 = arith.maximumf %11, %12 : vector<256x128xf32>
      %c0_5 = arith.constant 0 : index
      %c0_6 = arith.constant 0 : index
      %14 = vector.load %arg7[%c0_5, %c0_6] : memref<128x128xf32, #tpu.memory_space<vmem>>, vector<128x128xf32>
      %cst_7 = arith.constant dense<0.000000e+00> : vector<256x128xf32>
      %15 = tpu.matmul %13, %14, %cst_7 {dimension_numbers = #tpu.dot_dimension_numbers<[1], [0], [0], [1], [0, 0, 1, 1], [], []>} : vector<256x128xf32>, vector<128x128xf32>, vector<256x128xf32> -> vector<256x128xf32>
      %c0_8 = arith.constant 0 : index
      %c0_9 = arith.constant 0 : index
      %16 = vector.load %arg8[%c0_8, %c0_9] : memref<1x128xf32, #tpu.memory_space<vmem>>, vector<1x128xf32>
      %17 = vector.broadcast %16 : vector<1x128xf32> to vector<256x128xf32>
      %18 = arith.addf %15, %17 : vector<256x128xf32>
      %19 = arith.index_cast %1 : i32 to index
      %c0_10 = arith.constant 0 : index
      %20 = vector.load %arg9[%19, %c0_10] : memref<512x128xf32, #tpu.memory_space<vmem>>, vector<256x128xf32>
      tpu.vector_store %arg9[%19, %c0_10], %18 {strides = array<i32>} : memref<512x128xf32, #tpu.memory_space<vmem>>, vector<256x128xf32>,
    } else {
    }
    return
  }
  func.func @transform_0(%arg0: i32, %arg1: i32) -> (i32, i32) {
    %c0_i32 = arith.constant 0 : i32
    %c0_i32_0 = arith.constant 0 : i32
    %c0_i32_1 = arith.constant 0 : i32
    return %c0_i32, %c0_i32_0 : i32, i32
  }
  func.func @transform_1(%arg0: i32, %arg1: i32) -> (i32, i32) {
    %c0_i32 = arith.constant 0 : i32
    %c0_i32_0 = arith.constant 0 : i32
    %c0_i32_1 = arith.constant 0 : i32
    return %c0_i32, %c0_i32_0 : i32, i32
  }
  func.func @transform_2(%arg0: i32, %arg1: i32) -> (i32, i32) {
    %c0_i32 = arith.constant 0 : i32
    %c0_i32_0 = arith.constant 0 : i32
    %c0_i32_1 = arith.constant 0 : i32
    return %c0_i32, %c0_i32_0 : i32, i32
  }
  func.func @transform_3(%arg0: i32, %arg1: i32) -> (i32, i32) {
    %c0_i32 = arith.constant 0 : i32
    %c0_i32_0 = arith.constant 0 : i32
    %c0_i32_1 = arith.constant 0 : i32
    return %c0_i32, %c0_i32_0 : i32, i32
  }
  func.func @transform_4(%arg0: i32, %arg1: i32) -> (i32, i32) {
    %c0_i32 = arith.constant 0 : i32
    %c0_i32_0 = arith.constant 0 : i32
    %c0_i32_1 = arith.constant 0 : i32
    return %c0_i32, %c0_i32_0 : i32, i32
  }
  func.func @transform_5(%arg0: i32, %arg1: i32) -> (i32, i32) {
    %c0_i32 = arith.constant 0 : i32
    %c0_i32_0 = arith.constant 0 : i32
    %c0_i32_1 = arith.constant 0 : i32
    return %c0_i32, %c0_i32_0 : i32, i32
  }
  func.func @transform_6(%arg0: i32, %arg1: i32) -> (i32, i32) {
    %c0_i32 = arith.constant 0 : i32
    %c0_i32_0 = arith.constant 0 : i32
    %c0_i32_1 = arith.constant 0 : i32
    return %c0_i32, %c0_i32_0 : i32, i32
  }
  func.func @transform_7(%arg0: i32, %arg1: i32) -> (i32, i32) {
    %c0_i32 = arith.constant 0 : i32
    %c0_i32_0 = arith.constant 0 : i32
    %c0_i32_1 = arith.constant 0 : i32
    return %c0_i32, %c0_i32_0 : i32, i32
  }
}

</mosaic_0001>

<bundles_post_ra>
// kernel: gnn_forward.1
= control target key start
LH: loop header
LB: loop body
LE: loop exit
PB: predicated region body
PF: predicated region fallthrough
CT: control target
= control target key end

     0   :  { %s2321_s24 = smov 0   ;;  %s2323_s25 = smov 0   ;;  %s3611_s0 = inlined_call_operand.vmem [shape: f32[512,512], index: 0, kind: input, shape index: {}]   ;;  %s3612_s1 = inlined_call_operand.vmem [shape: f32[512,9], index: 1, kind: input, shape index: {}]   ;;  %s3613_s2 = inlined_call_operand.vmem [shape: f32[9,128], index: 2, kind: input, shape index: {}]   ;;  %s3614_s3 = inlined_call_operand.vmem [shape: f32[128,128], index: 3, kind: input, shape index: {}]   ;;  %s3615_s4 = inlined_call_operand.vmem [shape: f32[1,128], index: 4, kind: input, shape index: {}]   ;;  %s3616_s5 = inlined_call_operand.vmem [shape: f32[128,128], index: 5, kind: input, shape index: {}]   ;;  %s3617_s6 = inlined_call_operand.vmem [shape: f32[1,128], index: 6, kind: input, shape index: {}]   ;;  %s3618_s7 = inlined_call_operand.vmem [shape: f32[512,128], index: 7, kind: output, shape index: {}]  }
   0x1   :  { %s2325_s26 = smov 0   ;;  %s2327_s27 = smov 0  }
   0x2   :  { %s2329_s28 = smov 0  }
   0x3 LB: > { %s26_s29 = sadd.s32 1, %s2271_s26  ;;  %s29_s30 = sadd.s32 1, %s2275_s27  ;;  %s2279_s28 = sphi %s2329_s28, %s17_s28   ;;  %s2275_s27 = sphi %s2327_s27, %s3925_s27   ;;  %s2271_s26 = sphi %s2325_s26, %s3924_s26   ;;  %s2267_s25 = sphi %s2323_s25, %s3923_s25   ;;  %s2263_s24 = sphi %s2321_s24, %s3922_s24  }
   0x4   : > { %p27_p0 = scmp.ge.s32.totalorder %s26_s29, 2  ;;  %p2077_p1 = scmp.ge.s32.totalorder %s2279_s28, 1 }
   0x5   : > { %p234_p2 = scmp.lt.s32.totalorder %s2279_s28, 5 }
   0x6   : > { %s3927_s29 = smov (%p27_p0, %s26_s29), 0  ;;  %s3929_s30 = smov (!%p27_p0, %s29_s30), %s2275_s27 }
   0x7   : > { %p235_p3 = pnand %p2077_p1, %p234_p2  ;;  %p31_p4 = scmp.ge.s32.totalorder %s3929_s30, 2 }
   0x9   : > { %s3931_s30 = smov (%p31_p4, %s3929_s30), 0  ;;  %238 = sbr.rel (%p235_p3) target bundleno = 1539 (0x603), region = 48 }
   0xe   : > { %s2353_s8 = sshll.u32 %s2263_s24, 8  ;;  %p2081_p5 = scmp.ne.s32.totalorder %s2267_s25, 0 }
   0xf   : > { %s257_s9 = sshra.s32 %s2353_s8, 3  ;;  %s3207_s20 = scalar_lea.vmem (!%p2081_p5), [#allocation2], %s2353_s8 }
  0x10   : > { %s2118_s10 = sshll.u32 %s257_s9, 5 }
  0x11   : > { %s2359_s13 = scalar_lea.vmem %s3611_s0, %s2118_s10 }
  0x12   : > { %v2362_v0 = vld [vmem:[%s2359_s13] sm:$0xff]  ;;  %v2365_v1 = vld [vmem:[%s2359_s13 + $0x8] sm:$0xff]  ;;  %v2368_v2 = vld [vmem:[%s2359_s13 + $0x10] sm:$0xff] }
  0x13   : > { %3647 = vst [vmem:[#allocation3_spill] sm:$0xff] %v2365_v1  ;;  %v2371_v3 = vld [vmem:[%s2359_s13 + $0x18] sm:$0xff]  ;;  %v2374_v4 = vld [vmem:[%s2359_s13 + $0x20] sm:$0xff]  ;;  %v2377_v5 = vld [vmem:[%s2359_s13 + $0x28] sm:$0xff] }
  0x14   : > { %3648 = vst [vmem:[#allocation4_spill] sm:$0xff] %v2368_v2  ;;  %v2380_v6 = vld [vmem:[%s2359_s13 + $0x30] sm:$0xff]  ;;  %v2383_v7 = vld [vmem:[%s2359_s13 + $0x38] sm:$0xff]  ;;  %v2386_v8 = vld [vmem:[%s2359_s13 + $0x40] sm:$0xff] }
  0x15   : > { %3649 = vst [vmem:[#allocation5_spill] sm:$0xff] %v2371_v3  ;;  %v2389_v9 = vld [vmem:[%s2359_s13 + $0x48] sm:$0xff]  ;;  %v2392_v10 = vld [vmem:[%s2359_s13 + $0x50] sm:$0xff]  ;;  %v2395_v11 = vld [vmem:[%s2359_s13 + $0x58] sm:$0xff] }
  0x16   : > { %3650 = vst [vmem:[#allocation6_spill] sm:$0xff] %v2377_v5  ;;  %v2398_v12 = vld [vmem:[%s2359_s13 + $0x60] sm:$0xff]  ;;  %v2401_v13 = vld [vmem:[%s2359_s13 + $0x68] sm:$0xff]  ;;  %v2404_v14 = vld [vmem:[%s2359_s13 + $0x70] sm:$0xff] }
  0x17   : > { %3651 = vst [vmem:[#allocation7_spill] sm:$0xff] %v2380_v6  ;;  %v2407_v15 = vld [vmem:[%s2359_s13 + $0x78] sm:$0xff]  ;;  %v2410_v16 = vld [vmem:[%s2359_s13 + $0x80] sm:$0xff]  ;;  %v2413_v17 = vld [vmem:[%s2359_s13 + $0x88] sm:$0xff] }
  0x18   : > { %3652 = vst [vmem:[#allocation8_spill] sm:$0xff] %v2383_v7  ;;  %v2416_v18 = vld [vmem:[%s2359_s13 + $0x90] sm:$0xff]  ;;  %v2419_v19 = vld [vmem:[%s2359_s13 + $0x98] sm:$0xff]  ;;  %v2422_v20 = vld [vmem:[%s2359_s13 + $0xa0] sm:$0xff] }
  0x19   : > { %3653 = vst [vmem:[#allocation9_spill] sm:$0xff] %v2389_v9  ;;  %v2425_v21 = vld [vmem:[%s2359_s13 + $0xa8] sm:$0xff]  ;;  %v2428_v22 = vld [vmem:[%s2359_s13 + $0xb0] sm:$0xff]  ;;  %v2431_v23 = vld [vmem:[%s2359_s13 + $0xb8] sm:$0xff] }
  0x1a   : > { %3654 = vst [vmem:[#allocation10_spill] sm:$0xff] %v2392_v10  ;;  %v2434_v24 = vld [vmem:[%s2359_s13 + $0xc0] sm:$0xff]  ;;  %v2437_v25 = vld [vmem:[%s2359_s13 + $0xc8] sm:$0xff]  ;;  %v2440_v26 = vld [vmem:[%s2359_s13 + $0xd0] sm:$0xff] }
  0x1b   : > { %3655 = vst [vmem:[#allocation11_spill] sm:$0xff] %v2395_v11  ;;  %v2443_v27 = vld [vmem:[%s2359_s13 + $0xd8] sm:$0xff]  ;;  %v2446_v28 = vld [vmem:[%s2359_s13 + $0xe0] sm:$0xff]  ;;  %v2449_v29 = vld [vmem:[%s2359_s13 + $0xe8] sm:$0xff] }
  0x1c   : > { %3656 = vst [vmem:[#allocation12_spill] sm:$0xff] %v2401_v13  ;;  %v2452_v30 = vld [vmem:[%s2359_s13 + $0xf0] sm:$0xff]  ;;  %v2455_v31 = vld [vmem:[%s2359_s13 + $0xf8] sm:$0xff]  ;;  %v2458_v32 = vld [vmem:[%s2359_s13 + $0x100] sm:$0xff] }
  0x1d   : > { %3657 = vst [vmem:[#allocation13_spill] sm:$0xff] %v2404_v14  ;;  %v2461_v33 = vld [vmem:[%s2359_s13 + $0x108] sm:$0xff]  ;;  %v2464_v34 = vld [vmem:[%s2359_s13 + $0x110] sm:$0xff]  ;;  %v2467_v35 = vld [vmem:[%s2359_s13 + $0x118] sm:$0xff] }
  0x1e   : > { %3658 = vst [vmem:[#allocation14_spill] sm:$0xff] %v2407_v15  ;;  %v2470_v36 = vld [vmem:[%s2359_s13 + $0x120] sm:$0xff]  ;;  %v2473_v37 = vld [vmem:[%s2359_s13 + $0x128] sm:$0xff]  ;;  %v2476_v38 = vld [vmem:[%s2359_s13 + $0x130] sm:$0xff] }
  0x1f   : > { %3659 = vst [vmem:[#allocation15_spill] sm:$0xff] %v2413_v17  ;;  %v2479_v39 = vld [vmem:[%s2359_s13 + $0x138] sm:$0xff]  ;;  %v2482_v40 = vld [vmem:[%s2359_s13 + $0x140] sm:$0xff]  ;;  %v2485_v41 = vld [vmem:[%s2359_s13 + $0x148] sm:$0xff] }
  0x20   : > { %3660 = vst [vmem:[#allocation16_spill] sm:$0xff] %v2416_v18  ;;  %v2488_v42 = vld [vmem:[%s2359_s13 + $0x150] sm:$0xff]  ;;  %v2491_v43 = vld [vmem:[%s2359_s13 + $0x158] sm:$0xff]  ;;  %v2494_v44 = vld [vmem:[%s2359_s13 + $0x160] sm:$0xff] }
  0x21   : > { %3661 = vst [vmem:[#allocation17_spill] sm:$0xff] %v2419_v19  ;;  %v2497_v45 = vld [vmem:[%s2359_s13 + $0x168] sm:$0xff]  ;;  %v2500_v46 = vld [vmem:[%s2359_s13 + $0x170] sm:$0xff]  ;;  %v2503_v47 = vld [vmem:[%s2359_s13 + $0x178] sm:$0xff] }
  0x22   : > { %3662 = vst [vmem:[#allocation18_spill] sm:$0xff] %v2425_v21  ;;  %v2506_v48 = vld [vmem:[%s2359_s13 + $0x180] sm:$0xff]  ;;  %v2509_v49 = vld [vmem:[%s2359_s13 + $0x188] sm:$0xff]  ;;  %v2512_v50 = vld [vmem:[%s2359_s13 + $0x190] sm:$0xff] }
  0x23   : > { %3663 = vst [vmem:[#allocation19_spill] sm:$0xff] %v2428_v22  ;;  %v2515_v51 = vld [vmem:[%s2359_s13 + $0x198] sm:$0xff]  ;;  %v2518_v52 = vld [vmem:[%s2359_s13 + $0x1a0] sm:$0xff]  ;;  %v2521_v53 = vld [vmem:[%s2359_s13 + $0x1a8] sm:$0xff] }
  0x24   : > { %3664 = vst [vmem:[#allocation20_spill] sm:$0xff] %v2431_v23  ;;  %v2524_v54 = vld [vmem:[%s2359_s13 + $0x1b0] sm:$0xff]  ;;  %v2527_v55 = vld [vmem:[%s2359_s13 + $0x1b8] sm:$0xff]  ;;  %v2530_v56 = vld [vmem:[%s2359_s13 + $0x1c0] sm:$0xff] }
  0x25   : > { %3665 = vst [vmem:[#allocation21_spill] sm:$0xff] %v2437_v25  ;;  %v2533_v57 = vld [vmem:[%s2359_s13 + $0x1c8] sm:$0xff]  ;;  %v2536_v58 = vld [vmem:[%s2359_s13 + $0x1d0] sm:$0xff]  ;;  %v2539_v59 = vld [vmem:[%s2359_s13 + $0x1d8] sm:$0xff] }
  0x26   : > { %3666 = vst [vmem:[#allocation22_spill] sm:$0xff] %v2440_v26  ;;  %v2542_v60 = vld [vmem:[%s2359_s13 + $0x1e0] sm:$0xff]  ;;  %v2545_v61 = vld [vmem:[%s2359_s13 + $0x1e8] sm:$0xff]  ;;  %v2548_v62 = vld [vmem:[%s2359_s13 + $0x1f0] sm:$0xff] }
  0x27   : > { %3667 = vst [vmem:[#allocation23_spill] sm:$0xff] %v2443_v27  ;;  %v2551_v63 = vld [vmem:[%s2359_s13 + $0x1f8] sm:$0xff]  ;;  %v2638_v27 = vld [vmem:[%s2359_s13 + $0x2e0] sm:$0xff]  ;;  %v2701_v6 = vld [vmem:[%s2359_s13 + $0x388] sm:$0xff] }
  0x28   : > { %3668 = vst [vmem:[#allocation24_spill] sm:$0xff] %v2446_v28  ;;  %v2647_v26 = vld [vmem:[%s2359_s13 + $0x2f8] sm:$0xff]  ;;  %v2650_v23 = vld [vmem:[%s2359_s13 + $0x300] sm:$0xff]  ;;  %v2713_v2 = vld [vmem:[%s2359_s13 + $0x3a8] sm:$0xff] }
  0x29   : > { %3669 = vst [vmem:[#allocation25_spill] sm:$0xff] %v2449_v29  ;;  %v2659_v22 = vld [vmem:[%s2359_s13 + $0x318] sm:$0xff]  ;;  %v2662_v19 = vld [vmem:[%s2359_s13 + $0x320] sm:$0xff] }
  0x2a   : > { %3670 = vst [vmem:[#allocation26_spill] sm:$0xff] %v2452_v30  ;;  %v2635_v30 = vld [vmem:[%s2359_s13 + $0x2d8] sm:$0xff]  ;;  %v2674_v15 = vld [vmem:[%s2359_s13 + $0x340] sm:$0xff] }
  0x2b   : > { %3671 = vst [vmem:[#allocation27_spill] sm:$0xff] %v2455_v31  ;;  %v2626_v31 = vld [vmem:[%s2359_s13 + $0x2c0] sm:$0xff]  ;;  %v2671_v18 = vld [vmem:[%s2359_s13 + $0x338] sm:$0xff] }
  0x2c   : > { %3672 = vst [vmem:[#allocation28_spill] sm:$0xff] %v2461_v33  ;;  %v2683_v14 = vld [vmem:[%s2359_s13 + $0x358] sm:$0xff]  ;;  %v2686_v11 = vld [vmem:[%s2359_s13 + $0x360] sm:$0xff] }
  0x2d   : > { %3673 = vst [vmem:[#allocation29_spill] sm:$0xff] %v2464_v34  ;;  %v2623_v34 = vld [vmem:[%s2359_s13 + $0x2b8] sm:$0xff]  ;;  %v2698_v7 = vld [vmem:[%s2359_s13 + $0x380] sm:$0xff] }
  0x2e   : > { %3674 = vst [vmem:[#allocation30_spill] sm:$0xff] %v2467_v35  ;;  %v2614_v35 = vld [vmem:[%s2359_s13 + $0x2a0] sm:$0xff]  ;;  %v2695_v10 = vld [vmem:[%s2359_s13 + $0x378] sm:$0xff] }
  0x2f   : > { %3675 = vst [vmem:[#allocation31_spill] sm:$0xff] %v2473_v37  ;;  %v2710_v3 = vld [vmem:[%s2359_s13 + $0x3a0] sm:$0xff] }
  0x30   : > { %3676 = vst [vmem:[#allocation32_spill] sm:$0xff] %v2476_v38  ;;  %v2611_v38 = vld [vmem:[%s2359_s13 + $0x298] sm:$0xff] }
  0x31   : > { %3677 = vst [vmem:[#allocation33_spill] sm:$0xff] %v2479_v39  ;;  %v2602_v39 = vld [vmem:[%s2359_s13 + $0x280] sm:$0xff] }
  0x32   : > { %3678 = vst [vmem:[#allocation34_spill] sm:$0xff] %v2485_v41 }
  0x33   : > { %3679 = vst [vmem:[#allocation35_spill] sm:$0xff] %v2488_v42  ;;  %v2599_v42 = vld [vmem:[%s2359_s13 + $0x278] sm:$0xff] }
  0x34   : > { %3680 = vst [vmem:[#allocation36_spill] sm:$0xff] %v2491_v43  ;;  %v2590_v43 = vld [vmem:[%s2359_s13 + $0x260] sm:$0xff] }
  0x35   : > { %3681 = vst [vmem:[#allocation37_spill] sm:$0xff] %v2497_v45 }
  0x36   : > { %3682 = vst [vmem:[#allocation38_spill] sm:$0xff] %v2500_v46  ;;  %v2587_v46 = vld [vmem:[%s2359_s13 + $0x258] sm:$0xff] }
  0x37   : > { %3683 = vst [vmem:[#allocation39_spill] sm:$0xff] %v2503_v47  ;;  %v2578_v47 = vld [vmem:[%s2359_s13 + $0x240] sm:$0xff] }
  0x38   : > { %3684 = vst [vmem:[#allocation40_spill] sm:$0xff] %v2509_v49 }
  0x39   : > { %3685 = vst [vmem:[#allocation41_spill] sm:$0xff] %v2512_v50  ;;  %v2575_v50 = vld [vmem:[%s2359_s13 + $0x238] sm:$0xff] }
  0x3a   : > { %3686 = vst [vmem:[#allocation42_spill] sm:$0xff] %v2515_v51  ;;  %v2566_v51 = vld [vmem:[%s2359_s13 + $0x220] sm:$0xff] }
  0x3b   : > { %3687 = vst [vmem:[#allocation43_spill] sm:$0xff] %v2518_v52  ;;  %v2743_v52 = vld [vmem:[%s2359_s13 + $0x3f8] sm:$0xff] }
  0x3c   : > { %3688 = vst [vmem:[#allocation44_spill] sm:$0xff] %v2521_v53  ;;  %v2734_v53 = vld [vmem:[%s2359_s13 + $0x3e0] sm:$0xff] }
  0x3d   : > { %3689 = vst [vmem:[#allocation45_spill] sm:$0xff] %v2524_v54  ;;  %v2563_v54 = vld [vmem:[%s2359_s13 + $0x218] sm:$0xff] }
  0x3e   : > { %3690 = vst [vmem:[#allocation46_spill] sm:$0xff] %v2527_v55  ;;  %v2554_v55 = vld [vmem:[%s2359_s13 + $0x200] sm:$0xff] }
  0x3f   : > { %3691 = vst [vmem:[#allocation47_spill] sm:$0xff] %v2530_v56  ;;  %v2731_v56 = vld [vmem:[%s2359_s13 + $0x3d8] sm:$0xff] }
  0x40   : > { %3692 = vst [vmem:[#allocation48_spill] sm:$0xff] %v2533_v57  ;;  %v2728_v57 = vld [vmem:[%s2359_s13 + $0x3d0] sm:$0xff] }
  0x41   : > { %3693 = vst [vmem:[#allocation49_spill] sm:$0xff] %v2536_v58  ;;  %v2557_v58 = vld [vmem:[%s2359_s13 + $0x208] sm:$0xff] }
  0x42   : > { %3694 = vst [vmem:[#allocation50_spill] sm:$0xff] %v2539_v59  ;;  %v2560_v59 = vld [vmem:[%s2359_s13 + $0x210] sm:$0xff] }
  0x43   : > { %3695 = vst [vmem:[#allocation51_spill] sm:$0xff] %v2542_v60  ;;  %v2719_v60 = vld [vmem:[%s2359_s13 + $0x3b8] sm:$0xff] }
  0x44   : > { %3696 = vst [vmem:[#allocation52_spill] sm:$0xff] %v2545_v61  ;;  %v2716_v61 = vld [vmem:[%s2359_s13 + $0x3b0] sm:$0xff] }
  0x45   : > { %3697 = vst [vmem:[#allocation53_spill] sm:$0xff] %v2548_v62  ;;  %v2569_v62 = vld [vmem:[%s2359_s13 + $0x228] sm:$0xff] }
  0x46   : > { %3698 = vst [vmem:[#allocation54_spill] sm:$0xff] %v2551_v63  ;;  %v2572_v63 = vld [vmem:[%s2359_s13 + $0x230] sm:$0xff] }
  0x47   : > { %3699 = vst [vmem:[#allocation55_spill] sm:$0xff] %v2557_v58 }
  0x48   : > { %3700 = vst [vmem:[#allocation56_spill] sm:$0xff] %v2560_v59  ;;  %v2581_v59 = vld [vmem:[%s2359_s13 + $0x248] sm:$0xff] }
  0x49   : > { %3701 = vst [vmem:[#allocation57_spill] sm:$0xff] %v2563_v54  ;;  %v2584_v54 = vld [vmem:[%s2359_s13 + $0x250] sm:$0xff] }
  0x4a   : > { %3702 = vst [vmem:[#allocation58_spill] sm:$0xff] %v2569_v62 }
  0x4b   : > { %3703 = vst [vmem:[#allocation59_spill] sm:$0xff] %v2572_v63  ;;  %v2593_v63 = vld [vmem:[%s2359_s13 + $0x268] sm:$0xff] }
  0x4c   : > { %3704 = vst [vmem:[#allocation60_spill] sm:$0xff] %v2575_v50  ;;  %v2596_v50 = vld [vmem:[%s2359_s13 + $0x270] sm:$0xff] }
  0x4d   : > { %3705 = vst [vmem:[#allocation61_spill] sm:$0xff] %v2581_v59 }
  0x4e   : > { %3706 = vst [vmem:[#allocation62_spill] sm:$0xff] %v2584_v54  ;;  %v2605_v54 = vld [vmem:[%s2359_s13 + $0x288] sm:$0xff] }
  0x4f   : > { %3707 = vst [vmem:[#allocation63_spill] sm:$0xff] %v2587_v46  ;;  %v2608_v46 = vld [vmem:[%s2359_s13 + $0x290] sm:$0xff] }
  0x50   : > { %3708 = vst [vmem:[#allocation64_spill] sm:$0xff] %v2593_v63 }
  0x51   : > { %3709 = vst [vmem:[#allocation65_spill] sm:$0xff] %v2596_v50  ;;  %v2617_v50 = vld [vmem:[%s2359_s13 + $0x2a8] sm:$0xff] }
  0x52   : > { %3710 = vst [vmem:[#allocation66_spill] sm:$0xff] %v2599_v42  ;;  %v2620_v42 = vld [vmem:[%s2359_s13 + $0x2b0] sm:$0xff] }
  0x53   : > { %3711 = vst [vmem:[#allocation67_spill] sm:$0xff] %v2605_v54 }
  0x54   : > { %3712 = vst [vmem:[#allocation68_spill] sm:$0xff] %v2608_v46  ;;  %v2629_v46 = vld [vmem:[%s2359_s13 + $0x2c8] sm:$0xff] }
  0x55   : > { %3713 = vst [vmem:[#allocation69_spill] sm:$0xff] %v2611_v38  ;;  %v2632_v38 = vld [vmem:[%s2359_s13 + $0x2d0] sm:$0xff] }
  0x56   : > { %3714 = vst [vmem:[#allocation70_spill] sm:$0xff] %v2617_v50 }
  0x57   : > { %3715 = vst [vmem:[#allocation71_spill] sm:$0xff] %v2620_v42  ;;  %v2641_v42 = vld [vmem:[%s2359_s13 + $0x2e8] sm:$0xff] }
  0x58   : > { %3716 = vst [vmem:[#allocation72_spill] sm:$0xff] %v2623_v34  ;;  %v2644_v34 = vld [vmem:[%s2359_s13 + $0x2f0] sm:$0xff] }
  0x59   : > { %3717 = vst [vmem:[#allocation73_spill] sm:$0xff] %v2629_v46 }
  0x5a   : > { %3718 = vst [vmem:[#allocation74_spill] sm:$0xff] %v2632_v38  ;;  %v2653_v38 = vld [vmem:[%s2359_s13 + $0x308] sm:$0xff] }
  0x5b   : > { %3719 = vst [vmem:[#allocation75_spill] sm:$0xff] %v2635_v30  ;;  %v2656_v30 = vld [vmem:[%s2359_s13 + $0x310] sm:$0xff] }
  0x5c   : > { %3720 = vst [vmem:[#allocation76_spill] sm:$0xff] %v2641_v42 }
  0x5d   : > { %3721 = vst [vmem:[#allocation77_spill] sm:$0xff] %v2644_v34  ;;  %v2665_v34 = vld [vmem:[%s2359_s13 + $0x328] sm:$0xff] }
  0x5e   : > { %3722 = vst [vmem:[#allocation78_spill] sm:$0xff] %v2647_v26  ;;  %v2668_v26 = vld [vmem:[%s2359_s13 + $0x330] sm:$0xff] }
  0x5f   : > { %3723 = vst [vmem:[#allocation79_spill] sm:$0xff] %v2653_v38 }
  0x60   : > { %3724 = vst [vmem:[#allocation80_spill] sm:$0xff] %v2656_v30  ;;  %v2677_v30 = vld [vmem:[%s2359_s13 + $0x348] sm:$0xff] }
  0x61   : > { %3725 = vst [vmem:[#allocation81_spill] sm:$0xff] %v2659_v22  ;;  %v2680_v22 = vld [vmem:[%s2359_s13 + $0x350] sm:$0xff] }
  0x62   : > { %3726 = vst [vmem:[#allocation82_spill] sm:$0xff] %v2665_v34 }
  0x63   : > { %3727 = vst [vmem:[#allocation83_spill] sm:$0xff] %v2668_v26  ;;  %v2689_v26 = vld [vmem:[%s2359_s13 + $0x368] sm:$0xff] }
  0x64   : > { %3728 = vst [vmem:[#allocation84_spill] sm:$0xff] %v2671_v18  ;;  %v2692_v18 = vld [vmem:[%s2359_s13 + $0x370] sm:$0xff] }
  0x65   : > { %3729 = vst [vmem:[#allocation85_spill] sm:$0xff] %v2677_v30 }
  0x66   : > { %3730 = vst [vmem:[#allocation86_spill] sm:$0xff] %v2680_v22  ;;  %v2704_v22 = vld [vmem:[%s2359_s13 + $0x390] sm:$0xff] }
  0x67   : > { %3731 = vst [vmem:[#allocation87_spill] sm:$0xff] %v2683_v14  ;;  %v2707_v14 = vld [vmem:[%s2359_s13 + $0x398] sm:$0xff] }
  0x68   : > { %3732 = vst [vmem:[#allocation88_spill] sm:$0xff] %v2689_v26 }
  0x69   : > { %3733 = vst [vmem:[#allocation89_spill] sm:$0xff] %v2692_v18  ;;  %v2722_v18 = vld [vmem:[%s2359_s13 + $0x3c0] sm:$0xff] }
  0x6a   : > { %3734 = vst [vmem:[#allocation90_spill] sm:$0xff] %v2695_v10  ;;  %v2725_v10 = vld [vmem:[%s2359_s13 + $0x3c8] sm:$0xff] }
  0x6b   : > { %3735 = vst [vmem:[#allocation91_spill] sm:$0xff] %v2701_v6 }
  0x6c   : > { %3736 = vst [vmem:[#allocation92_spill] sm:$0xff] %v2704_v22  ;;  %v2737_v22 = vld [vmem:[%s2359_s13 + $0x3e8] sm:$0xff] }
  0x6d   : > { %3737 = vst [vmem:[#allocation93_spill] sm:$0xff] %v2707_v14  ;;  %v2740_v14 = vld [vmem:[%s2359_s13 + $0x3f0] sm:$0xff] }
  0x6e   : > { %3738 = vst [vmem:[#allocation94_spill] sm:$0xff] %v2713_v2 }
  0x6f   : > { %3739 = vst [vmem:[#allocation95_spill] sm:$0xff] %v2716_v61 }
  0x70   : > { %3740 = vst [vmem:[#allocation96_spill] sm:$0xff] %v2719_v60 }
  0x71   : > { %3741 = vst [vmem:[#allocation97_spill] sm:$0xff] %v2725_v10 }
  0x72   : > { %3742 = vst [vmem:[#allocation98_spill] sm:$0xff] %v2728_v57 }
  0x73   : > { %3743 = vst [vmem:[#allocation99_spill] sm:$0xff] %v2731_v56  ;;  %393 = sbr.rel (%p2081_p5) target bundleno = 921 (0x399), region = 52 }
  0x74   : > { %3744 = vst [vmem:[#allocation100_spill] sm:$0xff] %v2734_v53 }
  0x75   : > { %3745 = vst [vmem:[#allocation101_spill] sm:$0xff] %v2737_v22 }
  0x76   : > { %3746 = vst [vmem:[#allocation102_spill] sm:$0xff] %v2740_v14 }
  0x77   : > { %3747 = vst [vmem:[#allocation103_spill] sm:$0xff] %v2743_v52 }
  0x78   : > { %v409_v60 = vld [vmem:[%s3612_s1 + $0x78] sm:$0xff]  ;;  %v408_v56 = vld [vmem:[%s3612_s1 + $0x70] sm:$0xff]  ;;  %v407_v14 = vld [vmem:[%s3612_s1 + $0x68] sm:$0xff]  ;;  %vm1009_vm0 = vcmask 1040384   ;;  %vm912_vm1 = vcmask 72704  }
  0x79   : > { %v425_v57 = vld [vmem:[%s3612_s1 + $0xf8] sm:$0xff]  ;;  %2119 = vmatpush.msra.mxu2 %v409_v60  ;;  %v424_v52 = vld [vmem:[%s3612_s1 + $0xf0] sm:$0xff]  ;;  %v423_v61 = vld [vmem:[%s3612_s1 + $0xe8] sm:$0xff]  ;;  %458 = vmatpush.msra.mxu0 %v409_v60 }
  0x7a   : > { %2135 = vmatpush.msra.mxu3 %v425_v57  ;;  %571 = vmatpush.msra.mxu1 %v425_v57  ;;  %v406_v22 = vld [vmem:[%s3612_s1 + $0x60] sm:$0xff]  ;;  %v405_v10 = vld [vmem:[%s3612_s1 + $0x58] sm:$0xff]  ;;  %v404_v60 = vld [vmem:[%s3612_s1 + $0x50] sm:$0xff] }
  0x7b   : > { %2120 = vmatpush.msra.mxu2 %v408_v56  ;;  %v422_v53 = vld [vmem:[%s3612_s1 + $0xe0] sm:$0xff]  ;;  %459 = vmatpush.msra.mxu0 %v408_v56  ;;  %v421_v57 = vld [vmem:[%s3612_s1 + $0xd8] sm:$0xff]  ;;  %v403_v56 = vld [vmem:[%s3612_s1 + $0x48] sm:$0xff] }
  0x7c   : > { %2136 = vmatpush.msra.mxu3 %v424_v52  ;;  %572 = vmatpush.msra.mxu1 %v424_v52  ;;  %v420_v52 = vld [vmem:[%s3612_s1 + $0xd0] sm:$0xff] }
  0x7d   : > { %2121 = vmatpush.msra.mxu2 %v407_v14  ;;  %460 = vmatpush.msra.mxu0 %v407_v14  ;;  %v419_v14 = vld [vmem:[%s3612_s1 + $0xc8] sm:$0xff] }
  0x7e   : > { %2137 = vmatpush.msra.mxu3 %v423_v61  ;;  %573 = vmatpush.msra.mxu1 %v423_v61  ;;  %v402_v61 = vld [vmem:[%s3612_s1 + $0x40] sm:$0xff] }
  0x7f   : > { %2122 = vmatpush.msra.mxu2 %v406_v22  ;;  %461 = vmatpush.msra.mxu0 %v406_v22  ;;  %v418_v22 = vld [vmem:[%s3612_s1 + $0xc0] sm:$0xff] }
  0x80   : > { %2138 = vmatpush.msra.mxu3 %v422_v53  ;;  %574 = vmatpush.msra.mxu1 %v422_v53  ;;  %v401_v53 = vld [vmem:[%s3612_s1 + $0x38] sm:$0xff] }
  0x81   : > { %2123 = vmatpush.msra.mxu2 %v405_v10  ;;  %462 = vmatpush.msra.mxu0 %v405_v10  ;;  %v417_v10 = vld [vmem:[%s3612_s1 + $0xb8] sm:$0xff] }
  0x82   : > { %2139 = vmatpush.msra.mxu3 %v421_v57  ;;  %575 = vmatpush.msra.mxu1 %v421_v57  ;;  %v400_v57 = vld [vmem:[%s3612_s1 + $0x30] sm:$0xff] }
  0x83   : > { %2124 = vmatpush.msra.mxu2 %v404_v60  ;;  %463 = vmatpush.msra.mxu0 %v404_v60  ;;  %v416_v60 = vld [vmem:[%s3612_s1 + $0xb0] sm:$0xff] }
  0x84   : > { %2140 = vmatpush.msra.mxu3 %v420_v52  ;;  %576 = vmatpush.msra.mxu1 %v420_v52  ;;  %v399_v52 = vld [vmem:[%s3612_s1 + $0x28] sm:$0xff] }
  0x85   : > { %2125 = vmatpush.msra.mxu2 %v403_v56  ;;  %464 = vmatpush.msra.mxu0 %v403_v56  ;;  %v415_v56 = vld [vmem:[%s3612_s1 + $0xa8] sm:$0xff] }
  0x86   : > { %2141 = vmatpush.msra.mxu3 %v419_v14  ;;  %577 = vmatpush.msra.mxu1 %v419_v14  ;;  %v398_v14 = vld [vmem:[%s3612_s1 + $0x20] sm:$0xff] }
  0x87   : > { %2126 = vmatpush.msra.mxu2 %v402_v61  ;;  %465 = vmatpush.msra.mxu0 %v402_v61  ;;  %v414_v61 = vld [vmem:[%s3612_s1 + $0xa0] sm:$0xff] }
  0x88   : > { %2142 = vmatpush.msra.mxu3 %v418_v22  ;;  %578 = vmatpush.msra.mxu1 %v418_v22  ;;  %v397_v22 = vld [vmem:[%s3612_s1 + $0x18] sm:$0xff] }
  0x89   : > { %2127 = vmatpush.msra.mxu2 %v401_v53  ;;  %466 = vmatpush.msra.mxu0 %v401_v53  ;;  %v413_v53 = vld [vmem:[%s3612_s1 + $0x98] sm:$0xff] }
  0x8a   : > { %2143 = vmatpush.msra.mxu3 %v417_v10  ;;  %579 = vmatpush.msra.mxu1 %v417_v10  ;;  %v396_v10 = vld [vmem:[%s3612_s1 + $0x10] sm:$0xff] }
  0x8b   : > { %2128 = vmatpush.msra.mxu2 %v400_v57  ;;  %467 = vmatpush.msra.mxu0 %v400_v57  ;;  %v412_v57 = vld [vmem:[%s3612_s1 + $0x90] sm:$0xff] }
  0x8c   : > { %2144 = vmatpush.msra.mxu3 %v416_v60  ;;  %580 = vmatpush.msra.mxu1 %v416_v60  ;;  %v395_v60 = vld [vmem:[%s3612_s1 + $0x8] sm:$0xff] }
  0x8d   : > { %2129 = vmatpush.msra.mxu2 %v399_v52  ;;  %468 = vmatpush.msra.mxu0 %v399_v52  ;;  %v411_v52 = vld [vmem:[%s3612_s1 + $0x88] sm:$0xff] }
  0x8e   : > { %2145 = vmatpush.msra.mxu3 %v415_v56  ;;  %581 = vmatpush.msra.mxu1 %v415_v56  ;;  %v394_v56 = vld [vmem:[%s3612_s1] sm:$0xff] }
  0x8f   : > { %2130 = vmatpush.msra.mxu2 %v398_v14  ;;  %469 = vmatpush.msra.mxu0 %v398_v14  ;;  %v410_v14 = vld [vmem:[%s3612_s1 + $0x80] sm:$0xff] }
  0x90   : > { %2146 = vmatpush.msra.mxu3 %v414_v61  ;;  %582 = vmatpush.msra.mxu1 %v414_v61  ;;  %v441_v61 = vld [vmem:[%s3612_s1 + $0x178] sm:$0xff] }
  0x91   : > { %2131 = vmatpush.msra.mxu2 %v397_v22  ;;  %470 = vmatpush.msra.mxu0 %v397_v22  ;;  %v457_v22 = vld [vmem:[%s3612_s1 + $0x1f8] sm:$0xff] }
  0x92   : > { %2147 = vmatpush.msra.mxu3 %v413_v53  ;;  %583 = vmatpush.msra.mxu1 %v413_v53  ;;  %v440_v53 = vld [vmem:[%s3612_s1 + $0x170] sm:$0xff] }
  0x93   : > { %2132 = vmatpush.msra.mxu2 %v396_v10  ;;  %471 = vmatpush.msra.mxu0 %v396_v10  ;;  %v456_v10 = vld [vmem:[%s3612_s1 + $0x1f0] sm:$0xff] }
  0x94   : > { %2148 = vmatpush.msra.mxu3 %v412_v57  ;;  %584 = vmatpush.msra.mxu1 %v412_v57  ;;  %v439_v57 = vld [vmem:[%s3612_s1 + $0x168] sm:$0xff] }
  0x95   : > { %2133 = vmatpush.msra.mxu2 %v395_v60  ;;  %472 = vmatpush.msra.mxu0 %v395_v60  ;;  %v455_v60 = vld [vmem:[%s3612_s1 + $0x1e8] sm:$0xff] }
  0x96   : > { %2149 = vmatpush.msra.mxu3 %v411_v52  ;;  %585 = vmatpush.msra.mxu1 %v411_v52  ;;  %v438_v52 = vld [vmem:[%s3612_s1 + $0x160] sm:$0xff] }
  0x97   : > { %2134 = vmatpush.msra.mxu2 %v394_v56  ;;  %473 = vmatpush.msra.mxu0 %v394_v56  ;;  %v437_v56 = vld [vmem:[%s3612_s1 + $0x158] sm:$0xff] }
  0x98   : > { %2150 = vmatpush.msra.mxu3 %v410_v14  ;;  %522 = vmatmul.f32.vlgmr.msra.gmra.mxu2 %v2554_v55 }
  0x99   : > { %635 = vmatmul.f32.vlgmr.msra.gmra.mxu3 %v2557_v58  ;;  %684 = vmatpush.msrb.mxu2 %v441_v61  ;;  %v454_v61 = vld [vmem:[%s3612_s1 + $0x1e0] sm:$0xff] }
  0x9a   : > { %797 = vmatpush.msrb.mxu3 %v457_v22  ;;  %586 = vmatpush.msra.mxu1 %v410_v14  ;;  %v453_v14 = vld [vmem:[%s3612_s1 + $0x1d8] sm:$0xff]  ;;  %v436_v22 = vld [vmem:[%s3612_s1 + $0x150] sm:$0xff] }
  0x9b   : > { %685 = vmatpush.msrb.mxu2 %v440_v53  ;;  %474 = vmatmul.f32.vlgmr.msra.gmra.mxu0 %v2362_v0  ;;  %v452_v53 = vld [vmem:[%s3612_s1 + $0x1d0] sm:$0xff] }
  0x9c   : > { %798 = vmatpush.msrb.mxu3 %v456_v10  ;;  %587 = vmatmul.f32.vlgmr.msra.gmra.mxu1 %v2365_v1  ;;  %v435_v10 = vld [vmem:[%s3612_s1 + $0x148] sm:$0xff] }
  0x9d   : > { %686 = vmatpush.msrb.mxu2 %v439_v57  ;;  %v451_v57 = vld [vmem:[%s3612_s1 + $0x1c8] sm:$0xff] }
  0x9e   : > { %799 = vmatpush.msrb.mxu3 %v455_v60  ;;  %v434_v60 = vld [vmem:[%s3612_s1 + $0x140] sm:$0xff] }
  0x9f   : > { %687 = vmatpush.msrb.mxu2 %v438_v52  ;;  %v450_v52 = vld [vmem:[%s3612_s1 + $0x1c0] sm:$0xff] }
  0xa0   : > { %800 = vmatpush.msrb.mxu3 %v454_v61  ;;  %525 = vmatmul.f32.gmra.mxu2 %v2566_v51  ;;  %v433_v61 = vld [vmem:[%s3612_s1 + $0x138] sm:$0xff] }
  0xa1   : > { %638 = vmatmul.f32.gmra.mxu3 %v2569_v62  ;;  %688 = vmatpush.msrb.mxu2 %v437_v56  ;;  %v449_v56 = vld [vmem:[%s3612_s1 + $0x1b8] sm:$0xff] }
  0xa2   : > { %801 = vmatpush.msrb.mxu3 %v453_v14  ;;  %v432_v14 = vld [vmem:[%s3612_s1 + $0x130] sm:$0xff] }
  0xa3   : > { %689 = vmatpush.msrb.mxu2 %v436_v22  ;;  %477 = vmatmul.f32.gmra.mxu0 %v2374_v4  ;;  %v448_v22 = vld [vmem:[%s3612_s1 + $0x1b0] sm:$0xff] }
  0xa4   : > { %802 = vmatpush.msrb.mxu3 %v452_v53  ;;  %590 = vmatmul.f32.gmra.mxu1 %v2377_v5  ;;  %v431_v53 = vld [vmem:[%s3612_s1 + $0x128] sm:$0xff] }
  0xa5   : > { %690 = vmatpush.msrb.mxu2 %v435_v10  ;;  %v447_v10 = vld [vmem:[%s3612_s1 + $0x1a8] sm:$0xff] }
  0xa6   : > { %803 = vmatpush.msrb.mxu3 %v451_v57  ;;  %v430_v57 = vld [vmem:[%s3612_s1 + $0x120] sm:$0xff] }
  0xa7   : > { %691 = vmatpush.msrb.mxu2 %v434_v60  ;;  %v446_v60 = vld [vmem:[%s3612_s1 + $0x1a0] sm:$0xff] }
  0xa8   : > { %528 = vmatmul.f32.gmra.mxu2 %v2578_v47  ;;  %804 = vmatpush.msrb.mxu3 %v450_v52  ;;  %v429_v52 = vld [vmem:[%s3612_s1 + $0x118] sm:$0xff] }
  0xa9   : > { %641 = vmatmul.f32.gmra.mxu3 %v2581_v59  ;;  %692 = vmatpush.msrb.mxu2 %v433_v61  ;;  %v445_v61 = vld [vmem:[%s3612_s1 + $0x198] sm:$0xff] }
  0xaa   : > { %805 = vmatpush.msrb.mxu3 %v449_v56  ;;  %v428_v56 = vld [vmem:[%s3612_s1 + $0x110] sm:$0xff] }
  0xab   : > { %480 = vmatmul.f32.gmra.mxu0 %v2386_v8  ;;  %693 = vmatpush.msrb.mxu2 %v432_v14  ;;  %v444_v14 = vld [vmem:[%s3612_s1 + $0x190] sm:$0xff] }
  0xac   : > { %593 = vmatmul.f32.gmra.mxu1 %v2389_v9  ;;  %806 = vmatpush.msrb.mxu3 %v448_v22  ;;  %v427_v22 = vld [vmem:[%s3612_s1 + $0x108] sm:$0xff] }
  0xad   : > { %694 = vmatpush.msrb.mxu2 %v431_v53  ;;  %v443_v53 = vld [vmem:[%s3612_s1 + $0x188] sm:$0xff] }
  0xae   : > { %807 = vmatpush.msrb.mxu3 %v447_v10  ;;  %v426_v10 = vld [vmem:[%s3612_s1 + $0x100] sm:$0xff] }
  0xaf   : > { %695 = vmatpush.msrb.mxu2 %v430_v57  ;;  %v442_v57 = vld [vmem:[%s3612_s1 + $0x180] sm:$0xff] }
  0xb0   : > { %531 = vmatmul.f32.gmra.mxu2 %v2590_v43  ;;  %808 = vmatpush.msrb.mxu3 %v446_v60  ;;  %v911_v60 = vld [vmem:[%s3613_s2 + $0x8] sm:$0x1] }
  0xb1   : > { %644 = vmatmul.f32.gmra.mxu3 %v2593_v63  ;;  %696 = vmatpush.msrb.mxu2 %v429_v52  ;;  %v3748_v52 = vld [vmem:[#allocation43_spill] sm:$0xff] }
  0xb2   : > { %809 = vmatpush.msrb.mxu3 %v445_v61  ;;  %2082 = vmatpush.msk.msrb.mxu0 %vm1009_vm0, %v911_v60  ;;  %v3749_v61 = vld [vmem:[#allocation44_spill] sm:$0xff] }
  0xb3   : > { %483 = vmatmul.f32.gmra.mxu0 %v2398_v12  ;;  %697 = vmatpush.msrb.mxu2 %v428_v56  ;;  %v3750_v56 = vld [vmem:[#allocation97_spill] sm:$0xff]  ;;  %v3757_v60 = vld [vmem:[#allocation4_spill] sm:$0xff] }
  0xb4   : > { %596 = vmatmul.f32.gmra.mxu1 %v2401_v13  ;;  %810 = vmatpush.msrb.mxu3 %v444_v14  ;;  %v3751_v14 = vld [vmem:[#allocation47_spill] sm:$0xff] }
  0xb5   : > { %698 = vmatpush.msrb.mxu2 %v427_v22  ;;  %v3752_v22 = vld [vmem:[#allocation48_spill] sm:$0xff] }
  0xb6   : > { %811 = vmatpush.msrb.mxu3 %v443_v53  ;;  %v3753_v53 = vld [vmem:[#allocation100_spill] sm:$0xff] }
  0xb7   : > { %699 = vmatpush.msrb.mxu2 %v426_v10  ;;  %v3754_v10 = vld [vmem:[#allocation101_spill] sm:$0xff] }
  0xb8   : > { %534 = vmatmul.f32.gmra.mxu2 %v2602_v39  ;;  %812 = vmatpush.msrb.mxu3 %v442_v57  ;;  %v3755_v57 = vld [vmem:[#allocation51_spill] sm:$0xff] }
  0xb9   : > { %647 = vmatmul.f32.gmra.mxu3 %v2605_v54 }
  0xbb   : > { %486 = vmatmul.f32.gmra.mxu0 %v2410_v16 }
  0xbc   : > { %599 = vmatmul.f32.gmra.mxu1 %v2413_v17  ;;  %v3789_v17 = vld [vmem:[#allocation56_spill] sm:$0xff] }
  0xc0   : > { %537 = vmatmul.f32.gmra.mxu2 %v2614_v35 }
  0xc1   : > { %650 = vmatmul.f32.gmra.mxu3 %v2617_v50 }
  0xc3   : > { %489 = vmatmul.f32.gmra.mxu0 %v2422_v20 }
  0xc4   : > { %602 = vmatmul.f32.gmra.mxu1 %v2425_v21 }
  0xc8   : > { %540 = vmatmul.f32.gmra.mxu2 %v2626_v31 }
  0xc9   : > { %653 = vmatmul.f32.gmra.mxu3 %v2629_v46 }
  0xcb   : > { %492 = vmatmul.f32.gmra.mxu0 %v2434_v24 }
  0xcc   : > { %605 = vmatmul.f32.gmra.mxu1 %v2437_v25  ;;  %v3788_v25 = vld [vmem:[#allocation54_spill] sm:$0xff] }
  0xd0   : > { %543 = vmatmul.f32.gmra.mxu2 %v2638_v27 }
  0xd1   : > { %656 = vmatmul.f32.gmra.mxu3 %v2641_v42 }
  0xd3   : > { %495 = vmatmul.f32.gmra.mxu0 %v2446_v28 }
  0xd4   : > { %608 = vmatmul.f32.gmra.mxu1 %v2449_v29 }
  0xd8   : > { %546 = vmatmul.f32.gmra.mxu2 %v2650_v23 }
  0xd9   : > { %659 = vmatmul.f32.gmra.mxu3 %v2653_v38 }
  0xdb   : > { %498 = vmatmul.f32.gmra.mxu0 %v2458_v32 }
  0xdc   : > { %611 = vmatmul.f32.gmra.mxu1 %v2461_v33 }
  0xe0   : > { %549 = vmatmul.f32.gmra.mxu2 %v2662_v19 }
  0xe1   : > { %662 = vmatmul.f32.gmra.mxu3 %v2665_v34 }
  0xe3   : > { %501 = vmatmul.f32.gmra.mxu0 %v2470_v36 }
  0xe4   : > { %614 = vmatmul.f32.gmra.mxu1 %v2473_v37  ;;  %v3786_v37 = vld [vmem:[#allocation50_spill] sm:$0xff] }
  0xe8   : > { %552 = vmatmul.f32.gmra.mxu2 %v2674_v15 }
  0xe9   : > { %665 = vmatmul.f32.gmra.mxu3 %v2677_v30 }
  0xeb   : > { %504 = vmatmul.f32.gmra.mxu0 %v2482_v40 }
  0xec   : > { %617 = vmatmul.f32.gmra.mxu1 %v2485_v41  ;;  %v3785_v41 = vld [vmem:[#allocation49_spill] sm:$0xff] }
  0xf0   : > { %555 = vmatmul.f32.gmra.mxu2 %v2686_v11 }
  0xf1   : > { %668 = vmatmul.f32.gmra.mxu3 %v2689_v26 }
  0xf3   : > { %507 = vmatmul.f32.gmra.mxu0 %v2494_v44 }
  0xf4   : > { %620 = vmatmul.f32.gmra.mxu1 %v2497_v45 }
  0xf8   : > { %558 = vmatmul.f32.gmra.mxu2 %v2698_v7 }
  0xf9   : > { %671 = vmatmul.f32.gmra.mxu3 %v2701_v6 }
  0xfb   : > { %510 = vmatmul.f32.gmra.mxu0 %v2506_v48 }
  0xfc   : > { %623 = vmatmul.f32.gmra.mxu1 %v2509_v49 }
 0x100   : > { %561 = vmatmul.f32.gmra.mxu2 %v2710_v3 }
 0x101   : > { %674 = vmatmul.f32.gmra.mxu3 %v2713_v2  ;;  %v3756_v2 = vld [vmem:[#allocation52_spill] sm:$0xff] }
 0x103   : > { %513 = vmatmul.f32.gmra.mxu0 %v3748_v52  ;;  %v3758_v52 = vld [vmem:[#allocation5_spill] sm:$0xff] }
 0x104   : > { %626 = vmatmul.f32.gmra.mxu1 %v3749_v61 }
 0x108   : > { %564 = vmatmul.f32.gmra.mxu2 %v2722_v18 }
 0x109   : > { %677 = vmatmul.f32.gmra.mxu3 %v3750_v56  ;;  %v3759_v56 = vld [vmem:[#allocation7_spill] sm:$0xff] }
 0x10b   : > { %516 = vmatmul.f32.gmra.mxu0 %v3751_v14  ;;  %v3760_v14 = vld [vmem:[#allocation8_spill] sm:$0xff] }
 0x10c   : > { %629 = vmatmul.f32.gmra.mxu1 %v3752_v22 }
 0x110   : > { %567 = vmatmul.f32.gmra.mxu2 %v3753_v53 }
 0x111   : > { %680 = vmatmul.f32.gmra.mxu3 %v3754_v10  ;;  %v3761_v10 = vld [vmem:[#allocation10_spill] sm:$0xff] }
 0x113   : > { %519 = vmatmul.f32.gmra.mxu0 %v3755_v57  ;;  %v3762_v57 = vld [vmem:[#allocation11_spill] sm:$0xff] }
 0x114   : > { %632 = vmatmul.f32.gmra.mxu1 %v3756_v2 }
 0x118   : > { %700 = vmatmul.f32.vlgmr.msrb.gmra.mxu2 %v3757_v60 }
 0x119   : > { %813 = vmatmul.f32.vlgmr.msrb.gmra.mxu3 %v3758_v52  ;;  %v3763_v52 = vld [vmem:[#allocation13_spill] sm:$0xff] }
 0x11b   : > { %v523_v61 = vpop.f32.mrf.mxu2 }
 0x11c   : > { %v636_v6 = vpop.f32.mrf.mxu3 }
 0x11d   : > { %v3007_v26 = vadd.f32 %v636_v6, %v523_v61  ;;  %v3764_v6 = vld [vmem:[#allocation14_spill] sm:$0xff] }
 0x120   : > { %703 = vmatmul.f32.gmra.mxu2 %v3759_v56 }
 0x121   : > { %816 = vmatmul.f32.gmra.mxu3 %v3760_v14  ;;  %v3765_v14 = vld [vmem:[#allocation16_spill] sm:$0xff] }
 0x123   : > { %v526_v22 = vpop.f32.mrf.mxu2 }
 0x124   : > { %v639_v53 = vpop.f32.mrf.mxu3 }
 0x125   : > { %v3011_v30 = vadd.f32 %v639_v53, %v526_v22  ;;  %v3766_v22 = vld [vmem:[#allocation17_spill] sm:$0xff] }
 0x128   : > { %706 = vmatmul.f32.gmra.mxu2 %v3761_v10 }
 0x129   : > { %819 = vmatmul.f32.gmra.mxu3 %v3762_v57  ;;  %v3767_v57 = vld [vmem:[#allocation19_spill] sm:$0xff] }
 0x12b   : > { %v529_v2 = vpop.f32.mrf.mxu2 }
 0x12c   : > { %v642_v60 = vpop.f32.mrf.mxu3 }
 0x12d   : > { %v3015_v34 = vadd.f32 %v642_v60, %v529_v2  ;;  %v3768_v2 = vld [vmem:[#allocation20_spill] sm:$0xff]  ;;  %v910_v60 = vld [vmem:[%s3613_s2] sm:$0xff] }
 0x12e   : > { %1028 = vmatpush.msrb.mxu0 %v910_v60  ;;  %v3773_v60 = vld [vmem:[#allocation29_spill] sm:$0xff] }
 0x130   : > { %709 = vmatmul.f32.gmra.mxu2 %v3763_v52 }
 0x131   : > { %822 = vmatmul.f32.gmra.mxu3 %v3764_v6 }
 0x133   : > { %v532_v61 = vpop.f32.mrf.mxu2 }
 0x134   : > { %v645_v56 = vpop.f32.mrf.mxu3 }
 0x135   : > { %v3019_v38 = vadd.f32 %v645_v56, %v532_v61  ;;  %v3769_v56 = vld [vmem:[#allocation22_spill] sm:$0xff] }
 0x138   : > { %712 = vmatmul.f32.gmra.mxu2 %v3765_v14  ;;  %v3770_v14 = vld [vmem:[#allocation23_spill] sm:$0xff] }
 0x139   : > { %825 = vmatmul.f32.gmra.mxu3 %v3766_v22 }
 0x13b   : > { %v535_v53 = vpop.f32.mrf.mxu2 }
 0x13c   : > { %v648_v10 = vpop.f32.mrf.mxu3 }
 0x13d   : > { %v3023_v42 = vadd.f32 %v648_v10, %v535_v53 }
 0x140   : > { %715 = vmatmul.f32.gmra.mxu2 %v3767_v57  ;;  %v3771_v57 = vld [vmem:[#allocation26_spill] sm:$0xff] }
 0x141   : > { %828 = vmatmul.f32.gmra.mxu3 %v3768_v2  ;;  %v3772_v2 = vld [vmem:[#allocation27_spill] sm:$0xff] }
 0x143   : > { %v538_v52 = vpop.f32.mrf.mxu2 }
 0x144   : > { %v651_v6 = vpop.f32.mrf.mxu3 }
 0x145   : > { %v3030_v61 = vadd.f32 %v651_v6, %v538_v52  ;;  %v3774_v52 = vld [vmem:[#allocation30_spill] sm:$0xff] }
 0x148   : > { %718 = vmatmul.f32.gmra.mxu2 %v3769_v56 }
 0x149   : > { %831 = vmatmul.f32.gmra.mxu3 %v3770_v14  ;;  %v3775_v14 = vld [vmem:[#allocation32_spill] sm:$0xff] }
 0x14b   : > { %v541_v22 = vpop.f32.mrf.mxu2 }
 0x14c   : > { %v654_v53 = vpop.f32.mrf.mxu3 }
 0x14d   : > { %v3034_v10 = vadd.f32 %v654_v53, %v541_v22  ;;  %v3776_v22 = vld [vmem:[#allocation33_spill] sm:$0xff] }
 0x150   : > { %721 = vmatmul.f32.gmra.mxu2 %v3771_v57 }
 0x151   : > { %834 = vmatmul.f32.gmra.mxu3 %v3772_v2  ;;  %v3777_v2 = vld [vmem:[#allocation35_spill] sm:$0xff] }
 0x153   : > { %v544_v46 = vpop.f32.mrf.mxu2 }
 0x154   : > { %v657_v50 = vpop.f32.mrf.mxu3 }
 0x155   : > { %v3038_v54 = vadd.f32 %v657_v50, %v544_v46  ;;  %v3778_v46 = vld [vmem:[#allocation36_spill] sm:$0xff] }
 0x158   : > { %724 = vmatmul.f32.gmra.mxu2 %v3773_v60 }
 0x159   : > { %837 = vmatmul.f32.gmra.mxu3 %v3774_v52  ;;  %v3779_v52 = vld [vmem:[#allocation38_spill] sm:$0xff] }
 0x15b   : > { %v547_v6 = vpop.f32.mrf.mxu2 }
 0x15c   : > { %v660_v56 = vpop.f32.mrf.mxu3 }
 0x15d   : > { %v3042_v63 = vadd.f32 %v660_v56, %v547_v6  ;;  %v3780_v6 = vld [vmem:[#allocation39_spill] sm:$0xff] }
 0x160   : > { %727 = vmatmul.f32.gmra.mxu2 %v3775_v14 }
 0x161   : > { %840 = vmatmul.f32.gmra.mxu3 %v3776_v22  ;;  %v3781_v22 = vld [vmem:[#allocation41_spill] sm:$0xff] }
 0x163   : > { %v550_v53 = vpop.f32.mrf.mxu2 }
 0x164   : > { %v663_v57 = vpop.f32.mrf.mxu3 }
 0x165   : > { %v3046_v59 = vadd.f32 %v663_v57, %v550_v53  ;;  %v3782_v53 = vld [vmem:[#allocation42_spill] sm:$0xff]  ;;  %v475_v57 = vpop.f32.mrf.mxu0 }
 0x168   : > { %730 = vmatmul.f32.gmra.mxu2 %v3777_v2  ;;  %v588_v2 = vpop.f32.mrf.mxu1 }
 0x169   : > { %843 = vmatmul.f32.gmra.mxu3 %v3778_v46  ;;  %v589_v13 = vadd.f32 %v588_v2, %v475_v57  ;;  %v1169_v57 = vld [vmem:[%s3614_s3 + $0x58] sm:$0xff]  ;;  %v3792_v2 = vld [vmem:[#allocation60_spill] sm:$0xff] }
 0x16b   : > { %v553_v50 = vpop.f32.mrf.mxu2 }
 0x16c   : > { %v666_v60 = vpop.f32.mrf.mxu3 }
 0x16d   : > { %v3050_v62 = vadd.f32 %v666_v60, %v553_v50  ;;  %v3783_v50 = vld [vmem:[#allocation45_spill] sm:$0xff]  ;;  %v3784_v60 = vld [vmem:[#allocation46_spill] sm:$0xff] }
 0x170   : > { %733 = vmatmul.f32.gmra.mxu2 %v3779_v52  ;;  %v1173_v52 = vld [vmem:[%s3614_s3 + $0x78] sm:$0xff] }
 0x171   : > { %846 = vmatmul.f32.gmra.mxu3 %v3780_v6  ;;  %v478_v6 = vpop.f32.mrf.mxu0  ;;  %1178 = vmatpush.msrb.mxu1 %v1173_v52  ;;  %v3787_v52 = vld [vmem:[#allocation53_spill] sm:$0xff] }
 0x173   : > { %v556_v56 = vpop.f32.mrf.mxu2 }
 0x174   : > { %v669_v14 = vpop.f32.mrf.mxu3 }
 0x175   : > { %v3054_v58 = vadd.f32 %v669_v14, %v556_v56  ;;  %v591_v56 = vpop.f32.mrf.mxu1 }
 0x178   : > { %736 = vmatmul.f32.gmra.mxu2 %v3781_v22 }
 0x179   : > { %849 = vmatmul.f32.gmra.mxu3 %v3782_v53 }
 0x17b   : > { %v559_v49 = vpop.f32.mrf.mxu2 }
 0x17c   : > { %v672_v46 = vpop.f32.mrf.mxu3 }
 0x17d   : > { %v3058_v45 = vadd.f32 %v672_v46, %v559_v49  ;;  %v1172_v49 = vld [vmem:[%s3614_s3 + $0x70] sm:$0xff]  ;;  %v481_v46 = vpop.f32.mrf.mxu0 }
 0x17e   : > { %1179 = vmatpush.msrb.mxu1 %v1172_v49 }
 0x180   : > { %739 = vmatmul.f32.gmra.mxu2 %v3783_v50  ;;  %v594_v50 = vpop.f32.mrf.mxu1 }
 0x181   : > { %852 = vmatmul.f32.gmra.mxu3 %v3784_v60 }
 0x183   : > { %v562_v14 = vpop.f32.mrf.mxu2 }
 0x184   : > { %v675_v22 = vpop.f32.mrf.mxu3 }
 0x185   : > { %v3065_v53 = vadd.f32 %v675_v22, %v562_v14  ;;  %v484_v49 = vpop.f32.mrf.mxu0 }
 0x188   : > { %742 = vmatmul.f32.gmra.mxu2 %v3785_v41  ;;  %v1171_v41 = vld [vmem:[%s3614_s3 + $0x68] sm:$0xff]  ;;  %v597_v21 = vpop.f32.mrf.mxu1 }
 0x189   : > { %855 = vmatmul.f32.gmra.mxu3 %v3786_v37  ;;  %1180 = vmatpush.msrb.mxu1 %v1171_v41 }
 0x18b   : > { %v565_v60 = vpop.f32.mrf.mxu2 }
 0x18c   : > { %v678_v33 = vpop.f32.mrf.mxu3 }
 0x18d   : > { %v3072_v29 = vadd.f32 %v678_v33, %v565_v60  ;;  %v3790_v33 = vld [vmem:[#allocation57_spill] sm:$0xff]  ;;  %v487_v5 = vpop.f32.mrf.mxu0 }
 0x190   : > { %745 = vmatmul.f32.gmra.mxu2 %v3787_v52 }
 0x191   : > { %858 = vmatmul.f32.gmra.mxu3 %v3788_v25  ;;  %v1170_v25 = vld [vmem:[%s3614_s3 + $0x60] sm:$0xff] }
 0x192   : > { %1181 = vmatpush.msrb.mxu1 %v1170_v25 }
 0x193   : > { %v568_v37 = vpop.f32.mrf.mxu2 }
 0x194   : > { %v681_v14 = vpop.f32.mrf.mxu3  ;;  %1182 = vmatpush.msrb.mxu1 %v1169_v57 }
 0x195   : > { %v3079_v22 = vadd.f32 %v681_v14, %v568_v37  ;;  %v600_v37 = vpop.f32.mrf.mxu1  ;;  %v3791_v14 = vld [vmem:[#allocation59_spill] sm:$0xff] }
 0x198   : > { %748 = vmatmul.f32.gmra.mxu2 %v3789_v17  ;;  %v592_v17 = vadd.f32 %v591_v56, %v478_v6  ;;  %v1168_v6 = vld [vmem:[%s3614_s3 + $0x50] sm:$0xff]  ;;  %v3794_v56 = vld [vmem:[#allocation63_spill] sm:$0xff] }
 0x199   : > { %861 = vmatmul.f32.gmra.mxu3 %v3790_v33  ;;  %1183 = vmatpush.msrb.mxu1 %v1168_v6 }
 0x19b   : > { %v701_v60 = vpop.f32.mrf.mxu2 }
 0x19c   : > { %v814_v52 = vpop.f32.mrf.mxu3  ;;  %v702_v9 = vadd.f32 %v701_v60, %v589_v13  ;;  %v3793_v60 = vld [vmem:[#allocation62_spill] sm:$0xff] }
 0x19e   : > { %v815_v41 = vadd.f32 %v814_v52, %v702_v9  ;;  %v595_v9 = vadd.f32 %v594_v50, %v481_v46  ;;  %v490_v52 = vpop.f32.mrf.mxu0  ;;  %v1167_v46 = vld [vmem:[%s3614_s3 + $0x48] sm:$0xff]  ;;  %v3796_v50 = vld [vmem:[#allocation66_spill] sm:$0xff] }
 0x19f   : > { %1184 = vmatpush.msrb.mxu1 %v1167_v46 }
 0x1a0   : > { %751 = vmatmul.f32.gmra.mxu2 %v3791_v14  ;;  %2083 = vmatmul.msk.f32.vlgmr.msrb.gmra.mxu0 %vm912_vm1, %v815_v41  ;;  %v603_v14 = vpop.f32.mrf.mxu1 }
 0x1a1   : > { %864 = vmatmul.f32.gmra.mxu3 %v3792_v2 }
 0x1a3   : > { %v704_v33 = vpop.f32.mrf.mxu2 }
 0x1a4   : > { %v817_v25 = vpop.f32.mrf.mxu3  ;;  %v705_v1 = vadd.f32 %v704_v33, %v592_v17  ;;  %v3795_v17 = vld [vmem:[#allocation65_spill] sm:$0xff] }
 0x1a6   : > { %v818_v13 = vadd.f32 %v817_v25, %v705_v1  ;;  %v598_v1 = vadd.f32 %v597_v21, %v484_v49  ;;  %v493_v33 = vpop.f32.mrf.mxu0  ;;  %v1166_v21 = vld [vmem:[%s3614_s3 + $0x40] sm:$0xff] }
 0x1a7   : > { %1185 = vmatpush.msrb.mxu1 %v1166_v21 }
 0x1a8   : > { %754 = vmatmul.f32.gmra.mxu2 %v3793_v60  ;;  %2084 = vmatmul.msk.f32.gmra.mxu0 %vm912_vm1, %v818_v13  ;;  %v606_v25 = vpop.f32.mrf.mxu1 }
 0x1a9   : > { %867 = vmatmul.f32.gmra.mxu3 %v3794_v56 }
 0x1ab   : > { %v707_v41 = vpop.f32.mrf.mxu2 }
 0x1ac   : > { %v820_v57 = vpop.f32.mrf.mxu3  ;;  %v708_v2 = vadd.f32 %v707_v41, %v595_v9  ;;  %v3797_v9 = vld [vmem:[#allocation68_spill] sm:$0xff]  ;;  %v601_v41 = vadd.f32 %v600_v37, %v487_v5  ;;  %v1165_v5 = vld [vmem:[%s3614_s3 + $0x38] sm:$0xff] }
 0x1ad   : > { %v3800_v37 = vld [vmem:[#allocation72_spill] sm:$0xff]  ;;  %1186 = vmatpush.msrb.mxu1 %v1165_v5 }
 0x1ae   : > { %v821_v28 = vadd.f32 %v820_v57, %v708_v2 }
 0x1b0   : > { %757 = vmatmul.f32.gmra.mxu2 %v3795_v17  ;;  %2085 = vmatmul.msk.f32.gmra.mxu0 %vm912_vm1, %v821_v28  ;;  %v3798_v28 = vld [vmem:[#allocation69_spill] sm:$0xff]  ;;  %v496_v17 = vpop.f32.mrf.mxu0  ;;  %v609_v46 = vpop.f32.mrf.mxu1 }
 0x1b1   : > { %870 = vmatmul.f32.gmra.mxu3 %v3796_v50  ;;  %v610_v5 = vadd.f32 %v609_v46, %v496_v17  ;;  %v1162_v17 = vld [vmem:[%s3614_s3 + $0x20] sm:$0xff]  ;;  %v3806_v46 = vld [vmem:[#allocation81_spill] sm:$0xff] }
 0x1b3   : > { %v710_v13 = vpop.f32.mrf.mxu2 }
 0x1b4   : > { %v823_v60 = vpop.f32.mrf.mxu3  ;;  %v711_v6 = vadd.f32 %v710_v13, %v598_v1  ;;  %v3799_v1 = vld [vmem:[#allocation71_spill] sm:$0xff]  ;;  %v604_v13 = vadd.f32 %v603_v14, %v490_v52  ;;  %v1164_v52 = vld [vmem:[%s3614_s3 + $0x30] sm:$0xff] }
 0x1b5   : > { %v3802_v14 = vld [vmem:[#allocation75_spill] sm:$0xff]  ;;  %1187 = vmatpush.msrb.mxu1 %v1164_v52 }
 0x1b6   : > { %v824_v56 = vadd.f32 %v823_v60, %v711_v6 }
 0x1b8   : > { %760 = vmatmul.f32.gmra.mxu2 %v3797_v9  ;;  %2086 = vmatmul.msk.f32.gmra.mxu0 %vm912_vm1, %v824_v56  ;;  %v612_v21 = vpop.f32.mrf.mxu1 }
 0x1b9   : > { %873 = vmatmul.f32.gmra.mxu3 %v3798_v28  ;;  %v3801_v28 = vld [vmem:[#allocation74_spill] sm:$0xff] }
 0x1bb   : > { %v713_v49 = vpop.f32.mrf.mxu2 }
 0x1bc   : > { %v826_v57 = vpop.f32.mrf.mxu3  ;;  %v714_v2 = vadd.f32 %v713_v49, %v601_v41  ;;  %v499_v41 = vpop.f32.mrf.mxu0  ;;  %v607_v49 = vadd.f32 %v606_v25, %v493_v33  ;;  %v1163_v33 = vld [vmem:[%s3614_s3 + $0x28] sm:$0xff]  ;;  %v3804_v25 = vld [vmem:[#allocation78_spill] sm:$0xff] }
 0x1bd   : > { %1188 = vmatpush.msrb.mxu1 %v1163_v33  ;;  %v613_v52 = vadd.f32 %v612_v21, %v499_v41  ;;  %v1161_v41 = vld [vmem:[%s3614_s3 + $0x18] sm:$0xff]  ;;  %v3808_v21 = vld [vmem:[#allocation84_spill] sm:$0xff] }
 0x1be   : > { %v827_v50 = vadd.f32 %v826_v57, %v714_v2 }
 0x1bf   : > { %1189 = vmatpush.msrb.mxu1 %v1162_v17 }
 0x1c0   : > { %763 = vmatmul.f32.gmra.mxu2 %v3799_v1  ;;  %2087 = vmatmul.msk.f32.gmra.mxu0 %vm912_vm1, %v827_v50 }
 0x1c1   : > { %876 = vmatmul.f32.gmra.mxu3 %v3800_v37  ;;  %1190 = vmatpush.msrb.mxu1 %v1161_v41 }
 0x1c3   : > { %v716_v60 = vpop.f32.mrf.mxu2 }
 0x1c4   : > { %v829_v6 = vpop.f32.mrf.mxu3  ;;  %v717_v56 = vadd.f32 %v716_v60, %v604_v13  ;;  %v3803_v13 = vld [vmem:[#allocation77_spill] sm:$0xff]  ;;  %v502_v37 = vpop.f32.mrf.mxu0 }
 0x1c5   : > { %v615_v60 = vpop.f32.mrf.mxu1 }
 0x1c6   : > { %v830_v9 = vadd.f32 %v829_v6, %v717_v56  ;;  %v616_v33 = vadd.f32 %v615_v60, %v502_v37  ;;  %v1160_v37 = vld [vmem:[%s3614_s3 + $0x10] sm:$0xff]  ;;  %v3810_v60 = vld [vmem:[#allocation87_spill] sm:$0xff] }
 0x1c7   : > { %1191 = vmatpush.msrb.mxu1 %v1160_v37 }
 0x1c8   : > { %766 = vmatmul.f32.gmra.mxu2 %v3801_v28  ;;  %2088 = vmatmul.msk.f32.gmra.mxu0 %vm912_vm1, %v830_v9 }
 0x1c9   : > { %879 = vmatmul.f32.gmra.mxu3 %v3802_v14 }
 0x1cb   : > { %v719_v57 = vpop.f32.mrf.mxu2 }
 0x1cc   : > { %v832_v2 = vpop.f32.mrf.mxu3  ;;  %v720_v50 = vadd.f32 %v719_v57, %v607_v49  ;;  %v3805_v49 = vld [vmem:[#allocation80_spill] sm:$0xff]  ;;  %v505_v14 = vpop.f32.mrf.mxu0 }
 0x1cd   : > { %v618_v57 = vpop.f32.mrf.mxu1 }
 0x1ce   : > { %v833_v1 = vadd.f32 %v832_v2, %v720_v50  ;;  %v619_v17 = vadd.f32 %v618_v57, %v505_v14  ;;  %v1159_v14 = vld [vmem:[%s3614_s3 + $0x8] sm:$0xff]  ;;  %v3812_v57 = vld [vmem:[#allocation90_spill] sm:$0xff] }
 0x1cf   : > { %1192 = vmatpush.msrb.mxu1 %v1159_v14 }
 0x1d0   : > { %769 = vmatmul.f32.gmra.mxu2 %v3803_v13  ;;  %2089 = vmatmul.msk.f32.gmra.mxu0 %vm912_vm1, %v833_v1 }
 0x1d1   : > { %882 = vmatmul.f32.gmra.mxu3 %v3804_v25 }
 0x1d3   : > { %v722_v6 = vpop.f32.mrf.mxu2 }
 0x1d4   : > { %v835_v56 = vpop.f32.mrf.mxu3  ;;  %v723_v9 = vadd.f32 %v722_v6, %v610_v5  ;;  %v3807_v5 = vld [vmem:[#allocation83_spill] sm:$0xff] }
 0x1d6   : > { %v836_v28 = vadd.f32 %v835_v56, %v723_v9  ;;  %v508_v9 = vpop.f32.mrf.mxu0 }
 0x1d8   : > { %772 = vmatmul.f32.gmra.mxu2 %v3805_v49  ;;  %2090 = vmatmul.msk.f32.gmra.mxu0 %vm912_vm1, %v836_v28  ;;  %v621_v28 = vpop.f32.mrf.mxu1 }
 0x1d9   : > { %885 = vmatmul.f32.gmra.mxu3 %v3806_v46  ;;  %v622_v41 = vadd.f32 %v621_v28, %v508_v9  ;;  %v1158_v9 = vld [vmem:[%s3614_s3] sm:$0xff]  ;;  %v3814_v28 = vld [vmem:[#allocation93_spill] sm:$0xff] }
 0x1da   : > { %1193 = vmatpush.msrb.mxu1 %v1158_v9 }
 0x1db   : > { %v725_v2 = vpop.f32.mrf.mxu2 }
 0x1dc   : > { %v838_v50 = vpop.f32.mrf.mxu3  ;;  %v726_v1 = vadd.f32 %v725_v2, %v613_v52  ;;  %v3809_v52 = vld [vmem:[#allocation86_spill] sm:$0xff] }
 0x1de   : > { %v839_v13 = vadd.f32 %v838_v50, %v726_v1 }
 0x1e0   : > { %775 = vmatmul.f32.gmra.mxu2 %v3807_v5  ;;  %2091 = vmatmul.msk.f32.gmra.mxu0 %vm912_vm1, %v839_v13  ;;  %v511_v13 = vpop.f32.mrf.mxu0  ;;  %v624_v5 = vpop.f32.mrf.mxu1 }
 0x1e1   : > { %888 = vmatmul.f32.gmra.mxu3 %v3808_v21 }
 0x1e3   : > { %v728_v25 = vpop.f32.mrf.mxu2 }
 0x1e4   : > { %v841_v6 = vpop.f32.mrf.mxu3  ;;  %v729_v56 = vadd.f32 %v728_v25, %v616_v33  ;;  %v3811_v33 = vld [vmem:[#allocation89_spill] sm:$0xff] }
 0x1e6   : > { %v842_v49 = vadd.f32 %v841_v6, %v729_v56 }
 0x1e8   : > { %778 = vmatmul.f32.gmra.mxu2 %v3809_v52  ;;  %2092 = vmatmul.msk.f32.gmra.mxu0 %vm912_vm1, %v842_v49  ;;  %v3813_v49 = vld [vmem:[#allocation92_spill] sm:$0xff]  ;;  %v625_v52 = vadd.f32 %v624_v5, %v511_v13  ;;  %v627_v37 = vpop.f32.mrf.mxu1 }
 0x1e9   : > { %891 = vmatmul.f32.gmra.mxu3 %v3810_v60 }
 0x1eb   : > { %v731_v46 = vpop.f32.mrf.mxu2 }
 0x1ec   : > { %v844_v2 = vpop.f32.mrf.mxu3  ;;  %v732_v50 = vadd.f32 %v731_v46, %v619_v17  ;;  %v514_v17 = vpop.f32.mrf.mxu0 }
 0x1ee   : > { %v845_v1 = vadd.f32 %v844_v2, %v732_v50 }
 0x1f0   : > { %781 = vmatmul.f32.gmra.mxu2 %v3811_v33  ;;  %2093 = vmatmul.msk.f32.gmra.mxu0 %vm912_vm1, %v845_v1  ;;  %v3815_v1 = vld [vmem:[#allocation95_spill] sm:$0xff]  ;;  %v628_v33 = vadd.f32 %v627_v37, %v514_v17  ;;  %v630_v5 = vpop.f32.mrf.mxu1 }
 0x1f1   : > { %894 = vmatmul.f32.gmra.mxu3 %v3812_v57 }
 0x1f3   : > { %v734_v21 = vpop.f32.mrf.mxu2 }
 0x1f4   : > { %v847_v25 = vpop.f32.mrf.mxu3  ;;  %v735_v6 = vadd.f32 %v734_v21, %v622_v41  ;;  %v3816_v41 = vld [vmem:[#allocation96_spill] sm:$0xff]  ;;  %v517_v13 = vpop.f32.mrf.mxu0 }
 0x1f6   : > { %v848_v56 = vadd.f32 %v847_v25, %v735_v6  ;;  %v3817_v6 = vld [vmem:[#allocation98_spill] sm:$0xff] }
 0x1f8   : > { %784 = vmatmul.f32.gmra.mxu2 %v3813_v49  ;;  %2094 = vmatmul.msk.f32.gmra.mxu0 %vm912_vm1, %v848_v56  ;;  %v631_v56 = vadd.f32 %v630_v5, %v517_v13  ;;  %v3818_v49 = vld [vmem:[#allocation99_spill] sm:$0xff]  ;;  %v633_v17 = vpop.f32.mrf.mxu1 }
 0x1f9   : > { %897 = vmatmul.f32.gmra.mxu3 %v3814_v28 }
 0x1fb   : > { %v737_v60 = vpop.f32.mrf.mxu2 }
 0x1fc   : > { %v850_v46 = vpop.f32.mrf.mxu3  ;;  %v738_v2 = vadd.f32 %v737_v60, %v625_v52  ;;  %v520_v60 = vpop.f32.mrf.mxu0 }
 0x1fe   : > { %v851_v50 = vadd.f32 %v850_v46, %v738_v2  ;;  %v3819_v46 = vld [vmem:[#allocation102_spill] sm:$0xff]  ;;  %v634_v2 = vadd.f32 %v633_v17, %v520_v60 }
 0x200   : > { %787 = vmatmul.f32.gmra.mxu2 %v3815_v1  ;;  %2095 = vmatmul.msk.f32.gmra.mxu0 %vm912_vm1, %v851_v50  ;;  %v3820_v50 = vld [vmem:[#allocation103_spill] sm:$0xff] }
 0x201   : > { %900 = vmatmul.f32.gmra.mxu3 %v3816_v41 }
 0x203   : > { %v740_v14 = vpop.f32.mrf.mxu2 }
 0x204   : > { %v853_v57 = vpop.f32.mrf.mxu3  ;;  %v741_v21 = vadd.f32 %v740_v14, %v628_v33 }
 0x206   : > { %v854_v25 = vadd.f32 %v853_v57, %v741_v21 }
 0x208   : > { %790 = vmatmul.f32.gmra.mxu2 %v3817_v6  ;;  %2096 = vmatmul.msk.f32.gmra.mxu0 %vm912_vm1, %v854_v25 }
 0x209   : > { %903 = vmatmul.f32.gmra.mxu3 %v3818_v49 }
 0x20b   : > { %v743_v52 = vpop.f32.mrf.mxu2 }
 0x20c   : > { %v856_v9 = vpop.f32.mrf.mxu3  ;;  %v744_v28 = vadd.f32 %v743_v52, %v631_v56 }
 0x20e   : > { %v857_v37 = vadd.f32 %v856_v9, %v744_v28 }
 0x210   : > { %793 = vmatmul.f32.gmra.mxu2 %v3819_v46  ;;  %2097 = vmatmul.msk.f32.gmra.mxu0 %vm912_vm1, %v857_v37 }
 0x211   : > { %906 = vmatmul.f32.gmra.mxu3 %v3820_v50 }
 0x213   : > { %v746_v1 = vpop.f32.mrf.mxu2 }
 0x214   : > { %v859_v33 = vpop.f32.mrf.mxu3  ;;  %v747_v41 = vadd.f32 %v746_v1, %v634_v2 }
 0x216   : > { %v860_v14 = vadd.f32 %v859_v33, %v747_v41 }
 0x218   : > { %2098 = vmatmul.msk.f32.gmra.mxu0 %vm912_vm1, %v860_v14 }
 0x21b   : > { %v749_v13 = vpop.f32.mrf.mxu2 }
 0x21c   : > { %v862_v5 = vpop.f32.mrf.mxu3  ;;  %v750_v57 = vadd.f32 %v749_v13, %v3007_v26 }
 0x21d   : > { %v1030_v21 = vpop.f32.mrf.mxu0 }
 0x21e   : > { %v863_v25 = vadd.f32 %v862_v5, %v750_v57  ;;  %v1126_v6 = vmax.f32 %v1030_v21, 0.0 }
 0x220   : > { %2099 = vmatmul.msk.f32.gmra.mxu0 %vm912_vm1, %v863_v25  ;;  %1194 = vmatmul.f32.vlgmr.msrb.gmra.mxu1 %v1126_v6 }
 0x223   : > { %v752_v56 = vpop.f32.mrf.mxu2 }
 0x224   : > { %v753_v49 = vadd.f32 %v752_v56, %v3011_v30  ;;  %v865_v52 = vpop.f32.mrf.mxu3 }
 0x225   : > { %v1033_v9 = vpop.f32.mrf.mxu0 }
 0x226   : > { %v866_v28 = vadd.f32 %v865_v52, %v753_v49  ;;  %v1127_v60 = vmax.f32 %v1033_v9, 0.0 }
 0x228   : > { %2100 = vmatmul.msk.f32.gmra.mxu0 %vm912_vm1, %v866_v28  ;;  %1197 = vmatmul.f32.gmra.mxu1 %v1127_v60 }
 0x22b   : > { %v755_v17 = vpop.f32.mrf.mxu2 }
 0x22c   : > { %v756_v37 = vadd.f32 %v755_v17, %v3015_v34  ;;  %v868_v26 = vpop.f32.mrf.mxu3 }
 0x22d   : > { %v1036_v46 = vpop.f32.mrf.mxu0 }
 0x22e   : > { %v869_v2 = vadd.f32 %v868_v26, %v756_v37  ;;  %v1128_v50 = vmax.f32 %v1036_v46, 0.0 }
 0x230   : > { %2101 = vmatmul.msk.f32.gmra.mxu0 %vm912_vm1, %v869_v2  ;;  %1200 = vmatmul.f32.gmra.mxu1 %v1128_v50 }
 0x233   : > { %v758_v1 = vpop.f32.mrf.mxu2 }
 0x234   : > { %v759_v30 = vadd.f32 %v758_v1, %v3019_v38  ;;  %v871_v33 = vpop.f32.mrf.mxu3 }
 0x235   : > { %v1039_v41 = vpop.f32.mrf.mxu0 }
 0x236   : > { %v872_v14 = vadd.f32 %v871_v33, %v759_v30  ;;  %v1129_v13 = vmax.f32 %v1039_v41, 0.0 }
 0x238   : > { %2102 = vmatmul.msk.f32.gmra.mxu0 %vm912_vm1, %v872_v14  ;;  %1203 = vmatmul.f32.gmra.mxu1 %v1129_v13 }
 0x23b   : > { %v761_v5 = vpop.f32.mrf.mxu2 }
 0x23c   : > { %v762_v34 = vadd.f32 %v761_v5, %v3023_v42  ;;  %v874_v57 = vpop.f32.mrf.mxu3 }
 0x23d   : > { %v1042_v21 = vpop.f32.mrf.mxu0 }
 0x23e   : > { %v875_v25 = vadd.f32 %v874_v57, %v762_v34  ;;  %v1130_v6 = vmax.f32 %v1042_v21, 0.0 }
 0x240   : > { %2103 = vmatmul.msk.f32.gmra.mxu0 %vm912_vm1, %v875_v25  ;;  %1206 = vmatmul.f32.gmra.mxu1 %v1130_v6 }
 0x243   : > { %v764_v56 = vpop.f32.mrf.mxu2 }
 0x244   : > { %v765_v38 = vadd.f32 %v764_v56, %v3030_v61  ;;  %v877_v49 = vpop.f32.mrf.mxu3 }
 0x245   : > { %v1045_v52 = vpop.f32.mrf.mxu0 }
 0x246   : > { %v878_v9 = vadd.f32 %v877_v49, %v765_v38  ;;  %v1131_v28 = vmax.f32 %v1045_v52, 0.0 }
 0x248   : > { %2104 = vmatmul.msk.f32.gmra.mxu0 %vm912_vm1, %v878_v9  ;;  %1209 = vmatmul.f32.gmra.mxu1 %v1131_v28 }
 0x24b   : > { %v767_v60 = vpop.f32.mrf.mxu2 }
 0x24c   : > { %v768_v42 = vadd.f32 %v767_v60, %v3034_v10  ;;  %v880_v17 = vpop.f32.mrf.mxu3 }
 0x24d   : > { %v1048_v37 = vpop.f32.mrf.mxu0 }
 0x24e   : > { %v881_v26 = vadd.f32 %v880_v17, %v768_v42  ;;  %v1132_v46 = vmax.f32 %v1048_v37, 0.0 }
 0x250   : > { %2105 = vmatmul.msk.f32.gmra.mxu0 %vm912_vm1, %v881_v26  ;;  %1212 = vmatmul.f32.gmra.mxu1 %v1132_v46 }
 0x253   : > { %v770_v2 = vpop.f32.mrf.mxu2 }
 0x254   : > { %v771_v61 = vadd.f32 %v770_v2, %v3038_v54  ;;  %v883_v50 = vpop.f32.mrf.mxu3 }
 0x255   : > { %v1051_v1 = vpop.f32.mrf.mxu0 }
 0x256   : > { %v884_v30 = vadd.f32 %v883_v50, %v771_v61  ;;  %v1133_v33 = vmax.f32 %v1051_v1, 0.0 }
 0x258   : > { %2106 = vmatmul.msk.f32.gmra.mxu0 %vm912_vm1, %v884_v30  ;;  %1215 = vmatmul.f32.gmra.mxu1 %v1133_v33 }
 0x25b   : > { %v773_v41 = vpop.f32.mrf.mxu2 }
 0x25c   : > { %v774_v10 = vadd.f32 %v773_v41, %v3042_v63  ;;  %v886_v14 = vpop.f32.mrf.mxu3 }
 0x25d   : > { %v1054_v13 = vpop.f32.mrf.mxu0 }
 0x25e   : > { %v887_v5 = vadd.f32 %v886_v14, %v774_v10  ;;  %v1134_v34 = vmax.f32 %v1054_v13, 0.0 }
 0x260   : > { %2107 = vmatmul.msk.f32.gmra.mxu0 %vm912_vm1, %v887_v5  ;;  %1218 = vmatmul.f32.gmra.mxu1 %v1134_v34 }
 0x263   : > { %v776_v57 = vpop.f32.mrf.mxu2 }
 0x264   : > { %v777_v54 = vadd.f32 %v776_v57, %v3046_v59  ;;  %v889_v21 = vpop.f32.mrf.mxu3 }
 0x265   : > { %v1057_v25 = vpop.f32.mrf.mxu0 }
 0x266   : > { %v890_v6 = vadd.f32 %v889_v21, %v777_v54  ;;  %v1135_v56 = vmax.f32 %v1057_v25, 0.0 }
 0x268   : > { %2108 = vmatmul.msk.f32.gmra.mxu0 %vm912_vm1, %v890_v6  ;;  %1221 = vmatmul.f32.gmra.mxu1 %v1135_v56 }
 0x26b   : > { %v779_v38 = vpop.f32.mrf.mxu2 }
 0x26c   : > { %v780_v63 = vadd.f32 %v779_v38, %v3050_v62  ;;  %v892_v49 = vpop.f32.mrf.mxu3 }
 0x26d   : > { %v1060_v52 = vpop.f32.mrf.mxu0 }
 0x26e   : > { %v893_v9 = vadd.f32 %v892_v49, %v780_v63  ;;  %v1136_v28 = vmax.f32 %v1060_v52, 0.0 }
 0x270   : > { %2109 = vmatmul.msk.f32.gmra.mxu0 %vm912_vm1, %v893_v9  ;;  %1224 = vmatmul.f32.gmra.mxu1 %v1136_v28 }
 0x273   : > { %v782_v60 = vpop.f32.mrf.mxu2 }
 0x274   : > { %v783_v59 = vadd.f32 %v782_v60, %v3054_v58  ;;  %v895_v42 = vpop.f32.mrf.mxu3 }
 0x275   : > { %v1063_v17 = vpop.f32.mrf.mxu0 }
 0x276   : > { %v896_v37 = vadd.f32 %v895_v42, %v783_v59  ;;  %v1137_v26 = vmax.f32 %v1063_v17, 0.0 }
 0x278   : > { %2110 = vmatmul.msk.f32.gmra.mxu0 %vm912_vm1, %v896_v37  ;;  %1227 = vmatmul.f32.gmra.mxu1 %v1137_v26 }
 0x27b   : > { %v785_v46 = vpop.f32.mrf.mxu2 }
 0x27c   : > { %v786_v62 = vadd.f32 %v785_v46, %v3058_v45  ;;  %v898_v2 = vpop.f32.mrf.mxu3 }
 0x27d   : > { %v1066_v61 = vpop.f32.mrf.mxu0 }
 0x27e   : > { %v899_v50 = vadd.f32 %v898_v2, %v786_v62  ;;  %v1138_v1 = vmax.f32 %v1066_v61, 0.0 }
 0x280   : > { %2111 = vmatmul.msk.f32.gmra.mxu0 %vm912_vm1, %v899_v50  ;;  %1230 = vmatmul.f32.gmra.mxu1 %v1138_v1 }
 0x283   : > { %v788_v30 = vpop.f32.mrf.mxu2 }
 0x284   : > { %v789_v58 = vadd.f32 %v788_v30, %v3065_v53  ;;  %v901_v33 = vpop.f32.mrf.mxu3 }
 0x285   : > { %v1069_v41 = vpop.f32.mrf.mxu0 }
 0x286   : > { %v902_v10 = vadd.f32 %v901_v33, %v789_v58  ;;  %v1139_v14 = vmax.f32 %v1069_v41, 0.0 }
 0x288   : > { %2112 = vmatmul.msk.f32.gmra.mxu0 %vm912_vm1, %v902_v10  ;;  %1233 = vmatmul.f32.gmra.mxu1 %v1139_v14 }
 0x28b   : > { %v791_v13 = vpop.f32.mrf.mxu2 }
 0x28c   : > { %v792_v45 = vadd.f32 %v791_v13, %v3072_v29  ;;  %v904_v5 = vpop.f32.mrf.mxu3  ;;  %v3203_v29 = vld [vmem:[%s3615_s4] ss:$0 sm:$0xff] }
 0x28d   : > { %v1072_v34 = vpop.f32.mrf.mxu0 }
 0x28e   : > { %v905_v57 = vadd.f32 %v904_v5, %v792_v45  ;;  %v1140_v54 = vmax.f32 %v1072_v34, 0.0 }
 0x290   : > { %2113 = vmatmul.msk.f32.gmra.mxu0 %vm912_vm1, %v905_v57  ;;  %1236 = vmatmul.f32.gmra.mxu1 %v1140_v54 }
 0x293   : > { %v794_v21 = vpop.f32.mrf.mxu2 }
 0x294   : > { %v795_v53 = vadd.f32 %v794_v21, %v3079_v22  ;;  %v907_v25 = vpop.f32.mrf.mxu3 }
 0x295   : > { %v1075_v6 = vpop.f32.mrf.mxu0 }
 0x296   : > { %v908_v56 = vadd.f32 %v907_v25, %v795_v53  ;;  %v1141_v38 = vmax.f32 %v1075_v6, 0.0 }
 0x298   : > { %2114 = vmatmul.msk.f32.gmra.mxu0 %vm912_vm1, %v908_v56  ;;  %1239 = vmatmul.f32.gmra.mxu1 %v1141_v38 }
 0x29d   : > { %v1078_v63 = vpop.f32.mrf.mxu0  ;;  %v1195_v49 = vpop.f32.mrf.mxu1 }
 0x29e   : > { %v1142_v52 = vmax.f32 %v1078_v63, 0.0  ;;  %v1196_v9 = vadd.f32 %v3203_v29, %v1195_v49 }
 0x2a0   : > { %1292 = vst [vmem:[%s3207_s20] sm:$0xff] %v1196_v9  ;;  %1242 = vmatmul.f32.gmra.mxu1 %v1142_v52 }
 0x2a5   : > { %v1081_v22 = vpop.f32.mrf.mxu0  ;;  %v1198_v28 = vpop.f32.mrf.mxu1 }
 0x2a6   : > { %v1143_v60 = vmax.f32 %v1081_v22, 0.0  ;;  %v1199_v59 = vadd.f32 %v3203_v29, %v1198_v28 }
 0x2a8   : > { %1293 = vst [vmem:[%s3207_s20 + $0x8] sm:$0xff] %v1199_v59  ;;  %1245 = vmatmul.f32.gmra.mxu1 %v1143_v60 }
 0x2ad   : > { %v1084_v42 = vpop.f32.mrf.mxu0  ;;  %v1201_v17 = vpop.f32.mrf.mxu1 }
 0x2ae   : > { %v1144_v37 = vmax.f32 %v1084_v42, 0.0  ;;  %v1202_v26 = vadd.f32 %v3203_v29, %v1201_v17 }
 0x2b0   : > { %1294 = vst [vmem:[%s3207_s20 + $0x10] sm:$0xff] %v1202_v26  ;;  %1248 = vmatmul.f32.gmra.mxu1 %v1144_v37 }
 0x2b5   : > { %v1087_v46 = vpop.f32.mrf.mxu0  ;;  %v1204_v62 = vpop.f32.mrf.mxu1 }
 0x2b6   : > { %v1145_v2 = vmax.f32 %v1087_v46, 0.0  ;;  %v1205_v61 = vadd.f32 %v3203_v29, %v1204_v62 }
 0x2b8   : > { %1295 = vst [vmem:[%s3207_s20 + $0x18] sm:$0xff] %v1205_v61  ;;  %1251 = vmatmul.f32.gmra.mxu1 %v1145_v2 }
 0x2bd   : > { %v1090_v50 = vpop.f32.mrf.mxu0  ;;  %v1207_v1 = vpop.f32.mrf.mxu1 }
 0x2be   : > { %v1146_v30 = vmax.f32 %v1090_v50, 0.0  ;;  %v1208_v58 = vadd.f32 %v3203_v29, %v1207_v1 }
 0x2c0   : > { %1296 = vst [vmem:[%s3207_s20 + $0x20] sm:$0xff] %v1208_v58  ;;  %1254 = vmatmul.f32.gmra.mxu1 %v1146_v30 }
 0x2c5   : > { %v1093_v33 = vpop.f32.mrf.mxu0  ;;  %v1210_v41 = vpop.f32.mrf.mxu1 }
 0x2c6   : > { %v1147_v10 = vmax.f32 %v1093_v33, 0.0  ;;  %v1211_v14 = vadd.f32 %v3203_v29, %v1210_v41 }
 0x2c8   : > { %1297 = vst [vmem:[%s3207_s20 + $0x28] sm:$0xff] %v1211_v14  ;;  %1257 = vmatmul.f32.gmra.mxu1 %v1147_v10 }
 0x2cd   : > { %v1096_v13 = vpop.f32.mrf.mxu0  ;;  %v1213_v45 = vpop.f32.mrf.mxu1 }
 0x2ce   : > { %v1148_v5 = vmax.f32 %v1096_v13, 0.0  ;;  %v1214_v34 = vadd.f32 %v3203_v29, %v1213_v45 }
 0x2d0   : > { %1298 = vst [vmem:[%s3207_s20 + $0x30] sm:$0xff] %v1214_v34  ;;  %1260 = vmatmul.f32.gmra.mxu1 %v1148_v5 }
 0x2d5   : > { %v1099_v57 = vpop.f32.mrf.mxu0  ;;  %v1216_v54 = vpop.f32.mrf.mxu1 }
 0x2d6   : > { %v1149_v21 = vmax.f32 %v1099_v57, 0.0  ;;  %v1217_v53 = vadd.f32 %v3203_v29, %v1216_v54 }
 0x2d8   : > { %1299 = vst [vmem:[%s3207_s20 + $0x38] sm:$0xff] %v1217_v53  ;;  %1263 = vmatmul.f32.gmra.mxu1 %v1149_v21 }
 0x2dd   : > { %v1102_v25 = vpop.f32.mrf.mxu0  ;;  %v1219_v6 = vpop.f32.mrf.mxu1 }
 0x2de   : > { %v1150_v56 = vmax.f32 %v1102_v25, 0.0  ;;  %v1220_v38 = vadd.f32 %v3203_v29, %v1219_v6 }
 0x2e0   : > { %1300 = vst [vmem:[%s3207_s20 + $0x40] sm:$0xff] %v1220_v38  ;;  %1266 = vmatmul.f32.gmra.mxu1 %v1150_v56 }
 0x2e5   : > { %v1105_v63 = vpop.f32.mrf.mxu0  ;;  %v1222_v49 = vpop.f32.mrf.mxu1 }
 0x2e6   : > { %v1151_v52 = vmax.f32 %v1105_v63, 0.0  ;;  %v1223_v9 = vadd.f32 %v3203_v29, %v1222_v49 }
 0x2e8   : > { %1301 = vst [vmem:[%s3207_s20 + $0x48] sm:$0xff] %v1223_v9  ;;  %1269 = vmatmul.f32.gmra.mxu1 %v1151_v52 }
 0x2ed   : > { %v1108_v22 = vpop.f32.mrf.mxu0  ;;  %v1225_v28 = vpop.f32.mrf.mxu1 }
 0x2ee   : > { %v1152_v60 = vmax.f32 %v1108_v22, 0.0  ;;  %v1226_v59 = vadd.f32 %v3203_v29, %v1225_v28 }
 0x2f0   : > { %1302 = vst [vmem:[%s3207_s20 + $0x50] sm:$0xff] %v1226_v59  ;;  %1272 = vmatmul.f32.gmra.mxu1 %v1152_v60 }
 0x2f5   : > { %v1111_v42 = vpop.f32.mrf.mxu0  ;;  %v1228_v17 = vpop.f32.mrf.mxu1 }
 0x2f6   : > { %v1153_v37 = vmax.f32 %v1111_v42, 0.0  ;;  %v1229_v26 = vadd.f32 %v3203_v29, %v1228_v17 }
 0x2f8   : > { %1303 = vst [vmem:[%s3207_s20 + $0x58] sm:$0xff] %v1229_v26  ;;  %1275 = vmatmul.f32.gmra.mxu1 %v1153_v37 }
 0x2fd   : > { %v1114_v46 = vpop.f32.mrf.mxu0  ;;  %v1231_v62 = vpop.f32.mrf.mxu1 }
 0x2fe   : > { %v1154_v2 = vmax.f32 %v1114_v46, 0.0  ;;  %v1232_v61 = vadd.f32 %v3203_v29, %v1231_v62 }
 0x300   : > { %1304 = vst [vmem:[%s3207_s20 + $0x60] sm:$0xff] %v1232_v61  ;;  %1278 = vmatmul.f32.gmra.mxu1 %v1154_v2 }
 0x305   : > { %v1117_v50 = vpop.f32.mrf.mxu0  ;;  %v1234_v1 = vpop.f32.mrf.mxu1 }
 0x306   : > { %v1155_v30 = vmax.f32 %v1117_v50, 0.0  ;;  %v1235_v58 = vadd.f32 %v3203_v29, %v1234_v1 }
 0x308   : > { %1305 = vst [vmem:[%s3207_s20 + $0x68] sm:$0xff] %v1235_v58  ;;  %1281 = vmatmul.f32.gmra.mxu1 %v1155_v30 }
 0x30d   : > { %v1120_v33 = vpop.f32.mrf.mxu0  ;;  %v1237_v41 = vpop.f32.mrf.mxu1 }
 0x30e   : > { %v1156_v10 = vmax.f32 %v1120_v33, 0.0  ;;  %v1238_v14 = vadd.f32 %v3203_v29, %v1237_v41 }
 0x310   : > { %1306 = vst [vmem:[%s3207_s20 + $0x70] sm:$0xff] %v1238_v14  ;;  %1284 = vmatmul.f32.gmra.mxu1 %v1156_v10 }
 0x315   : > { %v1123_v13 = vpop.f32.mrf.mxu0  ;;  %v1240_v45 = vpop.f32.mrf.mxu1 }
 0x316   : > { %v1157_v5 = vmax.f32 %v1123_v13, 0.0  ;;  %v1241_v34 = vadd.f32 %v3203_v29, %v1240_v45 }
 0x318   : > { %1307 = vst [vmem:[%s3207_s20 + $0x78] sm:$0xff] %v1241_v34  ;;  %1287 = vmatmul.f32.gmra.mxu1 %v1157_v5 }
 0x31d   : > { %v1243_v57 = vpop.f32.mrf.mxu1 }
 0x31e   : > { %v1244_v54 = vadd.f32 %v3203_v29, %v1243_v57 }
 0x320   : > { %1308 = vst [vmem:[%s3207_s20 + $0x80] sm:$0xff] %v1244_v54 }
 0x325   : > { %v1246_v21 = vpop.f32.mrf.mxu1 }
 0x326   : > { %v1247_v53 = vadd.f32 %v3203_v29, %v1246_v21 }
 0x328   : > { %1309 = vst [vmem:[%s3207_s20 + $0x88] sm:$0xff] %v1247_v53 }
 0x32d   : > { %v1249_v25 = vpop.f32.mrf.mxu1 }
 0x32e   : > { %v1250_v6 = vadd.f32 %v3203_v29, %v1249_v25 }
 0x330   : > { %1310 = vst [vmem:[%s3207_s20 + $0x90] sm:$0xff] %v1250_v6 }
 0x335   : > { %v1252_v56 = vpop.f32.mrf.mxu1 }
 0x336   : > { %v1253_v38 = vadd.f32 %v3203_v29, %v1252_v56 }
 0x338   : > { %1311 = vst [vmem:[%s3207_s20 + $0x98] sm:$0xff] %v1253_v38 }
 0x33d   : > { %v1255_v63 = vpop.f32.mrf.mxu1 }
 0x33e   : > { %v1256_v49 = vadd.f32 %v3203_v29, %v1255_v63 }
 0x340   : > { %1312 = vst [vmem:[%s3207_s20 + $0xa0] sm:$0xff] %v1256_v49 }
 0x345   : > { %v1258_v52 = vpop.f32.mrf.mxu1 }
 0x346   : > { %v1259_v9 = vadd.f32 %v3203_v29, %v1258_v52 }
 0x348   : > { %1313 = vst [vmem:[%s3207_s20 + $0xa8] sm:$0xff] %v1259_v9 }
 0x34d   : > { %v1261_v22 = vpop.f32.mrf.mxu1 }
 0x34e   : > { %v1262_v28 = vadd.f32 %v3203_v29, %v1261_v22 }
 0x350   : > { %1314 = vst [vmem:[%s3207_s20 + $0xb0] sm:$0xff] %v1262_v28 }
 0x355   : > { %v1264_v60 = vpop.f32.mrf.mxu1 }
 0x356   : > { %v1265_v59 = vadd.f32 %v3203_v29, %v1264_v60 }
 0x358   : > { %1315 = vst [vmem:[%s3207_s20 + $0xb8] sm:$0xff] %v1265_v59 }
 0x35d   : > { %v1267_v42 = vpop.f32.mrf.mxu1 }
 0x35e   : > { %v1268_v17 = vadd.f32 %v3203_v29, %v1267_v42 }
 0x360   : > { %1316 = vst [vmem:[%s3207_s20 + $0xc0] sm:$0xff] %v1268_v17 }
 0x365   : > { %v1270_v37 = vpop.f32.mrf.mxu1 }
 0x366   : > { %v1271_v26 = vadd.f32 %v3203_v29, %v1270_v37 }
 0x368   : > { %1317 = vst [vmem:[%s3207_s20 + $0xc8] sm:$0xff] %v1271_v26 }
 0x36d   : > { %v1273_v46 = vpop.f32.mrf.mxu1 }
 0x36e   : > { %v1274_v62 = vadd.f32 %v3203_v29, %v1273_v46 }
 0x370   : > { %1318 = vst [vmem:[%s3207_s20 + $0xd0] sm:$0xff] %v1274_v62 }
 0x375   : > { %v1276_v2 = vpop.f32.mrf.mxu1 }
 0x376   : > { %v1277_v61 = vadd.f32 %v3203_v29, %v1276_v2 }
 0x378   : > { %1319 = vst [vmem:[%s3207_s20 + $0xd8] sm:$0xff] %v1277_v61 }
 0x37d   : > { %v1279_v50 = vpop.f32.mrf.mxu1 }
 0x37e   : > { %v1280_v1 = vadd.f32 %v3203_v29, %v1279_v50 }
 0x380   : > { %1320 = vst [vmem:[%s3207_s20 + $0xe0] sm:$0xff] %v1280_v1 }
 0x385   : > { %v1282_v30 = vpop.f32.mrf.mxu1 }
 0x386   : > { %v1283_v58 = vadd.f32 %v3203_v29, %v1282_v30 }
 0x388   : > { %1321 = vst [vmem:[%s3207_s20 + $0xe8] sm:$0xff] %v1283_v58 }
 0x38d   : > { %v1285_v33 = vpop.f32.mrf.mxu1 }
 0x38e   : > { %v1286_v41 = vadd.f32 %v3203_v29, %v1285_v33 }
 0x390   : > { %1322 = vst [vmem:[%s3207_s20 + $0xf0] sm:$0xff] %v1286_v41 }
 0x395   : > { %v1288_v10 = vpop.f32.mrf.mxu1 }
 0x396   : > { %v1289_v14 = vadd.f32 %v3203_v29, %v1288_v10 }
 0x398   : > { %1323 = vst [vmem:[%s3207_s20 + $0xf8] sm:$0xff] %v1289_v14 }
 0x399 PF: > { %p2115_p6 = scmp.ne.s32.totalorder %s2267_s25, 1 }
 0x39a   : > { %s3515_s22 = scalar_lea.vmem (!%p2115_p6), %s3618_s7, %s2353_s8 }
 0x39b   : > { %1327 = sbr.rel (%p2115_p6) target bundleno = 1539 (0x603), region = 56 }
 0x3a0   : > { %v1343_v13 = vld [vmem:[#allocation2 + $0x78] sm:$0xff]  ;;  %v1342_v45 = vld [vmem:[#allocation2 + $0x70] sm:$0xff]  ;;  %v1341_v5 = vld [vmem:[#allocation2 + $0x68] sm:$0xff] }
 0x3a1   : > { %2151 = vmatpush.msra.mxu1 %v1343_v13  ;;  %2152 = vmatpush.msra.mxu2 %v1343_v13  ;;  %v1340_v34 = vld [vmem:[#allocation2 + $0x60] sm:$0xff]  ;;  %v1339_v29 = vld [vmem:[#allocation2 + $0x58] sm:$0xff]  ;;  %v1338_v57 = vld [vmem:[#allocation2 + $0x50] sm:$0xff] }
 0x3a2   : > { %2153 = vmatpush.msra.mxu3 %v1343_v13  ;;  %1392 = vmatpush.msra.mxu0 %v1343_v13  ;;  %v1337_v54 = vld [vmem:[#allocation2 + $0x48] sm:$0xff]  ;;  %v1336_v21 = vld [vmem:[#allocation2 + $0x40] sm:$0xff]  ;;  %v1335_v53 = vld [vmem:[#allocation2 + $0x38] sm:$0xff] }
 0x3a3   : > { %2154 = vmatpush.msra.mxu1 %v1342_v45  ;;  %2155 = vmatpush.msra.mxu2 %v1342_v45  ;;  %v1334_v25 = vld [vmem:[#allocation2 + $0x30] sm:$0xff]  ;;  %v1333_v6 = vld [vmem:[#allocation2 + $0x28] sm:$0xff]  ;;  %v1332_v56 = vld [vmem:[#allocation2 + $0x20] sm:$0xff] }
 0x3a4   : > { %2156 = vmatpush.msra.mxu3 %v1342_v45  ;;  %1393 = vmatpush.msra.mxu0 %v1342_v45  ;;  %v1331_v38 = vld [vmem:[#allocation2 + $0x18] sm:$0xff]  ;;  %v1330_v63 = vld [vmem:[#allocation2 + $0x10] sm:$0xff]  ;;  %v1329_v49 = vld [vmem:[#allocation2 + $0x8] sm:$0xff] }
 0x3a5   : > { %2157 = vmatpush.msra.mxu1 %v1341_v5  ;;  %2158 = vmatpush.msra.mxu2 %v1341_v5  ;;  %v1328_v52 = vld [vmem:[#allocation2] sm:$0xff]  ;;  %v1375_v9 = vld [vmem:[#allocation2 + $0x178] sm:$0xff]  ;;  %v1374_v60 = vld [vmem:[#allocation2 + $0x170] sm:$0xff] }
 0x3a6   : > { %2159 = vmatpush.msra.mxu3 %v1341_v5  ;;  %1394 = vmatpush.msra.mxu0 %v1341_v5  ;;  %v1359_v22 = vld [vmem:[#allocation2 + $0xf8] sm:$0xff]  ;;  %v1358_v59 = vld [vmem:[#allocation2 + $0xf0] sm:$0xff]  ;;  %v1373_v17 = vld [vmem:[#allocation2 + $0x168] sm:$0xff] }
 0x3a7   : > { %2160 = vmatpush.msra.mxu1 %v1340_v34  ;;  %2161 = vmatpush.msra.mxu2 %v1340_v34  ;;  %v1391_v28 = vld [vmem:[#allocation2 + $0x1f8] sm:$0xff]  ;;  %v1390_v42 = vld [vmem:[#allocation2 + $0x1f0] sm:$0xff]  ;;  %v1357_v37 = vld [vmem:[#allocation2 + $0xe8] sm:$0xff] }
 0x3a8   : > { %2162 = vmatpush.msra.mxu3 %v1340_v34  ;;  %1395 = vmatpush.msra.mxu0 %v1340_v34  ;;  %v1389_v26 = vld [vmem:[#allocation2 + $0x1e8] sm:$0xff]  ;;  %v1372_v46 = vld [vmem:[#allocation2 + $0x160] sm:$0xff]  ;;  %v1387_v62 = vld [vmem:[#allocation2 + $0x1d8] sm:$0xff] }
 0x3a9   : > { %2163 = vmatpush.msra.mxu1 %v1339_v29  ;;  %2164 = vmatpush.msra.mxu2 %v1339_v29  ;;  %v1355_v2 = vld [vmem:[#allocation2 + $0xd8] sm:$0xff]  ;;  %v1370_v61 = vld [vmem:[#allocation2 + $0x150] sm:$0xff]  ;;  %v1385_v30 = vld [vmem:[#allocation2 + $0x1c8] sm:$0xff] }
 0x3aa   : > { %2165 = vmatpush.msra.mxu3 %v1339_v29  ;;  %1396 = vmatpush.msra.mxu0 %v1339_v29  ;;  %v1386_v50 = vld [vmem:[#allocation2 + $0x1d0] sm:$0xff]  ;;  %v1353_v58 = vld [vmem:[#allocation2 + $0xc8] sm:$0xff]  ;;  %v1352_v33 = vld [vmem:[#allocation2 + $0xc0] sm:$0xff] }
 0x3ab   : > { %2166 = vmatpush.msra.mxu1 %v1338_v57  ;;  %2167 = vmatpush.msra.mxu2 %v1338_v57  ;;  %v1354_v1 = vld [vmem:[#allocation2 + $0xd0] sm:$0xff]  ;;  %v1383_v41 = vld [vmem:[#allocation2 + $0x1b8] sm:$0xff]  ;;  %v1365_v45 = vld [vmem:[#allocation2 + $0x128] sm:$0xff] }
 0x3ac   : > { %2168 = vmatpush.msra.mxu3 %v1338_v57  ;;  %1397 = vmatpush.msra.mxu0 %v1338_v57  ;;  %v1351_v10 = vld [vmem:[#allocation2 + $0xb8] sm:$0xff]  ;;  %v1366_v14 = vld [vmem:[#allocation2 + $0x130] sm:$0xff]  ;;  %v1381_v5 = vld [vmem:[#allocation2 + $0x1a8] sm:$0xff] }
 0x3ad   : > { %2169 = vmatpush.msra.mxu1 %v1337_v54  ;;  %2170 = vmatpush.msra.mxu2 %v1337_v54  ;;  %v1382_v13 = vld [vmem:[#allocation2 + $0x1b0] sm:$0xff]  ;;  %v1348_v34 = vld [vmem:[#allocation2 + $0xa0] sm:$0xff]  ;;  %v1363_v29 = vld [vmem:[#allocation2 + $0x118] sm:$0xff] }
 0x3ae   : > { %2171 = vmatpush.msra.mxu3 %v1337_v54  ;;  %1398 = vmatpush.msra.mxu0 %v1337_v54  ;;  %v1379_v57 = vld [vmem:[#allocation2 + $0x198] sm:$0xff] }
 0x3af   : > { %2172 = vmatpush.msra.mxu1 %v1336_v21  ;;  %2173 = vmatpush.msra.mxu2 %v1336_v21  ;;  %v1347_v54 = vld [vmem:[#allocation2 + $0x98] sm:$0xff] }
 0x3b0   : > { %2174 = vmatpush.msra.mxu3 %v1336_v21  ;;  %1399 = vmatpush.msra.mxu0 %v1336_v21  ;;  %v1362_v21 = vld [vmem:[#allocation2 + $0x110] sm:$0xff] }
 0x3b1   : > { %2175 = vmatpush.msra.mxu1 %v1335_v53  ;;  %2176 = vmatpush.msra.mxu2 %v1335_v53 }
 0x3b2   : > { %2177 = vmatpush.msra.mxu3 %v1335_v53  ;;  %1400 = vmatpush.msra.mxu0 %v1335_v53  ;;  %v1346_v53 = vld [vmem:[#allocation2 + $0x90] sm:$0xff] }
 0x3b3   : > { %2178 = vmatpush.msra.mxu1 %v1334_v25  ;;  %2179 = vmatpush.msra.mxu2 %v1334_v25 }
 0x3b4   : > { %2180 = vmatpush.msra.mxu3 %v1334_v25  ;;  %1401 = vmatpush.msra.mxu0 %v1334_v25  ;;  %v1345_v25 = vld [vmem:[#allocation2 + $0x88] sm:$0xff] }
 0x3b5   : > { %2181 = vmatpush.msra.mxu1 %v1333_v6  ;;  %2182 = vmatpush.msra.mxu2 %v1333_v6 }
 0x3b6   : > { %2183 = vmatpush.msra.mxu3 %v1333_v6  ;;  %1402 = vmatpush.msra.mxu0 %v1333_v6  ;;  %v1376_v6 = vld [vmem:[#allocation2 + $0x180] sm:$0xff] }
 0x3b7   : > { %2184 = vmatpush.msra.mxu1 %v1332_v56  ;;  %2185 = vmatpush.msra.mxu2 %v1332_v56 }
 0x3b8   : > { %2186 = vmatpush.msra.mxu3 %v1332_v56  ;;  %1403 = vmatpush.msra.mxu0 %v1332_v56  ;;  %v1344_v56 = vld [vmem:[#allocation2 + $0x80] sm:$0xff] }
 0x3b9   : > { %2187 = vmatpush.msra.mxu1 %v1331_v38  ;;  %2188 = vmatpush.msra.mxu2 %v1331_v38 }
 0x3ba   : > { %2189 = vmatpush.msra.mxu3 %v1331_v38  ;;  %1404 = vmatpush.msra.mxu0 %v1331_v38  ;;  %v3829_v38 = vld [vmem:[#allocation6_spill] sm:$0xff] }
 0x3bb   : > { %2190 = vmatpush.msra.mxu1 %v1330_v63  ;;  %2191 = vmatpush.msra.mxu2 %v1330_v63 }
 0x3bc   : > { %2192 = vmatpush.msra.mxu3 %v1330_v63  ;;  %1405 = vmatpush.msra.mxu0 %v1330_v63  ;;  %v3833_v63 = vld [vmem:[#allocation10_spill] sm:$0xff] }
 0x3bd   : > { %2193 = vmatpush.msra.mxu1 %v1329_v49  ;;  %2194 = vmatpush.msra.mxu2 %v1329_v49 }
 0x3be   : > { %2195 = vmatpush.msra.mxu3 %v1329_v49  ;;  %1406 = vmatpush.msra.mxu0 %v1329_v49  ;;  %v3835_v49 = vld [vmem:[#allocation12_spill] sm:$0xff] }
 0x3bf   : > { %2196 = vmatpush.msra.mxu1 %v1328_v52  ;;  %2197 = vmatpush.msra.mxu2 %v1328_v52 }
 0x3c0   : > { %1432 = vmatmul.f32.vlgmr.msra.gmra.mxu1 %v2458_v32  ;;  %1456 = vmatmul.f32.vlgmr.msra.gmra.mxu2 %v2554_v55  ;;  %v1388_v32 = vld [vmem:[#allocation2 + $0x1e0] sm:$0xff] }
 0x3c1   : > { %1618 = vmatpush.msrb.mxu2 %v1375_v9  ;;  %2198 = vmatpush.msra.mxu3 %v1328_v52  ;;  %v1356_v55 = vld [vmem:[#allocation2 + $0xe0] sm:$0xff]  ;;  %v3837_v9 = vld [vmem:[#allocation14_spill] sm:$0xff] }
 0x3c2   : > { %1480 = vmatmul.f32.vlgmr.msra.gmra.mxu3 %v2650_v23  ;;  %1505 = vmatpush.msrb.mxu1 %v1359_v22  ;;  %v1371_v23 = vld [vmem:[#allocation2 + $0x158] sm:$0xff]  ;;  %v3838_v22 = vld [vmem:[#allocation15_spill] sm:$0xff] }
 0x3c3   : > { %1731 = vmatpush.msrb.mxu3 %v1391_v28  ;;  %1619 = vmatpush.msrb.mxu2 %v1374_v60  ;;  %v3839_v28 = vld [vmem:[#allocation16_spill] sm:$0xff]  ;;  %v3840_v60 = vld [vmem:[#allocation17_spill] sm:$0xff] }
 0x3c4   : > { %1506 = vmatpush.msrb.mxu1 %v1358_v59  ;;  %1407 = vmatpush.msra.mxu0 %v1328_v52  ;;  %v3836_v52 = vld [vmem:[#allocation13_spill] sm:$0xff]  ;;  %v3841_v59 = vld [vmem:[#allocation18_spill] sm:$0xff] }
 0x3c5   : > { %1732 = vmatpush.msrb.mxu3 %v1390_v42  ;;  %1620 = vmatpush.msrb.mxu2 %v1373_v17  ;;  %v3842_v42 = vld [vmem:[#allocation19_spill] sm:$0xff]  ;;  %v3843_v17 = vld [vmem:[#allocation20_spill] sm:$0xff] }
 0x3c6   : > { %1507 = vmatpush.msrb.mxu1 %v1357_v37  ;;  %1408 = vmatmul.f32.vlgmr.msra.gmra.mxu0 %v2362_v0  ;;  %v1369_v0 = vld [vmem:[#allocation2 + $0x148] sm:$0xff]  ;;  %v1891_v37 = vld [vmem:[%s3616_s5 + $0x78] sm:$0xff] }
 0x3c7   : > { %1733 = vmatpush.msrb.mxu3 %v1389_v26  ;;  %1621 = vmatpush.msrb.mxu2 %v1372_v46  ;;  %v1890_v26 = vld [vmem:[%s3616_s5 + $0x70] sm:$0xff] }
 0x3c8   : > { %1435 = vmatmul.f32.gmra.mxu1 %v2470_v36  ;;  %1459 = vmatmul.f32.gmra.mxu2 %v2566_v51  ;;  %v1368_v36 = vld [vmem:[#allocation2 + $0x140] sm:$0xff]  ;;  %v3844_v46 = vld [vmem:[#allocation21_spill] sm:$0xff] }
 0x3c9   : > { %1734 = vmatpush.msrb.mxu3 %v1388_v32  ;;  %1508 = vmatpush.msrb.mxu1 %v1356_v55  ;;  %v1384_v51 = vld [vmem:[#allocation2 + $0x1c0] sm:$0xff]  ;;  %v3845_v32 = vld [vmem:[#allocation22_spill] sm:$0xff] }
 0x3ca   : > { %1483 = vmatmul.f32.gmra.mxu3 %v2662_v19  ;;  %1622 = vmatpush.msrb.mxu2 %v1371_v23  ;;  %v1367_v19 = vld [vmem:[#allocation2 + $0x138] sm:$0xff]  ;;  %v3846_v55 = vld [vmem:[#allocation23_spill] sm:$0xff]  ;;  %v1889_v23 = vld [vmem:[%s3616_s5 + $0x68] sm:$0xff] }
 0x3cb   : > { %1735 = vmatpush.msrb.mxu3 %v1387_v62  ;;  %1509 = vmatpush.msrb.mxu1 %v1355_v2  ;;  %v1888_v62 = vld [vmem:[%s3616_s5 + $0x60] sm:$0xff]  ;;  %v3847_v2 = vld [vmem:[#allocation25_spill] sm:$0xff] }
 0x3cc   : > { %1623 = vmatpush.msrb.mxu2 %v1370_v61  ;;  %1896 = vmatpush.msrb.mxu0 %v1891_v37  ;;  %v3848_v61 = vld [vmem:[#allocation26_spill] sm:$0xff] }
 0x3cd   : > { %1736 = vmatpush.msrb.mxu3 %v1386_v50  ;;  %1510 = vmatpush.msrb.mxu1 %v1354_v1  ;;  %v3849_v50 = vld [vmem:[#allocation27_spill] sm:$0xff]  ;;  %v1887_v1 = vld [vmem:[%s3616_s5 + $0x58] sm:$0xff] }
 0x3ce   : > { %1624 = vmatpush.msrb.mxu2 %v1369_v0  ;;  %1411 = vmatmul.f32.gmra.mxu0 %v2374_v4  ;;  %v1350_v4 = vld [vmem:[#allocation2 + $0xb0] sm:$0xff] }
 0x3cf   : > { %1737 = vmatpush.msrb.mxu3 %v1385_v30  ;;  %1511 = vmatpush.msrb.mxu1 %v1353_v58  ;;  %v1886_v30 = vld [vmem:[%s3616_s5 + $0x50] sm:$0xff]  ;;  %v3850_v58 = vld [vmem:[#allocation28_spill] sm:$0xff] }
 0x3d0   : > { %1438 = vmatmul.f32.gmra.mxu1 %v2482_v40  ;;  %1462 = vmatmul.f32.gmra.mxu2 %v2578_v47  ;;  %v1349_v40 = vld [vmem:[#allocation2 + $0xa8] sm:$0xff]  ;;  %v1364_v47 = vld [vmem:[#allocation2 + $0x120] sm:$0xff] }
 0x3d1   : > { %1625 = vmatpush.msrb.mxu2 %v1368_v36  ;;  %1738 = vmatpush.msrb.mxu3 %v1384_v51  ;;  %v3851_v36 = vld [vmem:[#allocation29_spill] sm:$0xff]  ;;  %v3852_v51 = vld [vmem:[#allocation30_spill] sm:$0xff] }
 0x3d2   : > { %1486 = vmatmul.f32.gmra.mxu3 %v2674_v15  ;;  %1512 = vmatpush.msrb.mxu1 %v1352_v33  ;;  %v1380_v15 = vld [vmem:[#allocation2 + $0x1a0] sm:$0xff]  ;;  %v1885_v33 = vld [vmem:[%s3616_s5 + $0x48] sm:$0xff] }
 0x3d3   : > { %1626 = vmatpush.msrb.mxu2 %v1367_v19  ;;  %1739 = vmatpush.msrb.mxu3 %v1383_v41 }
 0x3d4   : > { %1513 = vmatpush.msrb.mxu1 %v1351_v10  ;;  %1897 = vmatpush.msrb.mxu0 %v1890_v26 }
 0x3d5   : > { %1627 = vmatpush.msrb.mxu2 %v1366_v14  ;;  %1740 = vmatpush.msrb.mxu3 %v1382_v13  ;;  %v1884_v14 = vld [vmem:[%s3616_s5 + $0x40] sm:$0xff] }
 0x3d6   : > { %1514 = vmatpush.msrb.mxu1 %v1350_v4  ;;  %1414 = vmatmul.f32.gmra.mxu0 %v2386_v8  ;;  %v1378_v8 = vld [vmem:[#allocation2 + $0x190] sm:$0xff]  ;;  %v3853_v13 = vld [vmem:[#allocation31_spill] sm:$0xff]  ;;  %v3854_v4 = vld [vmem:[#allocation32_spill] sm:$0xff] }
 0x3d7   : > { %1628 = vmatpush.msrb.mxu2 %v1365_v45  ;;  %1741 = vmatpush.msrb.mxu3 %v1381_v5  ;;  %v3855_v45 = vld [vmem:[#allocation33_spill] sm:$0xff]  ;;  %v1883_v5 = vld [vmem:[%s3616_s5 + $0x38] sm:$0xff] }
 0x3d8   : > { %1441 = vmatmul.f32.gmra.mxu1 %v2494_v44  ;;  %1465 = vmatmul.f32.gmra.mxu2 %v2590_v43  ;;  %v1361_v44 = vld [vmem:[#allocation2 + $0x108] sm:$0xff] }
 0x3d9   : > { %1515 = vmatpush.msrb.mxu1 %v1349_v40  ;;  %1629 = vmatpush.msrb.mxu2 %v1364_v47  ;;  %v1377_v43 = vld [vmem:[#allocation2 + $0x188] sm:$0xff] }
 0x3da   : > { %1489 = vmatmul.f32.gmra.mxu3 %v2686_v11  ;;  %v1360_v11 = vld [vmem:[#allocation2 + $0x100] sm:$0xff]  ;;  %1898 = vmatpush.msrb.mxu0 %v1889_v23  ;;  %v3873_v23 = vld [vmem:[#allocation54_spill] sm:$0xff] }
 0x3db   : > { %1742 = vmatpush.msrb.mxu3 %v1380_v15  ;;  %1516 = vmatpush.msrb.mxu1 %v1348_v34  ;;  %v1882_v34 = vld [vmem:[%s3616_s5 + $0x30] sm:$0xff] }
 0x3dc   : > { %1630 = vmatpush.msrb.mxu2 %v1363_v29  ;;  %1899 = vmatpush.msrb.mxu0 %v1888_v62  ;;  %v3856_v29 = vld [vmem:[#allocation34_spill] sm:$0xff] }
 0x3dd   : > { %1743 = vmatpush.msrb.mxu3 %v1379_v57  ;;  %1517 = vmatpush.msrb.mxu1 %v1347_v54  ;;  %v3857_v57 = vld [vmem:[#allocation35_spill] sm:$0xff]  ;;  %v3858_v54 = vld [vmem:[#allocation36_spill] sm:$0xff] }
 0x3de   : > { %1631 = vmatpush.msrb.mxu2 %v1362_v21  ;;  %1417 = vmatmul.f32.gmra.mxu0 %v2398_v12  ;;  %v3821_v12 = vld [vmem:[#allocation43_spill] sm:$0xff]  ;;  %v1881_v21 = vld [vmem:[%s3616_s5 + $0x28] sm:$0xff] }
 0x3df   : > { %1744 = vmatpush.msrb.mxu3 %v1378_v8  ;;  %1518 = vmatpush.msrb.mxu1 %v1346_v53 }
 0x3e0   : > { %1444 = vmatmul.f32.gmra.mxu1 %v2506_v48  ;;  %1468 = vmatmul.f32.gmra.mxu2 %v2602_v39  ;;  %v3822_v39 = vld [vmem:[#allocation47_spill] sm:$0xff]  ;;  %v3825_v48 = vld [vmem:[#allocation24_spill] sm:$0xff] }
 0x3e1   : > { %1632 = vmatpush.msrb.mxu2 %v1361_v44  ;;  %1745 = vmatpush.msrb.mxu3 %v1377_v43  ;;  %v1880_v43 = vld [vmem:[%s3616_s5 + $0x20] sm:$0xff] }
 0x3e2   : > { %1492 = vmatmul.f32.gmra.mxu3 %v2698_v7  ;;  %1519 = vmatpush.msrb.mxu1 %v1345_v25  ;;  %v3823_v7 = vld [vmem:[#allocation51_spill] sm:$0xff]  ;;  %v3859_v25 = vld [vmem:[#allocation37_spill] sm:$0xff] }
 0x3e3   : > { %1633 = vmatpush.msrb.mxu2 %v1360_v11  ;;  %1746 = vmatpush.msrb.mxu3 %v1376_v6  ;;  %v3860_v11 = vld [vmem:[#allocation38_spill] sm:$0xff]  ;;  %v3861_v6 = vld [vmem:[#allocation39_spill] sm:$0xff] }
 0x3e4   : > { %1520 = vmatpush.msrb.mxu1 %v1344_v56  ;;  %1900 = vmatpush.msrb.mxu0 %v1887_v1  ;;  %v1879_v56 = vld [vmem:[%s3616_s5 + $0x18] sm:$0xff]  ;;  %v3875_v1 = vld [vmem:[#allocation56_spill] sm:$0xff] }
 0x3e6   : > { %1420 = vmatmul.f32.gmra.mxu0 %v2410_v16  ;;  %v3824_v16 = vld [vmem:[#allocation100_spill] sm:$0xff] }
 0x3e7   : > { %1901 = vmatpush.msrb.mxu0 %v1886_v30 }
 0x3e8   : > { %1447 = vmatmul.f32.gmra.mxu1 %v3821_v12  ;;  %1471 = vmatmul.f32.gmra.mxu2 %v2614_v35  ;;  %v3826_v35 = vld [vmem:[#allocation3_spill] sm:$0xff] }
 0x3e9   : > { %1902 = vmatpush.msrb.mxu0 %v1885_v33 }
 0x3ea   : > { %1495 = vmatmul.f32.gmra.mxu3 %v2710_v3  ;;  %v3827_v3 = vld [vmem:[#allocation4_spill] sm:$0xff] }
 0x3eb   : > { %1903 = vmatpush.msrb.mxu0 %v1884_v14 }
 0x3ed   : > { %1904 = vmatpush.msrb.mxu0 %v1883_v5  ;;  %v3877_v5 = vld [vmem:[#allocation58_spill] sm:$0xff] }
 0x3ee   : > { %1423 = vmatmul.f32.gmra.mxu0 %v2422_v20  ;;  %v3828_v20 = vld [vmem:[#allocation5_spill] sm:$0xff] }
 0x3ef   : > { %1905 = vmatpush.msrb.mxu0 %v1882_v34  ;;  %v3878_v34 = vld [vmem:[#allocation59_spill] sm:$0xff] }
 0x3f0   : > { %1450 = vmatmul.f32.gmra.mxu1 %v3822_v39  ;;  %1474 = vmatmul.f32.gmra.mxu2 %v2626_v31  ;;  %v3830_v31 = vld [vmem:[#allocation7_spill] sm:$0xff] }
 0x3f1   : > { %1906 = vmatpush.msrb.mxu0 %v1881_v21 }
 0x3f2   : > { %1498 = vmatmul.f32.gmra.mxu3 %v2722_v18  ;;  %v3831_v18 = vld [vmem:[#allocation8_spill] sm:$0xff] }
 0x3f3   : > { %1907 = vmatpush.msrb.mxu0 %v1880_v43 }
 0x3f5   : > { %1908 = vmatpush.msrb.mxu0 %v1879_v56  ;;  %v3880_v56 = vld [vmem:[#allocation61_spill] sm:$0xff] }
 0x3f6   : > { %1426 = vmatmul.f32.gmra.mxu0 %v2434_v24  ;;  %v3832_v24 = vld [vmem:[#allocation9_spill] sm:$0xff] }
 0x3f8   : > { %1453 = vmatmul.f32.gmra.mxu1 %v3823_v7  ;;  %1477 = vmatmul.f32.gmra.mxu2 %v2638_v27  ;;  %v3834_v27 = vld [vmem:[#allocation11_spill] sm:$0xff] }
 0x3fa   : > { %1501 = vmatmul.f32.gmra.mxu3 %v3824_v16  ;;  %v1878_v16 = vld [vmem:[%s3616_s5 + $0x10] sm:$0xff] }
 0x3fb   : > { %1909 = vmatpush.msrb.mxu0 %v1878_v16  ;;  %v3881_v16 = vld [vmem:[#allocation62_spill] sm:$0xff] }
 0x3fe   : > { %1429 = vmatmul.f32.gmra.mxu0 %v3825_v48  ;;  %v3862_v48 = vld [vmem:[#allocation40_spill] sm:$0xff] }
 0x400   : > { %1521 = vmatmul.f32.vlgmr.msrb.gmra.mxu1 %v3826_v35  ;;  %1634 = vmatmul.f32.vlgmr.msrb.gmra.mxu2 %v3827_v3  ;;  %v3863_v35 = vld [vmem:[#allocation41_spill] sm:$0xff]  ;;  %v3864_v3 = vld [vmem:[#allocation42_spill] sm:$0xff] }
 0x402   : > { %1747 = vmatmul.f32.vlgmr.msrb.gmra.mxu3 %v3828_v20  ;;  %v1877_v20 = vld [vmem:[%s3616_s5 + $0x8] sm:$0xff] }
 0x403   : > { %1910 = vmatpush.msrb.mxu0 %v1877_v20 }
 0x408   : > { %1524 = vmatmul.f32.gmra.mxu1 %v3829_v38  ;;  %1637 = vmatmul.f32.gmra.mxu2 %v3830_v31 }
 0x40a   : > { %1750 = vmatmul.f32.gmra.mxu3 %v3831_v18 }
 0x410   : > { %1527 = vmatmul.f32.gmra.mxu1 %v3832_v24  ;;  %1640 = vmatmul.f32.gmra.mxu2 %v3833_v63  ;;  %v3865_v24 = vld [vmem:[#allocation44_spill] sm:$0xff]  ;;  %v3866_v63 = vld [vmem:[#allocation45_spill] sm:$0xff] }
 0x412   : > { %1753 = vmatmul.f32.gmra.mxu3 %v3834_v27  ;;  %v1876_v27 = vld [vmem:[%s3616_s5] sm:$0xff] }
 0x413   : > { %1911 = vmatpush.msrb.mxu0 %v1876_v27 }
 0x418   : > { %1530 = vmatmul.f32.gmra.mxu1 %v3835_v49  ;;  %1643 = vmatmul.f32.gmra.mxu2 %v3836_v52  ;;  %v3867_v49 = vld [vmem:[#allocation46_spill] sm:$0xff] }
 0x41a   : > { %1756 = vmatmul.f32.gmra.mxu3 %v3837_v9 }
 0x420   : > { %1533 = vmatmul.f32.gmra.mxu1 %v3838_v22  ;;  %1646 = vmatmul.f32.gmra.mxu2 %v3839_v28 }
 0x422   : > { %1759 = vmatmul.f32.gmra.mxu3 %v3840_v60  ;;  %v3868_v60 = vld [vmem:[#allocation48_spill] sm:$0xff] }
 0x428   : > { %1536 = vmatmul.f32.gmra.mxu1 %v3841_v59  ;;  %1649 = vmatmul.f32.gmra.mxu2 %v3842_v42  ;;  %v3869_v59 = vld [vmem:[#allocation49_spill] sm:$0xff]  ;;  %v3870_v42 = vld [vmem:[#allocation50_spill] sm:$0xff] }
 0x42a   : > { %1762 = vmatmul.f32.gmra.mxu3 %v3843_v17 }
 0x430   : > { %1539 = vmatmul.f32.gmra.mxu1 %v3844_v46  ;;  %1652 = vmatmul.f32.gmra.mxu2 %v3845_v32  ;;  %v3871_v46 = vld [vmem:[#allocation52_spill] sm:$0xff]  ;;  %v3872_v32 = vld [vmem:[#allocation53_spill] sm:$0xff] }
 0x432   : > { %1765 = vmatmul.f32.gmra.mxu3 %v3846_v55 }
 0x438   : > { %1542 = vmatmul.f32.gmra.mxu1 %v3847_v2  ;;  %1655 = vmatmul.f32.gmra.mxu2 %v3848_v61 }
 0x43a   : > { %1768 = vmatmul.f32.gmra.mxu3 %v3849_v50  ;;  %v3874_v50 = vld [vmem:[#allocation55_spill] sm:$0xff] }
 0x43d   : > { %v3344_v0 = vpop.f32.mrf.mxu1 }
 0x440   : > { %1545 = vmatmul.f32.gmra.mxu1 %v3850_v58  ;;  %1658 = vmatmul.f32.gmra.mxu2 %v3851_v36  ;;  %v3876_v58 = vld [vmem:[#allocation57_spill] sm:$0xff] }
 0x442   : > { %1771 = vmatmul.f32.gmra.mxu3 %v3852_v51 }
 0x443   : > { %v3355_v19 = vpop.f32.mrf.mxu2  ;;  %v1409_v28 = vpop.f32.mrf.mxu0 }
 0x445   : > { %v3357_v41 = vpop.f32.mrf.mxu1  ;;  %v3359_v10 = vpop.f32.mrf.mxu3 }
 0x448   : > { %1548 = vmatmul.f32.gmra.mxu1 %v3853_v13  ;;  %1661 = vmatmul.f32.gmra.mxu2 %v3854_v4 }
 0x44a   : > { %1774 = vmatmul.f32.gmra.mxu3 %v3855_v45 }
 0x44b   : > { %v3370_v40 = vpop.f32.mrf.mxu2  ;;  %v1412_v55 = vpop.f32.mrf.mxu0 }
 0x44d   : > { %v3372_v47 = vpop.f32.mrf.mxu1  ;;  %v3374_v15 = vpop.f32.mrf.mxu3 }
 0x450   : > { %1551 = vmatmul.f32.gmra.mxu1 %v3856_v29  ;;  %1664 = vmatmul.f32.gmra.mxu2 %v3857_v57  ;;  %v3879_v57 = vld [vmem:[#allocation60_spill] sm:$0xff] }
 0x452   : > { %1777 = vmatmul.f32.gmra.mxu3 %v3858_v54 }
 0x453   : > { %v3385_v8 = vpop.f32.mrf.mxu2  ;;  %v1415_v36 = vpop.f32.mrf.mxu0 }
 0x455   : > { %v3387_v53 = vpop.f32.mrf.mxu1  ;;  %v3389_v44 = vpop.f32.mrf.mxu3 }
 0x458   : > { %1554 = vmatmul.f32.gmra.mxu1 %v3859_v25  ;;  %1667 = vmatmul.f32.gmra.mxu2 %v3860_v11 }
 0x45a   : > { %1780 = vmatmul.f32.gmra.mxu3 %v3861_v6 }
 0x45b   : > { %v3400_v12 = vpop.f32.mrf.mxu2  ;;  %v1418_v43 = vpop.f32.mrf.mxu0 }
 0x45d   : > { %v3402_v39 = vpop.f32.mrf.mxu1  ;;  %v3404_v7 = vpop.f32.mrf.mxu3 }
 0x460   : > { %1557 = vmatmul.f32.gmra.mxu1 %v3862_v48  ;;  %1670 = vmatmul.f32.gmra.mxu2 %v3863_v35 }
 0x462   : > { %1783 = vmatmul.f32.gmra.mxu3 %v3864_v3  ;;  %v3882_v3 = vld [vmem:[#allocation63_spill] sm:$0xff] }
 0x463   : > { %v3415_v38 = vpop.f32.mrf.mxu2 }
 0x465   : > { %v3417_v31 = vpop.f32.mrf.mxu1  ;;  %v3419_v18 = vpop.f32.mrf.mxu3 }
 0x468   : > { %1560 = vmatmul.f32.gmra.mxu1 %v3865_v24  ;;  %1673 = vmatmul.f32.gmra.mxu2 %v3866_v63 }
 0x46a   : > { %1786 = vmatmul.f32.gmra.mxu3 %v3867_v49 }
 0x46b   : > { %v3427_v52 = vpop.f32.mrf.mxu2 }
 0x46d   : > { %v3429_v9 = vpop.f32.mrf.mxu1  ;;  %v3431_v22 = vpop.f32.mrf.mxu3 }
 0x470   : > { %1563 = vmatmul.f32.gmra.mxu1 %v3868_v60  ;;  %1676 = vmatmul.f32.gmra.mxu2 %v3869_v59  ;;  %v3883_v60 = vld [vmem:[#allocation64_spill] sm:$0xff]  ;;  %v3884_v59 = vld [vmem:[#allocation65_spill] sm:$0xff] }
 0x472   : > { %1789 = vmatmul.f32.gmra.mxu3 %v3870_v42 }
 0x473   : > { %v3436_v17 = vpop.f32.mrf.mxu2 }
 0x475   : > { %v3438_v37 = vpop.f32.mrf.mxu1  ;;  %v3440_v26 = vpop.f32.mrf.mxu3 }
 0x478   : > { %1566 = vmatmul.f32.gmra.mxu1 %v3871_v46  ;;  %1679 = vmatmul.f32.gmra.mxu2 %v3872_v32  ;;  %v3885_v32 = vld [vmem:[#allocation66_spill] sm:$0xff] }
 0x47a   : > { %1792 = vmatmul.f32.gmra.mxu3 %v3873_v23 }
 0x47b   : > { %v3445_v62 = vpop.f32.mrf.mxu2 }
 0x47d   : > { %v3447_v2 = vpop.f32.mrf.mxu3  ;;  %v1522_v61 = vpop.f32.mrf.mxu1 }
 0x47e   : > { %v1523_v30 = vadd.f32 %v1522_v61, %v1409_v28  ;;  %v1421_v28 = vpop.f32.mrf.mxu0 }
 0x480   : > { %1569 = vmatmul.f32.gmra.mxu1 %v3874_v50  ;;  %1682 = vmatmul.f32.gmra.mxu2 %v3875_v1 }
 0x482   : > { %1795 = vmatmul.f32.gmra.mxu3 %v3876_v58  ;;  %v3887_v58 = vld [vmem:[#allocation68_spill] sm:$0xff] }
 0x483   : > { %v1635_v51 = vpop.f32.mrf.mxu2 }
 0x484   : > { %v1636_v33 = vadd.f32 %v1635_v51, %v1523_v30  ;;  %v3886_v30 = vld [vmem:[#allocation67_spill] sm:$0xff] }
 0x485   : > { %v1525_v14 = vpop.f32.mrf.mxu1  ;;  %v1748_v13 = vpop.f32.mrf.mxu3 }
 0x486   : > { %v1749_v4 = vadd.f32 %v1748_v13, %v1636_v33  ;;  %v1526_v29 = vadd.f32 %v1525_v14, %v1412_v55  ;;  %v1424_v33 = vpop.f32.mrf.mxu0  ;;  %v3888_v14 = vld [vmem:[#allocation69_spill] sm:$0xff] }
 0x488   : > { %v1844_v45 = vmax.f32 %v1749_v4, 0.0  ;;  %1572 = vmatmul.f32.gmra.mxu1 %v3877_v5  ;;  %1685 = vmatmul.f32.gmra.mxu2 %v3878_v34 }
 0x48a   : > { %1798 = vmatmul.f32.gmra.mxu3 %v3879_v57  ;;  %1912 = vmatmul.f32.vlgmr.msrb.gmra.mxu0 %v1844_v45  ;;  %v3890_v57 = vld [vmem:[#allocation71_spill] sm:$0xff] }
 0x48b   : > { %v1638_v54 = vpop.f32.mrf.mxu2 }
 0x48c   : > { %v1639_v21 = vadd.f32 %v1638_v54, %v1526_v29  ;;  %v3889_v29 = vld [vmem:[#allocation70_spill] sm:$0xff] }
 0x48d   : > { %v1528_v25 = vpop.f32.mrf.mxu1  ;;  %v1751_v11 = vpop.f32.mrf.mxu3 }
 0x48e   : > { %v1752_v6 = vadd.f32 %v1751_v11, %v1639_v21  ;;  %v1529_v48 = vadd.f32 %v1528_v25, %v1415_v36  ;;  %v1427_v25 = vpop.f32.mrf.mxu0 }
 0x490   : > { %1575 = vmatmul.f32.gmra.mxu1 %v3880_v56  ;;  %1688 = vmatmul.f32.gmra.mxu2 %v3881_v16  ;;  %v1845_v35 = vmax.f32 %v1752_v6, 0.0 }
 0x492   : > { %1801 = vmatmul.f32.gmra.mxu3 %v3882_v3  ;;  %1915 = vmatmul.f32.gmra.mxu0 %v1845_v35  ;;  %v3892_v35 = vld [vmem:[#allocation73_spill] sm:$0xff]  ;;  %v3893_v3 = vld [vmem:[#allocation74_spill] sm:$0xff] }
 0x493   : > { %v1641_v20 = vpop.f32.mrf.mxu2 }
 0x494   : > { %v1642_v24 = vadd.f32 %v1641_v20, %v1529_v48 }
 0x495   : > { %v1531_v63 = vpop.f32.mrf.mxu1  ;;  %v1754_v27 = vpop.f32.mrf.mxu3 }
 0x496   : > { %v1755_v49 = vadd.f32 %v1754_v27, %v1642_v24  ;;  %v1532_v42 = vadd.f32 %v1531_v63, %v1418_v43  ;;  %v3891_v43 = vld [vmem:[#allocation72_spill] sm:$0xff]  ;;  %v3894_v63 = vld [vmem:[#allocation75_spill] sm:$0xff] }
 0x498   : > { %1578 = vmatmul.f32.gmra.mxu1 %v3883_v60  ;;  %1691 = vmatmul.f32.gmra.mxu2 %v3884_v59  ;;  %v1846_v46 = vmax.f32 %v1755_v49, 0.0 }
 0x49a   : > { %1804 = vmatmul.f32.gmra.mxu3 %v3885_v32  ;;  %1918 = vmatmul.f32.gmra.mxu0 %v1846_v46  ;;  %v3895_v46 = vld [vmem:[#allocation76_spill] sm:$0xff]  ;;  %v3896_v32 = vld [vmem:[#allocation77_spill] sm:$0xff] }
 0x49b   : > { %v1644_v55 = vpop.f32.mrf.mxu2 }
 0x49c   : > { %v1645_v23 = vadd.f32 %v1644_v55, %v1532_v42 }
 0x49d   : > { %v1534_v61 = vpop.f32.mrf.mxu1  ;;  %v1757_v50 = vpop.f32.mrf.mxu3 }
 0x49e   : > { %v1758_v1 = vadd.f32 %v1757_v50, %v1645_v23  ;;  %v1535_v36 = vadd.f32 %v1534_v61, %v1421_v28  ;;  %v1430_v28 = vpop.f32.mrf.mxu0  ;;  %v3897_v61 = vld [vmem:[#allocation78_spill] sm:$0xff] }
 0x4a0   : > { %1581 = vmatmul.f32.gmra.mxu1 %v3886_v30  ;;  %1694 = vmatmul.f32.gmra.mxu2 %v3887_v58  ;;  %v1847_v51 = vmax.f32 %v1758_v1, 0.0 }
 0x4a2   : > { %1807 = vmatmul.f32.gmra.mxu3 %v3888_v14  ;;  %1921 = vmatmul.f32.gmra.mxu0 %v1847_v51  ;;  %v3898_v51 = vld [vmem:[#allocation79_spill] sm:$0xff] }
 0x4a3   : > { %v1647_v13 = vpop.f32.mrf.mxu2 }
 0x4a4   : > { %v1648_v4 = vadd.f32 %v1647_v13, %v1535_v36 }
 0x4a5   : > { %v1537_v45 = vpop.f32.mrf.mxu1  ;;  %v1760_v5 = vpop.f32.mrf.mxu3 }
 0x4a6   : > { %v1761_v34 = vadd.f32 %v1760_v5, %v1648_v4  ;;  %v1538_v54 = vadd.f32 %v1537_v45, %v1424_v33  ;;  %v3899_v33 = vld [vmem:[#allocation80_spill] sm:$0xff]  ;;  %v3900_v4 = vld [vmem:[#allocation81_spill] sm:$0xff] }
 0x4a8   : > { %1584 = vmatmul.f32.gmra.mxu1 %v3889_v29  ;;  %1697 = vmatmul.f32.gmra.mxu2 %v3890_v57  ;;  %v1848_v21 = vmax.f32 %v1761_v34, 0.0 }
 0x4aa   : > { %1810 = vmatmul.f32.gmra.mxu3 %v3891_v43  ;;  %1924 = vmatmul.f32.gmra.mxu0 %v1848_v21  ;;  %v3901_v21 = vld [vmem:[#allocation82_spill] sm:$0xff]  ;;  %v3902_v43 = vld [vmem:[#allocation83_spill] sm:$0xff] }
 0x4ab   : > { %v1650_v11 = vpop.f32.mrf.mxu2 }
 0x4ac   : > { %v1651_v6 = vadd.f32 %v1650_v11, %v1538_v54  ;;  %v3903_v11 = vld [vmem:[#allocation84_spill] sm:$0xff] }
 0x4ad   : > { %v1540_v56 = vpop.f32.mrf.mxu1  ;;  %v1763_v16 = vpop.f32.mrf.mxu3 }
 0x4ae   : > { %v1764_v48 = vadd.f32 %v1763_v16, %v1651_v6  ;;  %v1541_v20 = vadd.f32 %v1540_v56, %v1427_v25 }
 0x4b0   : > { %1587 = vmatmul.f32.gmra.mxu1 %v3892_v35  ;;  %1700 = vmatmul.f32.gmra.mxu2 %v3893_v3  ;;  %v1849_v24 = vmax.f32 %v1764_v48, 0.0  ;;  %v3904_v3 = vld [vmem:[#allocation85_spill] sm:$0xff] }
 0x4b2   : > { %1813 = vmatmul.f32.gmra.mxu3 %v3894_v63  ;;  %1927 = vmatmul.f32.gmra.mxu0 %v1849_v24  ;;  %v3906_v63 = vld [vmem:[#allocation87_spill] sm:$0xff] }
 0x4b3   : > { %v1653_v27 = vpop.f32.mrf.mxu2 }
 0x4b4   : > { %v1654_v49 = vadd.f32 %v1653_v27, %v1541_v20  ;;  %v3905_v20 = vld [vmem:[#allocation86_spill] sm:$0xff] }
 0x4b5   : > { %v1543_v60 = vpop.f32.mrf.mxu1  ;;  %v1766_v59 = vpop.f32.mrf.mxu3 }
 0x4b6   : > { %v1767_v42 = vadd.f32 %v1766_v59, %v1654_v49  ;;  %v1544_v55 = vadd.f32 %v1543_v60, %v1430_v28 }
 0x4b8   : > { %1590 = vmatmul.f32.gmra.mxu1 %v3895_v46  ;;  %1703 = vmatmul.f32.gmra.mxu2 %v3896_v32  ;;  %v1850_v23 = vmax.f32 %v1767_v42, 0.0  ;;  %v3907_v42 = vld [vmem:[#allocation88_spill] sm:$0xff]  ;;  %v3908_v46 = vld [vmem:[#allocation89_spill] sm:$0xff] }
 0x4ba   : > { %1816 = vmatmul.f32.gmra.mxu3 %v3897_v61  ;;  %1930 = vmatmul.f32.gmra.mxu0 %v1850_v23 }
 0x4bb   : > { %v1656_v50 = vpop.f32.mrf.mxu2 }
 0x4bc   : > { %v1657_v1 = vadd.f32 %v1656_v50, %v1544_v55  ;;  %v3909_v55 = vld [vmem:[#allocation90_spill] sm:$0xff] }
 0x4bd   : > { %v1546_v30 = vpop.f32.mrf.mxu1  ;;  %v1769_v58 = vpop.f32.mrf.mxu3 }
 0x4be   : > { %v1770_v36 = vadd.f32 %v1769_v58, %v1657_v1  ;;  %v1547_v13 = vadd.f32 %v1546_v30, %v3344_v0  ;;  %v3910_v58 = vld [vmem:[#allocation91_spill] sm:$0xff] }
 0x4c0   : > { %1593 = vmatmul.f32.gmra.mxu1 %v3898_v51  ;;  %1706 = vmatmul.f32.gmra.mxu2 %v3899_v33  ;;  %v1851_v14 = vmax.f32 %v1770_v36, 0.0  ;;  %v3911_v36 = vld [vmem:[#allocation92_spill] sm:$0xff]  ;;  %v3912_v33 = vld [vmem:[#allocation93_spill] sm:$0xff] }
 0x4c2   : > { %1819 = vmatmul.f32.gmra.mxu3 %v3900_v4  ;;  %1933 = vmatmul.f32.gmra.mxu0 %v1851_v14 }
 0x4c3   : > { %v1659_v45 = vpop.f32.mrf.mxu2 }
 0x4c4   : > { %v1660_v5 = vadd.f32 %v1659_v45, %v1547_v13 }
 0x4c5   : > { %v1549_v34 = vpop.f32.mrf.mxu1  ;;  %v1772_v29 = vpop.f32.mrf.mxu3 }
 0x4c6   : > { %v1773_v57 = vadd.f32 %v1772_v29, %v1660_v5  ;;  %v1550_v25 = vadd.f32 %v1549_v34, %v3357_v41  ;;  %v3913_v34 = vld [vmem:[#allocation94_spill] sm:$0xff]  ;;  %v3914_v29 = vld [vmem:[#allocation95_spill] sm:$0xff] }
 0x4c8   : > { %v1852_v54 = vmax.f32 %v1773_v57, 0.0  ;;  %1596 = vmatmul.f32.gmra.mxu1 %v3901_v21  ;;  %1709 = vmatmul.f32.gmra.mxu2 %v3902_v43 }
 0x4ca   : > { %1822 = vmatmul.f32.gmra.mxu3 %v3903_v11  ;;  %1936 = vmatmul.f32.gmra.mxu0 %v1852_v54  ;;  %v3915_v54 = vld [vmem:[#allocation96_spill] sm:$0xff] }
 0x4cb   : > { %v1662_v6 = vpop.f32.mrf.mxu2 }
 0x4cc   : > { %v1663_v0 = vadd.f32 %v1662_v6, %v1550_v25 }
 0x4cd   : > { %v1552_v56 = vpop.f32.mrf.mxu1  ;;  %v1775_v16 = vpop.f32.mrf.mxu3 }
 0x4ce   : > { %v1776_v48 = vadd.f32 %v1775_v16, %v1663_v0  ;;  %v1553_v24 = vadd.f32 %v1552_v56, %v3372_v47  ;;  %v3916_v0 = vld [vmem:[#allocation97_spill] sm:$0xff]  ;;  %v3917_v56 = vld [vmem:[#allocation98_spill] sm:$0xff] }
 0x4d0   : > { %v1853_v35 = vmax.f32 %v1776_v48, 0.0  ;;  %1599 = vmatmul.f32.gmra.mxu1 %v3904_v3  ;;  %1712 = vmatmul.f32.gmra.mxu2 %v3905_v20  ;;  %v3918_v48 = vld [vmem:[#allocation99_spill] sm:$0xff] }
 0x4d2   : > { %1825 = vmatmul.f32.gmra.mxu3 %v3906_v63  ;;  %1939 = vmatmul.f32.gmra.mxu0 %v1853_v35 }
 0x4d3   : > { %v1665_v27 = vpop.f32.mrf.mxu2 }
 0x4d4   : > { %v1666_v41 = vadd.f32 %v1665_v27, %v1553_v24  ;;  %v3919_v27 = vld [vmem:[#allocation101_spill] sm:$0xff] }
 0x4d5   : > { %v1555_v49 = vpop.f32.mrf.mxu1  ;;  %v1778_v28 = vpop.f32.mrf.mxu3 }
 0x4d6   : > { %v1779_v60 = vadd.f32 %v1778_v28, %v1666_v41  ;;  %v1556_v32 = vadd.f32 %v1555_v49, %v3387_v53  ;;  %v3920_v41 = vld [vmem:[#allocation102_spill] sm:$0xff]  ;;  %v3921_v28 = vld [vmem:[#allocation103_spill] sm:$0xff] }
 0x4d8   : > { %v1854_v59 = vmax.f32 %v1779_v60, 0.0  ;;  %1602 = vmatmul.f32.gmra.mxu1 %v3907_v42  ;;  %1715 = vmatmul.f32.gmra.mxu2 %v3908_v46 }
 0x4da   : > { %1828 = vmatmul.f32.gmra.mxu3 %v3909_v55  ;;  %1942 = vmatmul.f32.gmra.mxu0 %v1854_v59 }
 0x4db   : > { %v1668_v23 = vpop.f32.mrf.mxu2 }
 0x4dc   : > { %v1669_v47 = vadd.f32 %v1668_v23, %v1556_v32 }
 0x4dd   : > { %v1558_v61 = vpop.f32.mrf.mxu1  ;;  %v1781_v50 = vpop.f32.mrf.mxu3 }
 0x4de   : > { %v1782_v1 = vadd.f32 %v1781_v50, %v1669_v47  ;;  %v1559_v51 = vadd.f32 %v1558_v61, %v3402_v39  ;;  %v3509_v61 = vld [vmem:[%s3617_s6] ss:$0 sm:$0xff] }
 0x4e0   : > { %v1855_v30 = vmax.f32 %v1782_v1, 0.0  ;;  %1605 = vmatmul.f32.gmra.mxu1 %v3910_v58  ;;  %1718 = vmatmul.f32.gmra.mxu2 %v3911_v36 }
 0x4e2   : > { %1831 = vmatmul.f32.gmra.mxu3 %v3912_v33  ;;  %1945 = vmatmul.f32.gmra.mxu0 %v1855_v30 }
 0x4e3   : > { %v1671_v14 = vpop.f32.mrf.mxu2 }
 0x4e4   : > { %v1672_v53 = vadd.f32 %v1671_v14, %v1559_v51 }
 0x4e5   : > { %v1561_v13 = vpop.f32.mrf.mxu1  ;;  %v1784_v4 = vpop.f32.mrf.mxu3 }
 0x4e6   : > { %v1785_v45 = vadd.f32 %v1784_v4, %v1672_v53  ;;  %v1562_v57 = vadd.f32 %v1561_v13, %v3417_v31 }
 0x4e8   : > { %v1856_v5 = vmax.f32 %v1785_v45, 0.0  ;;  %1608 = vmatmul.f32.gmra.mxu1 %v3913_v34  ;;  %1721 = vmatmul.f32.gmra.mxu2 %v3914_v29 }
 0x4ea   : > { %1834 = vmatmul.f32.gmra.mxu3 %v3915_v54  ;;  %1948 = vmatmul.f32.gmra.mxu0 %v1856_v5 }
 0x4eb   : > { %v1674_v21 = vpop.f32.mrf.mxu2 }
 0x4ec   : > { %v1675_v39 = vadd.f32 %v1674_v21, %v1562_v57 }
 0x4ed   : > { %v1564_v43 = vpop.f32.mrf.mxu1  ;;  %v1787_v25 = vpop.f32.mrf.mxu3 }
 0x4ee   : > { %v1788_v11 = vadd.f32 %v1787_v25, %v1675_v39  ;;  %v1565_v16 = vadd.f32 %v1564_v43, %v3429_v9 }
 0x4f0   : > { %v1857_v6 = vmax.f32 %v1788_v11, 0.0  ;;  %1611 = vmatmul.f32.gmra.mxu1 %v3916_v0  ;;  %1724 = vmatmul.f32.gmra.mxu2 %v3917_v56 }
 0x4f2   : > { %1837 = vmatmul.f32.gmra.mxu3 %v3918_v48  ;;  %1951 = vmatmul.f32.gmra.mxu0 %v1857_v6 }
 0x4f3   : > { %v1677_v35 = vpop.f32.mrf.mxu2 }
 0x4f4   : > { %v1678_v31 = vadd.f32 %v1677_v35, %v1565_v16 }
 0x4f5   : > { %v1567_v3 = vpop.f32.mrf.mxu1  ;;  %v1790_v20 = vpop.f32.mrf.mxu3 }
 0x4f6   : > { %v1791_v24 = vadd.f32 %v1790_v20, %v1678_v31  ;;  %v1568_v49 = vadd.f32 %v1567_v3, %v3438_v37 }
 0x4f8   : > { %v1858_v63 = vmax.f32 %v1791_v24, 0.0  ;;  %1614 = vmatmul.f32.gmra.mxu1 %v3919_v27  ;;  %1727 = vmatmul.f32.gmra.mxu2 %v3920_v41 }
 0x4fa   : > { %1840 = vmatmul.f32.gmra.mxu3 %v3921_v28  ;;  %1954 = vmatmul.f32.gmra.mxu0 %v1858_v63 }
 0x4fb   : > { %v1680_v9 = vpop.f32.mrf.mxu2 }
 0x4fc   : > { %v1681_v60 = vadd.f32 %v1680_v9, %v1568_v49 }
 0x4fd   : > { %v1570_v59 = vpop.f32.mrf.mxu1  ;;  %v1793_v42 = vpop.f32.mrf.mxu3 }
 0x4fe   : > { %v1794_v46 = vadd.f32 %v1793_v42, %v1681_v60  ;;  %v1571_v55 = vadd.f32 %v1570_v59, %v3355_v19 }
 0x500   : > { %v1859_v32 = vmax.f32 %v1794_v46, 0.0 }
 0x502   : > { %1957 = vmatmul.f32.gmra.mxu0 %v1859_v32 }
 0x503   : > { %v1683_v23 = vpop.f32.mrf.mxu2 }
 0x504   : > { %v1684_v47 = vadd.f32 %v1683_v23, %v1571_v55 }
 0x505   : > { %v1573_v37 = vpop.f32.mrf.mxu1  ;;  %v1796_v50 = vpop.f32.mrf.mxu3 }
 0x506   : > { %v1797_v1 = vadd.f32 %v1796_v50, %v1684_v47  ;;  %v1574_v36 = vadd.f32 %v1573_v37, %v3370_v40 }
 0x507   : > { %v1913_v30 = vpop.f32.mrf.mxu0 }
 0x508   : > { %v1860_v19 = vmax.f32 %v1797_v1, 0.0  ;;  %v1914_v58 = vadd.f32 %v3509_v61, %v1913_v30 }
 0x50a   : > { %2010 = vst [vmem:[%s3515_s22] sm:$0xff] %v1914_v58  ;;  %1960 = vmatmul.f32.gmra.mxu0 %v1860_v19 }
 0x50b   : > { %v1686_v51 = vpop.f32.mrf.mxu2 }
 0x50c   : > { %v1687_v33 = vadd.f32 %v1686_v51, %v1574_v36 }
 0x50d   : > { %v1576_v14 = vpop.f32.mrf.mxu1  ;;  %v1799_v53 = vpop.f32.mrf.mxu3 }
 0x50e   : > { %v1800_v13 = vadd.f32 %v1799_v53, %v1687_v33  ;;  %v1577_v34 = vadd.f32 %v1576_v14, %v3385_v8 }
 0x50f   : > { %v1916_v4 = vpop.f32.mrf.mxu0 }
 0x510   : > { %v1861_v45 = vmax.f32 %v1800_v13, 0.0  ;;  %v1917_v5 = vadd.f32 %v3509_v61, %v1916_v4 }
 0x512   : > { %2011 = vst [vmem:[%s3515_s22 + $0x8] sm:$0xff] %v1917_v5  ;;  %1963 = vmatmul.f32.gmra.mxu0 %v1861_v45 }
 0x513   : > { %v1689_v29 = vpop.f32.mrf.mxu2 }
 0x514   : > { %v1690_v57 = vadd.f32 %v1689_v29, %v1577_v34 }
 0x515   : > { %v1579_v54 = vpop.f32.mrf.mxu1  ;;  %v1802_v40 = vpop.f32.mrf.mxu3 }
 0x516   : > { %v1803_v21 = vadd.f32 %v1802_v40, %v1690_v57  ;;  %v1580_v11 = vadd.f32 %v1579_v54, %v3400_v12 }
 0x517   : > { %v1919_v39 = vpop.f32.mrf.mxu0 }
 0x518   : > { %v1862_v43 = vmax.f32 %v1803_v21, 0.0  ;;  %v1920_v25 = vadd.f32 %v3509_v61, %v1919_v39 }
 0x51a   : > { %2012 = vst [vmem:[%s3515_s22 + $0x10] sm:$0xff] %v1920_v25  ;;  %1966 = vmatmul.f32.gmra.mxu0 %v1862_v43 }
 0x51b   : > { %v1692_v6 = vpop.f32.mrf.mxu2 }
 0x51c   : > { %v1693_v0 = vadd.f32 %v1692_v6, %v1580_v11 }
 0x51d   : > { %v1582_v56 = vpop.f32.mrf.mxu1  ;;  %v1805_v8 = vpop.f32.mrf.mxu3 }
 0x51e   : > { %v1806_v16 = vadd.f32 %v1805_v8, %v1693_v0  ;;  %v1583_v3 = vadd.f32 %v1582_v56, %v3415_v38 }
 0x51f   : > { %v1922_v48 = vpop.f32.mrf.mxu0 }
 0x520   : > { %v1863_v35 = vmax.f32 %v1806_v16, 0.0  ;;  %v1923_v31 = vadd.f32 %v3509_v61, %v1922_v48 }
 0x522   : > { %2013 = vst [vmem:[%s3515_s22 + $0x18] sm:$0xff] %v1923_v31  ;;  %1969 = vmatmul.f32.gmra.mxu0 %v1863_v35 }
 0x523   : > { %v1695_v20 = vpop.f32.mrf.mxu2 }
 0x524   : > { %v1696_v24 = vadd.f32 %v1695_v20, %v1583_v3 }
 0x525   : > { %v1585_v63 = vpop.f32.mrf.mxu1  ;;  %v1808_v12 = vpop.f32.mrf.mxu3 }
 0x526   : > { %v1809_v27 = vadd.f32 %v1808_v12, %v1696_v24  ;;  %v1586_v9 = vadd.f32 %v1585_v63, %v3427_v52 }
 0x527   : > { %v1925_v41 = vpop.f32.mrf.mxu0 }
 0x528   : > { %v1864_v49 = vmax.f32 %v1809_v27, 0.0  ;;  %v1926_v28 = vadd.f32 %v3509_v61, %v1925_v41 }
 0x52a   : > { %2014 = vst [vmem:[%s3515_s22 + $0x20] sm:$0xff] %v1926_v28  ;;  %1972 = vmatmul.f32.gmra.mxu0 %v1864_v49 }
 0x52b   : > { %v1698_v60 = vpop.f32.mrf.mxu2 }
 0x52c   : > { %v1699_v59 = vadd.f32 %v1698_v60, %v1586_v9 }
 0x52d   : > { %v1588_v42 = vpop.f32.mrf.mxu1  ;;  %v1811_v38 = vpop.f32.mrf.mxu3 }
 0x52e   : > { %v1812_v46 = vadd.f32 %v1811_v38, %v1699_v59  ;;  %v1589_v47 = vadd.f32 %v1588_v42, %v3436_v17 }
 0x52f   : > { %v1928_v32 = vpop.f32.mrf.mxu0 }
 0x530   : > { %v1865_v55 = vmax.f32 %v1812_v46, 0.0  ;;  %v1929_v23 = vadd.f32 %v3509_v61, %v1928_v32 }
 0x532   : > { %2015 = vst [vmem:[%s3515_s22 + $0x28] sm:$0xff] %v1929_v23  ;;  %1975 = vmatmul.f32.gmra.mxu0 %v1865_v55 }
 0x533   : > { %v1701_v37 = vpop.f32.mrf.mxu2 }
 0x534   : > { %v1702_v50 = vadd.f32 %v1701_v37, %v1589_v47 }
 0x535   : > { %v1591_v1 = vpop.f32.mrf.mxu1  ;;  %v1814_v52 = vpop.f32.mrf.mxu3 }
 0x536   : > { %v1815_v30 = vadd.f32 %v1814_v52, %v1702_v50  ;;  %v1592_v51 = vadd.f32 %v1591_v1, %v3445_v62 }
 0x537   : > { %v1931_v19 = vpop.f32.mrf.mxu0 }
 0x538   : > { %v1866_v58 = vmax.f32 %v1815_v30, 0.0  ;;  %v1932_v36 = vadd.f32 %v3509_v61, %v1931_v19 }
 0x53a   : > { %2016 = vst [vmem:[%s3515_s22 + $0x30] sm:$0xff] %v1932_v36  ;;  %1978 = vmatmul.f32.gmra.mxu0 %v1866_v58 }
 0x53b   : > { %v1704_v33 = vpop.f32.mrf.mxu2 }
 0x53c   : > { %v1705_v14 = vadd.f32 %v1704_v33, %v1592_v51 }
 0x53d   : > { %v1594_v53 = vpop.f32.mrf.mxu1  ;;  %v1817_v17 = vpop.f32.mrf.mxu3 }
 0x53e   : > { %v1818_v13 = vadd.f32 %v1817_v17, %v1705_v14  ;;  %v1595_v34 = vadd.f32 %v1594_v53, %v3359_v10 }
 0x53f   : > { %v1934_v4 = vpop.f32.mrf.mxu0 }
 0x540   : > { %v1867_v45 = vmax.f32 %v1818_v13, 0.0  ;;  %v1935_v5 = vadd.f32 %v3509_v61, %v1934_v4 }
 0x542   : > { %2017 = vst [vmem:[%s3515_s22 + $0x38] sm:$0xff] %v1935_v5  ;;  %1981 = vmatmul.f32.gmra.mxu0 %v1867_v45 }
 0x543   : > { %v1707_v29 = vpop.f32.mrf.mxu2 }
 0x544   : > { %v1708_v57 = vadd.f32 %v1707_v29, %v1595_v34 }
 0x545   : > { %v1597_v54 = vpop.f32.mrf.mxu1  ;;  %v1820_v62 = vpop.f32.mrf.mxu3 }
 0x546   : > { %v1821_v40 = vadd.f32 %v1820_v62, %v1708_v57  ;;  %v1598_v25 = vadd.f32 %v1597_v54, %v3374_v15 }
 0x547   : > { %v1937_v21 = vpop.f32.mrf.mxu0 }
 0x548   : > { %v1868_v39 = vmax.f32 %v1821_v40, 0.0  ;;  %v1938_v43 = vadd.f32 %v3509_v61, %v1937_v21 }
 0x54a   : > { %2018 = vst [vmem:[%s3515_s22 + $0x40] sm:$0xff] %v1938_v43  ;;  %1984 = vmatmul.f32.gmra.mxu0 %v1868_v39 }
 0x54b   : > { %v1710_v11 = vpop.f32.mrf.mxu2 }
 0x54c   : > { %v1711_v6 = vadd.f32 %v1710_v11, %v1598_v25 }
 0x54d   : > { %v1600_v0 = vpop.f32.mrf.mxu1  ;;  %v1823_v10 = vpop.f32.mrf.mxu3 }
 0x54e   : > { %v1824_v56 = vadd.f32 %v1823_v10, %v1711_v6  ;;  %v1601_v35 = vadd.f32 %v1600_v0, %v3389_v44 }
 0x54f   : > { %v1940_v8 = vpop.f32.mrf.mxu0 }
 0x550   : > { %v1869_v16 = vmax.f32 %v1824_v56, 0.0  ;;  %v1941_v48 = vadd.f32 %v3509_v61, %v1940_v8 }
 0x552   : > { %2019 = vst [vmem:[%s3515_s22 + $0x48] sm:$0xff] %v1941_v48  ;;  %1987 = vmatmul.f32.gmra.mxu0 %v1869_v16 }
 0x553   : > { %v1713_v31 = vpop.f32.mrf.mxu2 }
 0x554   : > { %v1714_v3 = vadd.f32 %v1713_v31, %v1601_v35 }
 0x555   : > { %v1603_v20 = vpop.f32.mrf.mxu1  ;;  %v1826_v15 = vpop.f32.mrf.mxu3 }
 0x556   : > { %v1827_v24 = vadd.f32 %v1826_v15, %v1714_v3  ;;  %v1604_v41 = vadd.f32 %v1603_v20, %v3404_v7 }
 0x557   : > { %v1943_v63 = vpop.f32.mrf.mxu0 }
 0x558   : > { %v1870_v12 = vmax.f32 %v1827_v24, 0.0  ;;  %v1944_v27 = vadd.f32 %v3509_v61, %v1943_v63 }
 0x55a   : > { %2020 = vst [vmem:[%s3515_s22 + $0x50] sm:$0xff] %v1944_v27  ;;  %1990 = vmatmul.f32.gmra.mxu0 %v1870_v12 }
 0x55b   : > { %v1716_v49 = vpop.f32.mrf.mxu2 }
 0x55c   : > { %v1717_v28 = vadd.f32 %v1716_v49, %v1604_v41 }
 0x55d   : > { %v1606_v9 = vpop.f32.mrf.mxu1  ;;  %v1829_v44 = vpop.f32.mrf.mxu3 }
 0x55e   : > { %v1830_v60 = vadd.f32 %v1829_v44, %v1717_v28  ;;  %v1607_v46 = vadd.f32 %v1606_v9, %v3419_v18 }
 0x55f   : > { %v1946_v59 = vpop.f32.mrf.mxu0 }
 0x560   : > { %v1871_v42 = vmax.f32 %v1830_v60, 0.0  ;;  %v1947_v38 = vadd.f32 %v3509_v61, %v1946_v59 }
 0x562   : > { %2021 = vst [vmem:[%s3515_s22 + $0x58] sm:$0xff] %v1947_v38  ;;  %1993 = vmatmul.f32.gmra.mxu0 %v1871_v42 }
 0x563   : > { %v1719_v32 = vpop.f32.mrf.mxu2 }
 0x564   : > { %v1720_v55 = vadd.f32 %v1719_v32, %v1607_v46 }
 0x565   : > { %v1609_v23 = vpop.f32.mrf.mxu1  ;;  %v1832_v7 = vpop.f32.mrf.mxu3 }
 0x566   : > { %v1833_v47 = vadd.f32 %v1832_v7, %v1720_v55  ;;  %v1610_v52 = vadd.f32 %v1609_v23, %v3431_v22 }
 0x567   : > { %v1949_v37 = vpop.f32.mrf.mxu0 }
 0x568   : > { %v1872_v50 = vmax.f32 %v1833_v47, 0.0  ;;  %v1950_v1 = vadd.f32 %v3509_v61, %v1949_v37 }
 0x56a   : > { %2022 = vst [vmem:[%s3515_s22 + $0x60] sm:$0xff] %v1950_v1  ;;  %1996 = vmatmul.f32.gmra.mxu0 %v1872_v50 }
 0x56b   : > { %v1722_v30 = vpop.f32.mrf.mxu2 }
 0x56c   : > { %v1723_v19 = vadd.f32 %v1722_v30, %v1610_v52 }
 0x56d   : > { %v1612_v58 = vpop.f32.mrf.mxu1  ;;  %v1835_v18 = vpop.f32.mrf.mxu3 }
 0x56e   : > { %v1836_v36 = vadd.f32 %v1835_v18, %v1723_v19  ;;  %v1613_v53 = vadd.f32 %v1612_v58, %v3440_v26 }
 0x56f   : > { %v1952_v51 = vpop.f32.mrf.mxu0 }
 0x570   : > { %v1873_v33 = vmax.f32 %v1836_v36, 0.0  ;;  %v1953_v14 = vadd.f32 %v3509_v61, %v1952_v51 }
 0x572   : > { %2023 = vst [vmem:[%s3515_s22 + $0x68] sm:$0xff] %v1953_v14  ;;  %1999 = vmatmul.f32.gmra.mxu0 %v1873_v33 }
 0x573   : > { %v1725_v17 = vpop.f32.mrf.mxu2 }
 0x574   : > { %v1726_v13 = vadd.f32 %v1725_v17, %v1613_v53 }
 0x575   : > { %v1838_v4 = vpop.f32.mrf.mxu3  ;;  %v1615_v45 = vpop.f32.mrf.mxu1 }
 0x576   : > { %v1839_v22 = vadd.f32 %v1838_v4, %v1726_v13  ;;  %v1616_v57 = vadd.f32 %v1615_v45, %v3447_v2 }
 0x577   : > { %v1955_v5 = vpop.f32.mrf.mxu0 }
 0x578   : > { %v1874_v34 = vmax.f32 %v1839_v22, 0.0  ;;  %v1956_v29 = vadd.f32 %v3509_v61, %v1955_v5 }
 0x57a   : > { %2024 = vst [vmem:[%s3515_s22 + $0x70] sm:$0xff] %v1956_v29  ;;  %2002 = vmatmul.f32.gmra.mxu0 %v1874_v34 }
 0x57b   : > { %v1728_v54 = vpop.f32.mrf.mxu2 }
 0x57c   : > { %v1729_v26 = vadd.f32 %v1728_v54, %v1616_v57 }
 0x57d   : > { %v1841_v62 = vpop.f32.mrf.mxu3 }
 0x57e   : > { %v1842_v40 = vadd.f32 %v1841_v62, %v1729_v26 }
 0x57f   : > { %v1958_v21 = vpop.f32.mrf.mxu0 }
 0x580   : > { %v1875_v39 = vmax.f32 %v1842_v40, 0.0  ;;  %v1959_v43 = vadd.f32 %v3509_v61, %v1958_v21 }
 0x582   : > { %2025 = vst [vmem:[%s3515_s22 + $0x78] sm:$0xff] %v1959_v43  ;;  %2005 = vmatmul.f32.gmra.mxu0 %v1875_v39 }
 0x587   : > { %v1961_v25 = vpop.f32.mrf.mxu0 }
 0x588   : > { %v1962_v11 = vadd.f32 %v3509_v61, %v1961_v25 }
 0x58a   : > { %2026 = vst [vmem:[%s3515_s22 + $0x80] sm:$0xff] %v1962_v11 }
 0x58f   : > { %v1964_v2 = vpop.f32.mrf.mxu0 }
 0x590   : > { %v1965_v6 = vadd.f32 %v3509_v61, %v1964_v2 }
 0x592   : > { %2027 = vst [vmem:[%s3515_s22 + $0x88] sm:$0xff] %v1965_v6 }
 0x597   : > { %v1967_v0 = vpop.f32.mrf.mxu0 }
 0x598   : > { %v1968_v10 = vadd.f32 %v3509_v61, %v1967_v0 }
 0x59a   : > { %2028 = vst [vmem:[%s3515_s22 + $0x90] sm:$0xff] %v1968_v10 }
 0x59f   : > { %v1970_v56 = vpop.f32.mrf.mxu0 }
 0x5a0   : > { %v1971_v8 = vadd.f32 %v3509_v61, %v1970_v56 }
 0x5a2   : > { %2029 = vst [vmem:[%s3515_s22 + $0x98] sm:$0xff] %v1971_v8 }
 0x5a7   : > { %v1973_v16 = vpop.f32.mrf.mxu0 }
 0x5a8   : > { %v1974_v48 = vadd.f32 %v3509_v61, %v1973_v16 }
 0x5aa   : > { %2030 = vst [vmem:[%s3515_s22 + $0xa0] sm:$0xff] %v1974_v48 }
 0x5af   : > { %v1976_v35 = vpop.f32.mrf.mxu0 }
 0x5b0   : > { %v1977_v31 = vadd.f32 %v3509_v61, %v1976_v35 }
 0x5b2   : > { %2031 = vst [vmem:[%s3515_s22 + $0xa8] sm:$0xff] %v1977_v31 }
 0x5b7   : > { %v1979_v3 = vpop.f32.mrf.mxu0 }
 0x5b8   : > { %v1980_v20 = vadd.f32 %v3509_v61, %v1979_v3 }
 0x5ba   : > { %2032 = vst [vmem:[%s3515_s22 + $0xb0] sm:$0xff] %v1980_v20 }
 0x5bf   : > { %v1982_v15 = vpop.f32.mrf.mxu0 }
 0x5c0   : > { %v1983_v24 = vadd.f32 %v3509_v61, %v1982_v15 }
 0x5c2   : > { %2033 = vst [vmem:[%s3515_s22 + $0xb8] sm:$0xff] %v1983_v24 }
 0x5c7   : > { %v1985_v63 = vpop.f32.mrf.mxu0 }
 0x5c8   : > { %v1986_v12 = vadd.f32 %v3509_v61, %v1985_v63 }
 0x5ca   : > { %2034 = vst [vmem:[%s3515_s22 + $0xc0] sm:$0xff] %v1986_v12 }
 0x5cf   : > { %v1988_v27 = vpop.f32.mrf.mxu0 }
 0x5d0   : > { %v1989_v41 = vadd.f32 %v3509_v61, %v1988_v27 }
 0x5d2   : > { %2035 = vst [vmem:[%s3515_s22 + $0xc8] sm:$0xff] %v1989_v41 }
 0x5d7   : > { %v1991_v49 = vpop.f32.mrf.mxu0 }
 0x5d8   : > { %v1992_v28 = vadd.f32 %v3509_v61, %v1991_v49 }
 0x5da   : > { %2036 = vst [vmem:[%s3515_s22 + $0xd0] sm:$0xff] %v1992_v28 }
 0x5df   : > { %v1994_v9 = vpop.f32.mrf.mxu0 }
 0x5e0   : > { %v1995_v44 = vadd.f32 %v3509_v61, %v1994_v9 }
 0x5e2   : > { %2037 = vst [vmem:[%s3515_s22 + $0xd8] sm:$0xff] %v1995_v44 }
 0x5e7   : > { %v1997_v60 = vpop.f32.mrf.mxu0 }
 0x5e8   : > { %v1998_v59 = vadd.f32 %v3509_v61, %v1997_v60 }
 0x5ea   : > { %2038 = vst [vmem:[%s3515_s22 + $0xe0] sm:$0xff] %v1998_v59 }
 0x5ef   : > { %v2000_v42 = vpop.f32.mrf.mxu0 }
 0x5f0   : > { %v2001_v38 = vadd.f32 %v3509_v61, %v2000_v42 }
 0x5f2   : > { %2039 = vst [vmem:[%s3515_s22 + $0xe8] sm:$0xff] %v2001_v38 }
 0x5f7   : > { %v2003_v46 = vpop.f32.mrf.mxu0 }
 0x5f8   : > { %v2004_v32 = vadd.f32 %v3509_v61, %v2003_v46 }
 0x5fa   : > { %2040 = vst [vmem:[%s3515_s22 + $0xf0] sm:$0xff] %v2004_v32 }
 0x5ff   : > { %v2006_v55 = vpop.f32.mrf.mxu0 }
 0x600   : > { %v2007_v23 = vadd.f32 %v3509_v61, %v2006_v55 }
 0x602   : > { %2041 = vst [vmem:[%s3515_s22 + $0xf8] sm:$0xff] %v2007_v23 }
 0x603 PF: > { %s17_s28 = sadd.s32 1, %s2279_s28   ;;  %s3922_s24 = smov %s2271_s26 }
 0x604   : > { %p14_p7 = scmp.ge.s32.totalorder %s17_s28, 6   ;;  %s3923_s25 = smov %s2275_s27 }
 0x605   : > { %s3924_s26 = smov %s3927_s29  ;;  %s3925_s27 = smov %s3931_s30 }
 0x606   :  { %16 = sbr.rel (!%p14_p7) target bundleno = 3 (0x3), region = 82 }

</bundles_post_ra>
